<compile_context>
chip_gen: v7x
topology: tpu7x:2x2x1
jax: 0.10.0
libtpu: 0.0.40
codegen_flags: <defaults>
</compile_context>

<pallas_src>
import functools

import jax
import jax.numpy as jnp
from jax.experimental import pallas as pl
from jax.experimental.pallas import tpu as pltpu

F_PAD = 128               # every hidden feature dim padded to one 128-lane width
FUSED_MAX_NODES = 2048    # n_pad up to which the whole net runs as one VMEM kernel


def _round_up(x, m):
    return ((x + m - 1) // m) * m


# ---------------------------------------------------------------------------
# Fully fused small-N path: 3x SAGE + mean-pool + Linear + log_softmax in one
# grid-less kernel.  All operands stay resident in VMEM for the whole call.
# ---------------------------------------------------------------------------
def _fused_kernel(m_ref, scale_ref, x_ref, w1_ref, b1_ref, w2_ref, b2_ref,
                  w3_ref, b3_ref, p_ref, wl_ref, bl_ref, out_ref):
    m_bf = m_ref[...].astype(jnp.bfloat16)        # int8 edge counts -> bf16
    scale = scale_ref[...]                        # (n_pad, 1) f32, 1/deg

    def sage(h, w_ref, b_ref):
        # mean aggregation = diag(1/deg) @ (M @ h): exact counts, f32 scale.
        agg = jnp.dot(m_bf, h, preferred_element_type=jnp.float32) * scale
        # fused projection (A@h)@Wl + h@Wr as two K=128 MXU pushes on static
        # ref slices of the stacked weight (no concat materialisation).
        out = jnp.dot(agg.astype(jnp.bfloat16), w_ref[pl.ds(0, F_PAD), :],
                      preferred_element_type=jnp.float32)
        out += jnp.dot(h, w_ref[pl.ds(F_PAD, F_PAD), :],
                       preferred_element_type=jnp.float32)
        out += b_ref[...]                                   # f32 epilogue
        return jnp.maximum(out, 0.0).astype(jnp.bfloat16)   # ReLU

    h = sage(x_ref[...], w1_ref, b1_ref)
    h = sage(h, w2_ref, b2_ref)
    h = sage(h, w3_ref, b3_ref)

    # global_mean_pool -> (dropout = identity at inference) -> Linear
    pooled = jnp.dot(p_ref[...], h, preferred_element_type=jnp.float32)
    logits = jnp.dot(pooled, wl_ref[...],
                     preferred_element_type=jnp.float32) + bl_ref[...]
    # log_softmax
    mx = jnp.max(logits, axis=1, keepdims=True)
    shifted = logits - mx
    out_ref[...] = shifted - jnp.log(
        jnp.sum(jnp.exp(shifted), axis=1, keepdims=True))


def _fused_forward(m_i8, inv_deg, x_pad, p_pad, params):
    (w1, b1, w2, b2, w3, b3, w_lin, b_lin) = params
    g = p_pad.shape[0]
    c = w_lin.shape[1]
    vmem = pl.BlockSpec(memory_space=pltpu.MemorySpace.VMEM)
    return pl.pallas_call(
        _fused_kernel,
        out_shape=jax.ShapeDtypeStruct((g, c), jnp.float32),
        in_specs=[vmem] * 12,
        out_specs=vmem,
        compiler_params=pltpu.CompilerParams(vmem_limit_bytes=32 * 1024 * 1024),
    )(m_i8, inv_deg, x_pad, w1, b1, w2, b2, w3, b3, p_pad, w_lin, b_lin)


# ---------------------------------------------------------------------------
# Tiled large-N fallback: one SAGE layer
#   relu( (1/deg) * (M @ h) @ Wl + h @ Wr + b )
# ---------------------------------------------------------------------------
def _sage_layer_kernel(m_ref, h_ref, scale_ref, w_ref, b_ref, out_ref, acc_ref,
                       *, tm, tk):
    i = pl.program_id(0)
    k = pl.program_id(1)

    @pl.when(k == 0)
    def _():
        acc_ref[...] = jnp.zeros_like(acc_ref)

    # Neighbour slice of the VMEM-resident h (no per-row-tile re-streaming).
    kk = pl.multiple_of(k * tk, tk)
    hk = h_ref[pl.ds(kk, tk), :]
    # int8 edge-count tile -> bf16 on the VPU (slack), f32 MXU accumulation.
    acc_ref[...] += jnp.dot(m_ref[...].astype(jnp.bfloat16), hk,
                            preferred_element_type=jnp.float32)

    @pl.when(k == pl.num_programs(1) - 1)
    def _():
        ii = pl.multiple_of(i * tm, tm)
        hi = h_ref[pl.ds(ii, tm), :]
        agg = (acc_ref[...] * scale_ref[...]).astype(jnp.bfloat16)
        out = jnp.dot(agg, w_ref[pl.ds(0, F_PAD), :],
                      preferred_element_type=jnp.float32)
        out += jnp.dot(hi, w_ref[pl.ds(F_PAD, F_PAD), :],
                       preferred_element_type=jnp.float32)
        out += b_ref[...]                                        # f32 epilogue
        out_ref[...] = jnp.maximum(out, 0.0).astype(out_ref.dtype)  # ReLU


def _sage_layer(h, m_i8, inv_deg, w_stacked, b, *, tm, tk):
    # TODO(synk): for n_pad where the resident h itself no longer fits VMEM,
    # fall back to streaming h tiles (previous version's scheme).
    n_pad = h.shape[0]
    grid = (n_pad // tm, n_pad // tk)
    est_vmem = (2 * tm * tk                      # int8 M tiles, double buffered
                + 2 * n_pad * F_PAD * 2          # resident h (bf16)
                + 2 * tm * F_PAD * 2             # out tiles (bf16)
                + tm * F_PAD * 4                 # f32 accumulator
                + 2 * 2 * F_PAD * F_PAD * 2      # stacked weights (bf16)
                + 2 * tm * 4 + 2 * F_PAD * 4)    # scale + bias
    vmem_limit = int(min(max(2 * est_vmem, 32 * 1024 * 1024), 56 * 1024 * 1024))
    cost = pl.CostEstimate(
        flops=2 * n_pad * n_pad * F_PAD + 2 * n_pad * (2 * F_PAD) * F_PAD,
        transcendentals=0,
        bytes_accessed=(m_i8.size + 2 * h.size * 2 + w_stacked.size * 2
                        + b.size * 4 + inv_deg.size * 4),
    )
    kernel = functools.partial(_sage_layer_kernel, tm=tm, tk=tk)
    return pl.pallas_call(
        kernel,
        out_shape=jax.ShapeDtypeStruct((n_pad, F_PAD), jnp.bfloat16),
        grid_spec=pltpu.PrefetchScalarGridSpec(
            num_scalar_prefetch=0,
            grid=grid,
            in_specs=[
                pl.BlockSpec((tm, tk), lambda i, k: (i, k)),            # M tile (int8)
                pl.BlockSpec((n_pad, F_PAD), lambda i, k: (0, 0)),      # resident h
                pl.BlockSpec((tm, 1), lambda i, k: (i, 0)),             # 1/deg rows
                pl.BlockSpec((2 * F_PAD, F_PAD), lambda i, k: (0, 0)),  # [Wl;Wr]
                pl.BlockSpec((1, F_PAD), lambda i, k: (0, 0)),          # bias
            ],
            out_specs=pl.BlockSpec((tm, F_PAD), lambda i, k: (i, 0)),
            scratch_shapes=[pltpu.VMEM((tm, F_PAD), jnp.float32)],
        ),
        compiler_params=pltpu.CompilerParams(
            dimension_semantics=("parallel", "arbitrary"),
            vmem_limit_bytes=vmem_limit),
        cost_estimate=cost,
    )(m_i8, h, inv_deg, w_stacked, b)


# ---------------------------------------------------------------------------
# Tiled head: global_mean_pool (n-tiled, f32 accumulator) -> Linear
#             -> log_softmax.  (dropout = identity at inference)
# ---------------------------------------------------------------------------
def _head_kernel(h_ref, p_ref, w_ref, b_ref, out_ref, acc_ref):
    k = pl.program_id(0)

    @pl.when(k == 0)
    def _():
        acc_ref[...] = jnp.zeros_like(acc_ref)

    acc_ref[...] += jnp.dot(p_ref[...], h_ref[...],
                            preferred_element_type=jnp.float32)

    @pl.when(k == pl.num_programs(0) - 1)
    def _():
        logits = jnp.dot(acc_ref[...], w_ref[...],
                         preferred_element_type=jnp.float32) + b_ref[...]
        mx = jnp.max(logits, axis=1, keepdims=True)
        shifted = logits - mx
        out_ref[...] = shifted - jnp.log(
            jnp.sum(jnp.exp(shifted), axis=1, keepdims=True))


def _head(h, p_pad, w_lin, b_lin, *, tn):
    n_pad = h.shape[0]
    g = p_pad.shape[0]
    c = w_lin.shape[1]
    return pl.pallas_call(
        _head_kernel,
        out_shape=jax.ShapeDtypeStruct((g, c), jnp.float32),
        grid_spec=pltpu.PrefetchScalarGridSpec(
            num_scalar_prefetch=0,
            grid=(n_pad // tn,),
            in_specs=[
                pl.BlockSpec((tn, F_PAD), lambda k: (k, 0)),   # h tile
                pl.BlockSpec((g, tn), lambda k: (0, k)),       # P tile
                pl.BlockSpec((F_PAD, c), lambda k: (0, 0)),    # W_lin
                pl.BlockSpec((1, c), lambda k: (0, 0)),        # b_lin
            ],
            out_specs=pl.BlockSpec((g, c), lambda k: (0, 0)),
            scratch_shapes=[pltpu.VMEM((g, F_PAD), jnp.float32)],
        ),
        compiler_params=pltpu.CompilerParams(
            dimension_semantics=("arbitrary",)),
    )(h, p_pad, w_lin, b_lin)


# ---------------------------------------------------------------------------
# Full forward (no casts of HBM operands inside jit)
# ---------------------------------------------------------------------------
@functools.partial(jax.jit, static_argnames=("tm", "tk", "fused"))
def sage_graphnet_forward(m_i8, inv_deg, x_pad, p_pad, params, *, tm, tk, fused):
    if fused:
        return _fused_forward(m_i8, inv_deg, x_pad, p_pad, params)
    (w1, b1, w2, b2, w3, b3, w_lin, b_lin) = params
    h = _sage_layer(x_pad, m_i8, inv_deg, w1, b1, tm=tm, tk=tk)  # 13 -> 16
    h = _sage_layer(h, m_i8, inv_deg, w2, b2, tm=tm, tk=tk)      # 16 -> 64
    h = _sage_layer(h, m_i8, inv_deg, w3, b3, tm=tm, tk=tk)      # 64 -> 128
    return _head(h, p_pad, w_lin, b_lin, tn=tk)


# ---------------------------------------------------------------------------
# One-time layout / quantization plumbing (outside the kernels AND outside jit)
# ---------------------------------------------------------------------------
def _pad_to(x, shape, dtype=None):
    dtype = x.dtype if dtype is None else dtype
    out = jnp.zeros(shape, dtype)
    return out.at[tuple(slice(0, s) for s in x.shape)].set(x.astype(dtype))


def _stack_sage_weights(wl, wr, b):
    """[Wl; Wr] stacked + zero-padded to [2*F_PAD, F_PAD] bf16; bias f32."""
    f_in, f_out = wl.shape
    w = jnp.zeros((2 * F_PAD, F_PAD), jnp.float32)
    w = w.at[:f_in, :f_out].set(wl)
    w = w.at[F_PAD:F_PAD + f_in, :f_out].set(wr)
    b_p = jnp.zeros((1, F_PAD), jnp.float32).at[:, :f_out].set(b)
    return w.astype(jnp.bfloat16), b_p


def _choose_tiles(n_pad):
    """(8,128)-legal tiles: tk as large as possible; tm prefers an even
    row-tile count so v7x's two TensorCores split the parallel axis evenly."""
    cands = (1024, 512, 256, 128)
    tk = next((t for t in cands if n_pad % t == 0), 128)
    tm = next((t for t in cands if n_pad % t == 0 and (n_pad // t) % 2 == 0),
              None)
    if tm is None:
        tm = next((t for t in cands if n_pad % t == 0), 128)
    return tm, tk


def prepare_inputs(x, edge_index, batch, num_graphs, raw_params):
    """Pad to 128-lane-dense slabs, quantize A to int8 counts + f32 row scale,
    and pre-cast every operand so the jitted forward never re-casts HBM data."""
    n = x.shape[0]
    n_pad = _round_up(n, 128)

    src, dst = edge_index[0], edge_index[1]
    counts = jnp.zeros((n_pad, n_pad), jnp.float32).at[dst, src].add(1.0)
    deg = counts.sum(axis=1, keepdims=True)
    inv_deg = jnp.where(deg > 0, 1.0 / jnp.maximum(deg, 1.0), 0.0)  # (n_pad,1) f32
    m_i8 = counts.astype(jnp.int8)   # exact: edge multiplicities are tiny ints

    x_pad = _pad_to(x, (n_pad, F_PAD), jnp.bfloat16)

    onehot = (batch[None, :] == jnp.arange(num_graphs)[:, None]).astype(jnp.float32)
    p = onehot / jnp.maximum(onehot.sum(axis=1, keepdims=True), 1.0)
    p_pad = _pad_to(p, (num_graphs, n_pad), jnp.bfloat16)

    (w1l, w1r, b1, w2l, w2r, b2, w3l, w3r, b3, w_lin, b_lin) = raw_params
    params = (*_stack_sage_weights(w1l, w1r, b1),
              *_stack_sage_weights(w2l, w2r, b2),
              *_stack_sage_weights(w3l, w3r, b3),
              w_lin.astype(jnp.float32), b_lin.astype(jnp.float32))

    tm, tk = _choose_tiles(n_pad)
    fused = n_pad <= FUSED_MAX_NODES
    return m_i8, inv_deg, x_pad, p_pad, params, tm, tk, fused


# ---------------------------------------------------------------------------
# Pure-JAX f32 reference (SAGEConv semantics)
# ---------------------------------------------------------------------------
def _reference_forward(x, a, p, raw_params):
    (w1l, w1r, b1, w2l, w2r, b2, w3l, w3r, b3, w_lin, b_lin) = raw_params

    def layer(h, wl, wr, b):
        return jnp.maximum(a @ h @ wl + h @ wr + b, 0.0)

    h = layer(x, w1l, w1r, b1)
    h = layer(h, w2l, w2r, b2)
    h = layer(h, w3l, w3r, b3)
    logits = (p @ h) @ w_lin + b_lin
    return jax.nn.log_softmax(logits, axis=1)


if __name__ == "__main__":
    key = jax.random.PRNGKey(0)
    N = 384          # nodes across the batch
    E = 1536         # edges
    G = 4            # graphs in the batch
    F_IN = 13        # num_node_features (module: SAGEConv(13, 16))
    NUM_CLASSES = 7

    k_x, k_e, k1, k2, k3, k4 = jax.random.split(key, 6)

    x = jax.random.normal(k_x, (N, F_IN), jnp.float32)
    edge_index = jax.random.randint(k_e, (2, E), 0, N, dtype=jnp.int32)
    batch = jnp.repeat(jnp.arange(G, dtype=jnp.int32), N // G)

    def init_linear(k, f_in, f_out, with_bias=True):
        kw, kb = jax.random.split(k)
        bound = 1.0 / jnp.sqrt(f_in)
        w = jax.random.uniform(kw, (f_in, f_out), jnp.float32, -bound, bound)
        if with_bias:
            b = jax.random.uniform(kb, (1, f_out), jnp.float32, -bound, bound)
            return w, b
        return w

    k1a, k1b = jax.random.split(k1)
    k2a, k2b = jax.random.split(k2)
    k3a, k3b = jax.random.split(k3)
    w1l, b1 = init_linear(k1a, 13, 16)
    w1r = init_linear(k1b, 13, 16, with_bias=False)
    w2l, b2 = init_linear(k2a, 16, 64)
    w2r = init_linear(k2b, 16, 64, with_bias=False)
    w3l, b3 = init_linear(k3a, 64, 128)
    w3r = init_linear(k3b, 64, 128, with_bias=False)
    w_lin, b_lin = init_linear(k4, 128, NUM_CLASSES)
    raw_params = (w1l, w1r, b1, w2l, w2r, b2, w3l, w3r, b3, w_lin, b_lin)

    # f32 reference operands (mean-normalized dense adjacency + pooling matrix)
    src, dst = edge_index[0], edge_index[1]
    M_f32 = jnp.zeros((N, N), jnp.float32).at[dst, src].add(1.0)
    assert float(M_f32.max()) <= 127.0   # int8 edge-count quantization is exact
    deg = M_f32.sum(axis=1, keepdims=True)
    A = jnp.where(deg > 0, M_f32 / jnp.maximum(deg, 1.0), 0.0)
    onehot = (batch[None, :] == jnp.arange(G)[:, None]).astype(jnp.float32)
    P = onehot / jnp.maximum(onehot.sum(axis=1, keepdims=True), 1.0)
    ref = _reference_forward(x, A, P, raw_params)

    # one-time plumbing (padding / int8 quantization / casts) outside jit
    m_i8, inv_deg, x_pad, p_pad, params, tm, tk, fused = prepare_inputs(
        x, edge_index, batch, G, raw_params)

    # --- fused small-N path (the one selected for N=384) ---------------------
    out = sage_graphnet_forward(m_i8, inv_deg, x_pad, p_pad, params,
                                tm=tm, tk=tk, fused=fused)
    out = jax.block_until_ready(out)
    assert out.shape == (G, NUM_CLASSES)
    assert bool(jnp.allclose(jnp.exp(out).sum(axis=1), 1.0, atol=1e-4))
    assert bool(jnp.allclose(out, ref, atol=0.02, rtol=0.02)), float(
        jnp.abs(out - ref).max())

    # --- tiled large-N fallback path, exercised & checked at the same size ---
    out_tiled = sage_graphnet_forward(m_i8, inv_deg, x_pad, p_pad, params,
                                      tm=tm, tk=tk, fused=False)
    out_tiled = jax.block_until_ready(out_tiled)
    assert out_tiled.shape == (G, NUM_CLASSES)
    assert bool(jnp.allclose(out_tiled, ref, atol=0.02, rtol=0.02)), float(
        jnp.abs(out_tiled - ref).max())

    print("KERNEL_OK")
</pallas_src>

<mosaic_0001>
module attributes {stable_mosaic.version = 11 : i64} {
  func.func @_fused_kernel(%arg0: memref<384x384xi8, #tpu.memory_space<vmem>>, %arg1: memref<384x1xf32, #tpu.memory_space<vmem>>, %arg2: memref<384x128xbf16, #tpu.memory_space<vmem>>, %arg3: memref<256x128xbf16, #tpu.memory_space<vmem>>, %arg4: memref<1x128xf32, #tpu.memory_space<vmem>>, %arg5: memref<256x128xbf16, #tpu.memory_space<vmem>>, %arg6: memref<1x128xf32, #tpu.memory_space<vmem>>, %arg7: memref<256x128xbf16, #tpu.memory_space<vmem>>, %arg8: memref<1x128xf32, #tpu.memory_space<vmem>>, %arg9: memref<4x384xbf16, #tpu.memory_space<vmem>>, %arg10: memref<128x7xf32, #tpu.memory_space<vmem>>, %arg11: memref<1x7xf32, #tpu.memory_space<vmem>>, %arg12: memref<4x7xf32, #tpu.memory_space<vmem>>) attributes {dimension_semantics = [], scalar_prefetch = 0 : i64, scratch_operands = 0 : i64, tpu.core_type = #tpu.core_type<tc>} {
    %c0 = arith.constant 0 : index
    %c0_0 = arith.constant 0 : index
    %0 = vector.load %arg0[%c0, %c0_0] : memref<384x384xi8, #tpu.memory_space<vmem>>, vector<384x384xi8>
    %1 = arith.sitofp %0 : vector<384x384xi8> to vector<384x384xbf16>
    %c0_1 = arith.constant 0 : index
    %c0_2 = arith.constant 0 : index
    %2 = vector.load %arg1[%c0_1, %c0_2] : memref<384x1xf32, #tpu.memory_space<vmem>>, vector<384x1xf32>
    %c0_3 = arith.constant 0 : index
    %c0_4 = arith.constant 0 : index
    %3 = vector.load %arg2[%c0_3, %c0_4] : memref<384x128xbf16, #tpu.memory_space<vmem>>, vector<384x128xbf16>
    %cst = arith.constant dense<0.000000e+00> : vector<384x128xf32>
    %4 = tpu.matmul %1, %3, %cst {dimension_numbers = #tpu.dot_dimension_numbers<[1], [0], [0], [1], [0, 0, 1, 1], [], []>} : vector<384x384xbf16>, vector<384x128xbf16>, vector<384x128xf32> -> vector<384x128xf32>
    %5 = vector.broadcast %2 : vector<384x1xf32> to vector<384x128xf32>
    %6 = arith.mulf %4, %5 : vector<384x128xf32>
    %7 = arith.truncf %6 : vector<384x128xf32> to vector<384x128xbf16>
    %c0_5 = arith.constant 0 : index
    %c0_6 = arith.constant 0 : index
    %8 = vector.load %arg3[%c0_5, %c0_6] : memref<256x128xbf16, #tpu.memory_space<vmem>>, vector<128x128xbf16>
    %cst_7 = arith.constant dense<0.000000e+00> : vector<384x128xf32>
    %9 = tpu.matmul %7, %8, %cst_7 {dimension_numbers = #tpu.dot_dimension_numbers<[1], [0], [0], [1], [0, 0, 1, 1], [], []>} : vector<384x128xbf16>, vector<128x128xbf16>, vector<384x128xf32> -> vector<384x128xf32>
    %c128 = arith.constant 128 : index
    %c0_8 = arith.constant 0 : index
    %10 = vector.load %arg3[%c128, %c0_8] : memref<256x128xbf16, #tpu.memory_space<vmem>>, vector<128x128xbf16>
    %cst_9 = arith.constant dense<0.000000e+00> : vector<384x128xf32>
    %11 = tpu.matmul %3, %10, %cst_9 {dimension_numbers = #tpu.dot_dimension_numbers<[1], [0], [0], [1], [0, 0, 1, 1], [], []>} : vector<384x128xbf16>, vector<128x128xbf16>, vector<384x128xf32> -> vector<384x128xf32>
    %12 = arith.addf %9, %11 : vector<384x128xf32>
    %c0_10 = arith.constant 0 : index
    %c0_11 = arith.constant 0 : index
    %13 = vector.load %arg4[%c0_10, %c0_11] : memref<1x128xf32, #tpu.memory_space<vmem>>, vector<1x128xf32>
    %14 = vector.broadcast %13 : vector<1x128xf32> to vector<384x128xf32>
    %15 = arith.addf %12, %14 : vector<384x128xf32>
    %cst_12 = arith.constant 0.000000e+00 : f32
    %16 = vector.broadcast %cst_12 : f32 to vector<384x128xf32>
    %17 = arith.maximumf %15, %16 : vector<384x128xf32>
    %18 = arith.truncf %17 : vector<384x128xf32> to vector<384x128xbf16>
    %cst_13 = arith.constant dense<0.000000e+00> : vector<384x128xf32>
    %19 = tpu.matmul %1, %18, %cst_13 {dimension_numbers = #tpu.dot_dimension_numbers<[1], [0], [0], [1], [0, 0, 1, 1], [], []>} : vector<384x384xbf16>, vector<384x128xbf16>, vector<384x128xf32> -> vector<384x128xf32>
    %20 = vector.broadcast %2 : vector<384x1xf32> to vector<384x128xf32>
    %21 = arith.mulf %19, %20 : vector<384x128xf32>
    %22 = arith.truncf %21 : vector<384x128xf32> to vector<384x128xbf16>
    %c0_14 = arith.constant 0 : index
    %c0_15 = arith.constant 0 : index
    %23 = vector.load %arg5[%c0_14, %c0_15] : memref<256x128xbf16, #tpu.memory_space<vmem>>, vector<128x128xbf16>
    %cst_16 = arith.constant dense<0.000000e+00> : vector<384x128xf32>
    %24 = tpu.matmul %22, %23, %cst_16 {dimension_numbers = #tpu.dot_dimension_numbers<[1], [0], [0], [1], [0, 0, 1, 1], [], []>} : vector<384x128xbf16>, vector<128x128xbf16>, vector<384x128xf32> -> vector<384x128xf32>
    %c128_17 = arith.constant 128 : index
    %c0_18 = arith.constant 0 : index
    %25 = vector.load %arg5[%c128_17, %c0_18] : memref<256x128xbf16, #tpu.memory_space<vmem>>, vector<128x128xbf16>
    %cst_19 = arith.constant dense<0.000000e+00> : vector<384x128xf32>
    %26 = tpu.matmul %18, %25, %cst_19 {dimension_numbers = #tpu.dot_dimension_numbers<[1], [0], [0], [1], [0, 0, 1, 1], [], []>} : vector<384x128xbf16>, vector<128x128xbf16>, vector<384x128xf32> -> vector<384x128xf32>
    %27 = arith.addf %24, %26 : vector<384x128xf32>
    %c0_20 = arith.constant 0 : index
    %c0_21 = arith.constant 0 : index
    %28 = vector.load %arg6[%c0_20, %c0_21] : memref<1x128xf32, #tpu.memory_space<vmem>>, vector<1x128xf32>
    %29 = vector.broadcast %28 : vector<1x128xf32> to vector<384x128xf32>
    %30 = arith.addf %27, %29 : vector<384x128xf32>
    %cst_22 = arith.constant 0.000000e+00 : f32
    %31 = vector.broadcast %cst_22 : f32 to vector<384x128xf32>
    %32 = arith.maximumf %30, %31 : vector<384x128xf32>
    %33 = arith.truncf %32 : vector<384x128xf32> to vector<384x128xbf16>
    %cst_23 = arith.constant dense<0.000000e+00> : vector<384x128xf32>
    %34 = tpu.matmul %1, %33, %cst_23 {dimension_numbers = #tpu.dot_dimension_numbers<[1], [0], [0], [1], [0, 0, 1, 1], [], []>} : vector<384x384xbf16>, vector<384x128xbf16>, vector<384x128xf32> -> vector<384x128xf32>
    %35 = vector.broadcast %2 : vector<384x1xf32> to vector<384x128xf32>
    %36 = arith.mulf %34, %35 : vector<384x128xf32>
    %37 = arith.truncf %36 : vector<384x128xf32> to vector<384x128xbf16>
    %c0_24 = arith.constant 0 : index
    %c0_25 = arith.constant 0 : index
    %38 = vector.load %arg7[%c0_24, %c0_25] : memref<256x128xbf16, #tpu.memory_space<vmem>>, vector<128x128xbf16>
    %cst_26 = arith.constant dense<0.000000e+00> : vector<384x128xf32>
    %39 = tpu.matmul %37, %38, %cst_26 {dimension_numbers = #tpu.dot_dimension_numbers<[1], [0], [0], [1], [0, 0, 1, 1], [], []>} : vector<384x128xbf16>, vector<128x128xbf16>, vector<384x128xf32> -> vector<384x128xf32>
    %c128_27 = arith.constant 128 : index
    %c0_28 = arith.constant 0 : index
    %40 = vector.load %arg7[%c128_27, %c0_28] : memref<256x128xbf16, #tpu.memory_space<vmem>>, vector<128x128xbf16>
    %cst_29 = arith.constant dense<0.000000e+00> : vector<384x128xf32>
    %41 = tpu.matmul %33, %40, %cst_29 {dimension_numbers = #tpu.dot_dimension_numbers<[1], [0], [0], [1], [0, 0, 1, 1], [], []>} : vector<384x128xbf16>, vector<128x128xbf16>, vector<384x128xf32> -> vector<384x128xf32>
    %42 = arith.addf %39, %41 : vector<384x128xf32>
    %c0_30 = arith.constant 0 : index
    %c0_31 = arith.constant 0 : index
    %43 = vector.load %arg8[%c0_30, %c0_31] : memref<1x128xf32, #tpu.memory_space<vmem>>, vector<1x128xf32>
    %44 = vector.broadcast %43 : vector<1x128xf32> to vector<384x128xf32>
    %45 = arith.addf %42, %44 : vector<384x128xf32>
    %cst_32 = arith.constant 0.000000e+00 : f32
    %46 = vector.broadcast %cst_32 : f32 to vector<384x128xf32>
    %47 = arith.maximumf %45, %46 : vector<384x128xf32>
    %48 = arith.truncf %47 : vector<384x128xf32> to vector<384x128xbf16>
    %c0_33 = arith.constant 0 : index
    %c0_34 = arith.constant 0 : index
    %49 = vector.load %arg9[%c0_33, %c0_34] : memref<4x384xbf16, #tpu.memory_space<vmem>>, vector<4x384xbf16>
    %cst_35 = arith.constant dense<0.000000e+00> : vector<4x128xf32>
    %50 = tpu.matmul %49, %48, %cst_35 {dimension_numbers = #tpu.dot_dimension_numbers<[1], [0], [0], [1], [0, 0, 1, 1], [], []>} : vector<4x384xbf16>, vector<384x128xbf16>, vector<4x128xf32> -> vector<4x128xf32>
    %c0_36 = arith.constant 0 : index
    %c0_37 = arith.constant 0 : index
    %51 = vector.load %arg10[%c0_36, %c0_37] : memref<128x7xf32, #tpu.memory_space<vmem>>, vector<128x7xf32>
    %cst_38 = arith.constant dense<0.000000e+00> : vector<4x7xf32>
    %52 = tpu.matmul %50, %51, %cst_38 {dimension_numbers = #tpu.dot_dimension_numbers<[1], [0], [0], [1], [0, 0, 1, 1], [], []>} : vector<4x128xf32>, vector<128x7xf32>, vector<4x7xf32> -> vector<4x7xf32>
    %c0_39 = arith.constant 0 : index
    %c0_40 = arith.constant 0 : index
    %53 = vector.load %arg11[%c0_39, %c0_40] : memref<1x7xf32, #tpu.memory_space<vmem>>, vector<1x7xf32>
    %54 = vector.broadcast %53 : vector<1x7xf32> to vector<4x7xf32>
    %55 = arith.addf %52, %54 : vector<4x7xf32>
    %cst_41 = arith.constant dense<0xFF800000> : vector<4xf32>
    %56 = vector.multi_reduction <maximumf>, %55, %cst_41 [1] : vector<4x7xf32> to vector<4xf32>
    %57 = vector.shape_cast %56 : vector<4xf32> to vector<4x1xf32>
    %58 = vector.broadcast %57 : vector<4x1xf32> to vector<4x7xf32>
    %59 = arith.subf %55, %58 : vector<4x7xf32>
    %60 = math.exp %59 : vector<4x7xf32>
    %cst_42 = arith.constant dense<0.000000e+00> : vector<4xf32>
    %61 = vector.multi_reduction <add>, %60, %cst_42 [1] : vector<4x7xf32> to vector<4xf32>
    %62 = vector.shape_cast %61 : vector<4xf32> to vector<4x1xf32>
    %63 = math.log %62 : vector<4x1xf32>
    %64 = vector.broadcast %63 : vector<4x1xf32> to vector<4x7xf32>
    %65 = arith.subf %59, %64 : vector<4x7xf32>
    %c0_43 = arith.constant 0 : index
    %c0_44 = arith.constant 0 : index
    %66 = vector.load %arg12[%c0_43, %c0_44] : memref<4x7xf32, #tpu.memory_space<vmem>>, vector<4x7xf32>
    tpu.vector_store %arg12[%c0_43, %c0_44], %65 {strides = array<i32>} : memref<4x7xf32, #tpu.memory_space<vmem>>, vector<4x7xf32>,
    return
  }
}

</mosaic_0001>

<bundles_post_ra>
// kernel: sage_graphnet_forward.1
= control target key start
LH: loop header
LB: loop body
LE: loop exit
PB: predicated region body
PF: predicated region fallthrough
CT: control target
= control target key end

     0   :  { %17 = vsyncpa [#allocation3], 0  ;;  %s7842_s0 = inlined_call_operand.vmem [shape: s8[384,384], index: 0, kind: input, shape index: {}]   ;;  %s7843_s1 = inlined_call_operand.vmem [shape: f32[384,1], index: 1, kind: input, shape index: {}]   ;;  %s7844_s2 = inlined_call_operand.vmem [shape: bf16[384,128], index: 2, kind: input, shape index: {}]   ;;  %s7845_s3 = inlined_call_operand.hbm [shape: bf16[256,128], index: 3, kind: input, shape index: {}]   ;;  %s7846_s4 = inlined_call_operand.vmem [shape: f32[1,128], index: 4, kind: input, shape index: {}]   ;;  %s7847_s5 = inlined_call_operand.hbm [shape: bf16[256,128], index: 5, kind: input, shape index: {}]   ;;  %s7848_s6 = inlined_call_operand.vmem [shape: f32[1,128], index: 6, kind: input, shape index: {}]   ;;  %s7849_s7 = inlined_call_operand.hbm [shape: bf16[256,128], index: 7, kind: input, shape index: {}]   ;;  %s7850_s8 = inlined_call_operand.vmem [shape: f32[1,128], index: 8, kind: input, shape index: {}]   ;;  %s7851_s9 = inlined_call_operand.vmem [shape: bf16[4,384], index: 9, kind: input, shape index: {}]   ;;  %s7852_s10 = inlined_call_operand.vmem [shape: f32[128,7], index: 10, kind: input, shape index: {}]   ;;  %s7853_s11 = inlined_call_operand.vmem [shape: f32[1,7], index: 11, kind: input, shape index: {}]   ;;  %s7854_s12 = inlined_call_operand.hbm [shape: f32[4,7], index: 12, kind: output, shape index: {}]  }
   0x1   :  { %18 = vsyncpa [#allocation6], 0 }
   0x2   :  { %19 = vsyncpa [#allocation4], 0  ;;  %s5972_s21 = smov [#allocation5]   ;;  %s5973_s23 = smov [#allocation2]  }
   0x3   :  { %s45_s22 = sshll.u32 %s5972_s21, 4  ;;  %s31_s24 = sshll.u32 %s5973_s23, 4  ;;  %s46_s22 = int_to_ptr.vmem [resolvable:$true] %s45_s22  ;;  %s6048_s24 = int_to_ptr.vmem [resolvable:$true] %s31_s24 }
   0x4   :  { %s5878_s27 = scalar_lea.hbm %s7847_s5, 2048 }
   0x5   :  { %p5879_p0 = scmp.ne.s32.totalorder %s7847_s5, %s5878_s27  ;;  %p5882_p1 = scmp.lt.u32.totalorder %s5878_s27, %s7847_s5 }
   0x7   :  { %p5884_p2 = pnand %p5882_p1, %p5879_p0 }
   0x9   :  { %5887 = shalt.err (!%p5884_p2)
}
   0xa   :  { %s5888_s14 = scalar_lea.vmem %s46_s22, 2048  ;;  %p5893_p4 = scmp.lt.s32.totalorder %s46_s22, %s46_s22 }
   0xb   :  { %p5889_p3 = scmp.ne.s32.totalorder %s46_s22, %s5888_s14  ;;  %p5894_p5 = scmp.lt.s32.totalorder %s5888_s14, %s5888_s14 }
   0xd   :  { %p5895_p6 = por %p5894_p5, %p5893_p4 }
   0xf   :  { %p5896_p7 = pnand %p5895_p6, %p5889_p3 }
  0x11   :  { %5899 = shalt.err (!%p5896_p7)
}
  0x12   :  { %s5974_s15 = smov 64   ;;  %s5975_s16 = smov 4  }
  0x13   :  { %51 = dma.hbm_to_vmem [thread:$0]  %s7847_s5, 2048, %s46_s22, [#allocation6], %s5974_s15, %s5974_s15, %s5975_s16  }
  0x14   :  { %s5900_s21 = scalar_lea.hbm %s7845_s3, 2048 }
  0x15   :  { %p5901_p8 = scmp.ne.s32.totalorder %s7845_s3, %s5900_s21  ;;  %p5904_p9 = scmp.lt.u32.totalorder %s5900_s21, %s7845_s3 }
  0x17   :  { %p5906_p10 = pnand %p5904_p9, %p5901_p8 }
  0x19   :  { %5909 = shalt.err (!%p5906_p10)
}
  0x1a   :  { %s5910_s28 = scalar_lea.vmem %s6048_s24, 2048  ;;  %p5915_p12 = scmp.lt.s32.totalorder %s6048_s24, %s6048_s24 }
  0x1b   :  { %p5911_p11 = scmp.ne.s32.totalorder %s6048_s24, %s5910_s28  ;;  %p5916_p13 = scmp.lt.s32.totalorder %s5910_s28, %s5910_s28 }
  0x1d   :  { %p5917_p0 = por %p5916_p13, %p5915_p12 }
  0x1f   :  { %p5918_p1 = pnand %p5917_p0, %p5911_p11 }
  0x21   :  { %5921 = shalt.err (!%p5918_p1)
}
  0x22   :  { %37 = dma.hbm_to_vmem [thread:$0]  %s7845_s3, 2048, %s6048_s24, [#allocation3], %s5974_s15, %s5974_s15, %s5975_s16  }
  0x23   :  { %s5976_s29 = smov [#allocation7]   ;;  %s5922_s17 = scalar_lea.hbm %s7849_s7, 2048 }
  0x24   :  { %s59_s30 = sshll.u32 %s5976_s29, 4  ;;  %p5923_p2 = scmp.ne.s32.totalorder %s7849_s7, %s5922_s17  ;;  %s60_s30 = int_to_ptr.vmem [resolvable:$true] %s59_s30 }
  0x25   :  { %p5926_p3 = scmp.lt.u32.totalorder %s5922_s17, %s7849_s7 }
  0x27   :  { %p5928_p4 = pnand %p5926_p3, %p5923_p2 }
  0x29   :  { %5931 = shalt.err (!%p5928_p4)
}
  0x2a   :  { %s5932_s23 = scalar_lea.vmem %s60_s30, 2048  ;;  %p5937_p6 = scmp.lt.s32.totalorder %s60_s30, %s60_s30 }
  0x2b   :  { %p5933_p5 = scmp.ne.s32.totalorder %s60_s30, %s5932_s23  ;;  %p5938_p7 = scmp.lt.s32.totalorder %s5932_s23, %s5932_s23 }
  0x2d   :  { %p5939_p8 = por %p5938_p7, %p5937_p6 }
  0x2f   :  { %p5940_p9 = pnand %p5939_p8, %p5933_p5 }
  0x31   :  { %5943 = shalt.err (!%p5940_p9)
}
  0x32   :  { %65 = dma.hbm_to_vmem [thread:$0]  %s7849_s7, 2048, %s60_s30, [#allocation6], %s5974_s15, %s5974_s15, %s5975_s16  }
  0x33   :  { %5966 = dma.done.wait [#allocation3], 2048  }
  0x34   :  { %5967 = vsyncadd [#allocation3], 4294965248 }
  0x35   :  { %5968 = dma.done.wait [#allocation6], 4096  }
  0x36   :  { %5969 = vsyncadd [#allocation6], 4294963200  ;;  %v7855_v0 = vmov 0   ;;  %v6106_v1 = vld [vmem:[%s7844_s2] sm:$0xff]   ;;  %v6112_v2 = vld [vmem:[%s7844_s2 + $0x8] sm:$0xff]   ;;  %vm5980_vm0 = vmmov 0  }
  0x37   :  { %432 = vmatprep.subr.bf16.mxu0 %v7855_v0  ;;  %5799 = vset.pattern.permute.xlu0 %v7855_v0  ;;  %v6119_v3 = vld [vmem:[%s7844_s2 + $0x10] sm:$0xff]   ;;  %v6125_v4 = vld [vmem:[%s7844_s2 + $0x80] sm:$0xff]   ;;  %v6130_v5 = vld [vmem:[%s7844_s2 + $0x18] sm:$0xff]   ;;  %vm4547_vm1 = vcmask 52224  }
  0x38   :  { %5800 = vset.pattern.permute.xlu1 %v7855_v0  ;;  %433 = vmatpush1.bf16.msra.mxu0 %v6106_v1  ;;  %v6137_v6 = vld [vmem:[%s7844_s2 + $0x88] sm:$0xff]   ;;  %v6145_v7 = vld [vmem:[%s7844_s2 + $0x90] sm:$0xff]   ;;  %v6151_v8 = vld [vmem:[%s7844_s2 + $0x20] sm:$0xff]  }
  0x39   :  { %434 = vmatprep.subr.bf16.mxu0 %v7855_v0  ;;  %4989 = vmatprep.subr.bf16.mxu1 %v6125_v4  ;;  %v6159_v9 = vld [vmem:[%s7844_s2 + $0x98] sm:$0xff]   ;;  %v6165_v10 = vld [vmem:[%s7844_s2 + $0x28] sm:$0xff]   ;;  %v6173_v11 = vld [vmem:[%s7844_s2 + $0xa0] sm:$0xff]  }
  0x3a   :  { %4990 = vmatpush3.bf16.msra.mxu1 %v6125_v4  ;;  %v6179_v12 = vld [vmem:[%s7844_s2 + $0x30] sm:$0xff]   ;;  %v6187_v13 = vld [vmem:[%s7844_s2 + $0xa8] sm:$0xff]   ;;  %v6206_v18 = vld [vmem:[%s7844_s2 + $0x38] sm:$0xff]  }
  0x3b   :  { %4991 = vmatprep.subr.bf16.mxu1 %v6137_v6  ;;  %v86_v14 = vld [vmem:[%s7842_s0 + $0x10] sm:$0xff]  ;;  %v6195_v15 = vld [vmem:[%s7842_s0 + $0x8] sm:$0xff]  ;;  %v192_v20 = vld [vmem:[%s7843_s1] sm:$0xff] }
  0x3c   :  { %435 = vmatpush1.bf16.msra.mxu0 %v6112_v2  ;;  %v6197_v16 = vunpack.c.l.s8.bf16 %v86_v14  ;;  %v6200_v17 = vunpack.c.l.s8.bf16 %v6195_v15  ;;  %v6214_v19 = vld [vmem:[%s7844_s2 + $0xb0] sm:$0xff]   ;;  %884 = vperm.xlu0 %5799, %v192_v20   ;;  %v6228_v22 = vld [vmem:[%s7844_s2 + $0x40] sm:$0xff]   ;;  %v193_v23 = vld [vmem:[%s7843_s1 + $0x8] sm:$0xff]  ;;  %v6268_v31 = vunpack.c.h.s8.bf16 %v86_v14 }
  0x3d   :  { %436 = vmatprep.subr.bf16.mxu0 %v7855_v0  ;;  %v194_v21 = vld [vmem:[%s7843_s1 + $0x10] sm:$0xff]  ;;  %v195_v24 = vld [vmem:[%s7843_s1 + $0x18] sm:$0xff]  ;;  %v6248_v26 = vld [vmem:[%s7844_s2 + $0x48] sm:$0xff]  }
  0x3e   :  { %4992 = vmatpush3.bf16.msra.mxu1 %v6137_v6  ;;  %8041 = vst [vmem:[#allocation12_spill] sm:$0xff] %v6197_v16  ;;  %8042 = vst [vmem:[#allocation13_spill] sm:$0xff] %v6200_v17  ;;  %5005 = vmatprep.mubr.bf16.mxu1 %v6197_v16  ;;  %v6242_v25 = vld [vmem:[%s7844_s2 + $0xb8] sm:$0xff]   ;;  %v196_v27 = vld [vmem:[%s7843_s1 + $0x20] sm:$0xff] }
  0x3f   :  { %4993 = vmatprep.subr.bf16.mxu1 %v6145_v7  ;;  %464 = vmatprep.mubr.bf16.mxu0 %v6200_v17  ;;  %v197_v28 = vld [vmem:[%s7843_s1 + $0x28] sm:$0xff]  ;;  %v6266_v30 = vld [vmem:[%s7844_s2 + $0x50] sm:$0xff]   ;;  %8043 = vst [vmem:[#allocation14_spill] sm:$0xff] %v6268_v31  ;;  %v5825_v34 = vld [vmem:[#allocation2 + $0x40] sm:$0xff]  }
  0x40   :  { %437 = vmatpush1.bf16.msra.mxu0 %v6119_v3  ;;  %894 = vperm.xlu1 %5800, %v194_v21   ;;  %v89_v29 = vld [vmem:[%s7842_s0 + $0x28] sm:$0xff]  ;;  %v198_v32 = vld [vmem:[%s7843_s1 + $0x30] sm:$0xff]  ;;  %v199_v35 = vld [vmem:[%s7843_s1 + $0x38] sm:$0xff] }
  0x41   :  { %438 = vmatprep.subr.bf16.mxu0 %v7855_v0  ;;  %889 = vperm.xlu0 %5799, %v193_v23   ;;  %v6275_v33 = vunpack.c.l.s8.bf16 %v89_v29  ;;  %v5826_v36 = vld [vmem:[#allocation2 + $0x48] sm:$0xff]   ;;  %v6284_v37 = vld [vmem:[%s7844_s2 + $0x58] sm:$0xff]   ;;  %v200_v38 = vld [vmem:[%s7843_s1 + $0x40] sm:$0xff]  ;;  %v6307_v44 = vunpack.c.h.s8.bf16 %v89_v29  ;;  %v6378_v23 = vunpack.c.h.s8.bf16 %v6195_v15 }
  0x42   :  { %4994 = vmatpush3.bf16.msra.mxu1 %v6145_v7  ;;  %v6295_v39 = vld [vmem:[%s7844_s2 + $0x60] sm:$0xff]   ;;  %v201_v41 = vld [vmem:[%s7843_s1 + $0x48] sm:$0xff]  ;;  %v202_v42 = vld [vmem:[%s7843_s1 + $0x50] sm:$0xff] }
  0x43   :  { %4995 = vmatprep.subr.bf16.mxu1 %v6159_v9  ;;  %8044 = vst [vmem:[#allocation15_spill] sm:$0xff] %v6275_v33  ;;  %v92_v40 = vld [vmem:[%s7842_s0 + $0x40] sm:$0xff]  ;;  %v5827_v43 = vld [vmem:[#allocation2 + $0x50] sm:$0xff]   ;;  %8045 = vst [vmem:[#allocation16_spill] sm:$0xff] %v6307_v44 }
  0x44   :  { %439 = vmatpush1.bf16.msra.mxu0 %v6130_v5  ;;  %899 = vperm.xlu1 %5800, %v195_v24   ;;  %v6310_v45 = vunpack.c.l.s8.bf16 %v92_v40  ;;  %v203_v46 = vld [vmem:[%s7843_s1 + $0x58] sm:$0xff]  ;;  %v6319_v48 = vld [vmem:[%s7844_s2 + $0x68] sm:$0xff]   ;;  %v204_v50 = vld [vmem:[%s7843_s1 + $0x60] sm:$0xff]  ;;  %v6342_v55 = vunpack.c.h.s8.bf16 %v92_v40 }
  0x45   :  { %440 = vmatprep.subr.bf16.mxu0 %v7855_v0  ;;  %904 = vperm.xlu0 %5799, %v196_v27   ;;  %v5828_v47 = vld [vmem:[#allocation2 + $0x58] sm:$0xff]   ;;  %v205_v51 = vld [vmem:[%s7843_s1 + $0x68] sm:$0xff]  ;;  %v5829_v52 = vld [vmem:[#allocation2 + $0x60] sm:$0xff]  }
  0x46   :  { %4996 = vmatpush3.bf16.msra.mxu1 %v6159_v9  ;;  %8046 = vst [vmem:[#allocation17_spill] sm:$0xff] %v6310_v45  ;;  %v95_v49 = vld [vmem:[%s7842_s0 + $0x58] sm:$0xff]  ;;  %v6336_v53 = vld [vmem:[%s7844_s2 + $0x70] sm:$0xff]   ;;  %8047 = vst [vmem:[#allocation18_spill] sm:$0xff] %v6342_v55 }
  0x47   :  { %4997 = vmatprep.subr.bf16.mxu1 %v6173_v11  ;;  %v206_v54 = vld [vmem:[%s7843_s1 + $0x70] sm:$0xff]  ;;  %v6345_v56 = vunpack.c.l.s8.bf16 %v95_v49  ;;  %v207_v57 = vld [vmem:[%s7843_s1 + $0x78] sm:$0xff]  ;;  %v5830_v58 = vld [vmem:[#allocation2 + $0x68] sm:$0xff]   ;;  %v6380_v24 = vunpack.c.h.s8.bf16 %v95_v49 }
  0x48   :  { %441 = vmatpush1.bf16.msra.mxu0 %v6151_v8  ;;  %909 = vperm.xlu1 %5800, %v197_v28   ;;  %v6354_v59 = vld [vmem:[%s7844_s2 + $0x78] sm:$0xff]   ;;  %v84_v60 = vld [vmem:[%s7842_s0] sm:$0xff]  ;;  %v98_v62 = vld [vmem:[%s7842_s0 + $0x70] sm:$0xff] }
  0x49   :  { %442 = vmatprep.subr.bf16.mxu0 %v7855_v0  ;;  %914 = vperm.xlu0 %5799, %v198_v32   ;;  %8048 = vst [vmem:[#allocation19_spill] sm:$0xff] %v6345_v56  ;;  %v208_v61 = vld [vmem:[%s7843_s1 + $0x80] sm:$0xff]  ;;  %v209_v63 = vld [vmem:[%s7843_s1 + $0x88] sm:$0xff]  ;;  %v210_v14 = vld [vmem:[%s7843_s1 + $0x90] sm:$0xff]  ;;  %v6374_v20 = vunpack.c.l.s8.bf16 %v84_v60  ;;  %v6382_v27 = vunpack.c.l.s8.bf16 %v98_v62 }
  0x4a   :  { %4998 = vmatpush3.bf16.msra.mxu1 %v6173_v11  ;;  %v5831_v21 = vld [vmem:[#allocation2 + $0x70] sm:$0xff]   ;;  %8049 = vst [vmem:[#allocation20_spill] sm:$0xff] %v6380_v24  ;;  %v88_v28 = vld [vmem:[%s7842_s0 + $0x20] sm:$0xff]  ;;  %v211_v15 = vld [vmem:[%s7843_s1 + $0x98] sm:$0xff] }
  0x4b   :  { %4999 = vmatprep.subr.bf16.mxu1 %v6187_v13  ;;  %8050 = vst [vmem:[#allocation21_spill] sm:$0xff] %v6382_v27  ;;  %v5832_v29 = vld [vmem:[#allocation2 + $0x78] sm:$0xff]   ;;  %v101_v32 = vld [vmem:[%s7842_s0 + $0x88] sm:$0xff]  ;;  %v6409_v40 = vunpack.c.l.s8.bf16 %v88_v28  ;;  %v216_v49 = vld [vmem:[%s7843_s1 + $0xc0] sm:$0xff] }
  0x4c   :  { %443 = vmatpush1.bf16.msra.mxu0 %v6165_v10  ;;  %919 = vperm.xlu1 %5800, %v199_v35   ;;  %v213_v35 = vld [vmem:[%s7843_s1 + $0xa8] sm:$0xff] }
  0x4d   :  { %444 = vmatprep.subr.bf16.mxu0 %v7855_v0  ;;  %924 = vperm.xlu0 %5799, %v200_v38   ;;  %v6407_v38 = vunpack.c.h.s8.bf16 %v84_v60  ;;  %8052 = vst [vmem:[#allocation23_spill] sm:$0xff] %v6409_v40  ;;  %v91_v60 = vld [vmem:[%s7842_s0 + $0x38] sm:$0xff] }
  0x4e   :  { %5000 = vmatpush3.bf16.msra.mxu1 %v6187_v13 }
  0x4f   :  { %5001 = vmatprep.subr.bf16.mxu1 %v6214_v19  ;;  %8051 = vst [vmem:[#allocation22_spill] sm:$0xff] %v6407_v38 }
  0x50   :  { %445 = vmatpush1.bf16.msra.mxu0 %v6179_v12  ;;  %929 = vperm.xlu1 %5800, %v201_v41   ;;  %v6411_v41 = vunpack.c.h.s8.bf16 %v98_v62  ;;  %v107_v62 = vld [vmem:[%s7842_s0 + $0xb8] sm:$0xff] }
  0x51   :  { %446 = vmatprep.subr.bf16.mxu0 %v7855_v0  ;;  %934 = vperm.xlu0 %5799, %v202_v42   ;;  %v6413_v42 = vunpack.c.l.s8.bf16 %v101_v32 }
  0x52   :  { %5002 = vmatpush3.bf16.msra.mxu1 %v6214_v19  ;;  %8053 = vst [vmem:[#allocation24_spill] sm:$0xff] %v6411_v41 }
  0x53   :  { %5003 = vmatprep.subr.bf16.mxu1 %v6242_v25  ;;  %8054 = vst [vmem:[#allocation25_spill] sm:$0xff] %v6413_v42 }
  0x54   :  { %447 = vmatpush1.bf16.msra.mxu0 %v6206_v18  ;;  %939 = vperm.xlu1 %5800, %v203_v46   ;;  %v87_v46 = vld [vmem:[%s7842_s0 + $0x18] sm:$0xff] }
  0x55   :  { %448 = vmatprep.subr.bf16.mxu0 %v7855_v0  ;;  %944 = vperm.xlu0 %5799, %v204_v50   ;;  %v217_v50 = vld [vmem:[%s7843_s1 + $0xc8] sm:$0xff] }
  0x56   :  { %5004 = vmatpush3.bf16.msra.mxu1 %v6242_v25 }
  0x57   :  { %5053 = vmatprep.subr.bf16.mxu1 %v5825_v34 }
  0x58   :  { %449 = vmatpush1.bf16.msra.mxu0 %v6228_v22  ;;  %949 = vperm.xlu1 %5800, %v205_v51   ;;  %v218_v51 = vld [vmem:[%s7843_s1 + $0xd0] sm:$0xff] }
  0x59   :  { %450 = vmatprep.subr.bf16.mxu0 %v7855_v0  ;;  %5006 = vmatmul.mubr.bf16.vlgmr.msra.gmra.mrb[0].mxu1 %v6268_v31 }
  0x5a   :  { %5009 = vmatprep.mubr.bf16.mxu1 %v6275_v33  ;;  %5054 = vmatpush3.bf16.msra.mxu1 %v5825_v34  ;;  %v212_v34 = vld [vmem:[%s7843_s1 + $0xa0] sm:$0xff] }
  0x5b   :  { %5055 = vmatprep.subr.bf16.mxu1 %v5826_v36  ;;  %954 = vperm.xlu0 %5799, %v206_v54   ;;  %v6439_v54 = vunpack.c.h.s8.bf16 %v88_v28  ;;  %v6466_v28 = vunpack.c.l.s8.bf16 %v91_v60 }
  0x5c   :  { %451 = vmatpush1.bf16.msra.mxu0 %v6248_v26  ;;  %959 = vperm.xlu1 %5800, %v207_v57   ;;  %v6441_v57 = vunpack.c.h.s8.bf16 %v101_v32  ;;  %v6473_v32 = vunpack.c.l.s8.bf16 %v107_v62 }
  0x5d   :  { %452 = vmatprep.subr.bf16.mxu0 %v7855_v0  ;;  %8058 = vst [vmem:[#allocation29_spill] sm:$0xff] %v6466_v28 }
  0x5e   :  { %5056 = vmatpush3.bf16.msra.mxu1 %v5826_v36  ;;  %v214_v36 = vld [vmem:[%s7843_s1 + $0xb0] sm:$0xff]  ;;  %8055 = vst [vmem:[#allocation26_spill] sm:$0xff] %v6441_v57  ;;  %8060 = vst [vmem:[#allocation31_spill] sm:$0xff] %v6473_v32 }
  0x5f   :  { %5057 = vmatprep.subr.bf16.mxu1 %v5827_v43  ;;  %964 = vperm.xlu0 %5799, %v208_v61   ;;  %v219_v61 = vld [vmem:[%s7843_s1 + $0xd8] sm:$0xff] }
  0x60   :  { %453 = vmatpush1.bf16.msra.mxu0 %v6266_v30  ;;  %969 = vperm.xlu1 %5800, %v209_v63   ;;  %v220_v63 = vld [vmem:[%s7843_s1 + $0xe0] sm:$0xff] }
  0x61   :  { %454 = vmatprep.subr.bf16.mxu0 %v7855_v0  ;;  %5010 = vmatmul.mubr.bf16.gmra.mrb[4].mxu1 %v6307_v44 }
  0x62   :  { %5013 = vmatprep.mubr.bf16.mxu1 %v6310_v45  ;;  %5058 = vmatpush3.bf16.msra.mxu1 %v5827_v43  ;;  %v215_v43 = vld [vmem:[%s7843_s1 + $0xb8] sm:$0xff] }
  0x63   :  { %5059 = vmatprep.subr.bf16.mxu1 %v5828_v47  ;;  %974 = vperm.xlu0 %5799, %v210_v14   ;;  %v6461_v14 = vunpack.c.h.s8.bf16 %v87_v46 }
  0x64   :  { %455 = vmatpush1.bf16.msra.mxu0 %v6284_v37  ;;  %979 = vperm.xlu1 %5800, %v211_v15  }
  0x65   :  { %456 = vmatprep.subr.bf16.mxu0 %v7855_v0  ;;  %8057 = vst [vmem:[#allocation28_spill] sm:$0xff] %v6461_v14 }
  0x66   :  { %5060 = vmatpush3.bf16.msra.mxu1 %v5828_v47  ;;  %v104_v47 = vld [vmem:[%s7842_s0 + $0xa0] sm:$0xff] }
  0x67   :  { %5061 = vmatprep.subr.bf16.mxu1 %v5829_v52  ;;  %984 = vperm.xlu0 %5799, %v212_v34   ;;  %v6468_v15 = vunpack.c.h.s8.bf16 %v104_v47  ;;  %v223_v34 = vld [vmem:[%s7843_s1 + $0xf8] sm:$0xff] }
  0x68   :  { %457 = vmatpush1.bf16.msra.mxu0 %v6295_v39  ;;  %989 = vperm.xlu1 %5800, %v213_v35   ;;  %v90_v35 = vld [vmem:[%s7842_s0 + $0x30] sm:$0xff] }
  0x69   :  { %458 = vmatprep.subr.bf16.mxu0 %v7855_v0  ;;  %5014 = vmatmul.mubr.bf16.gmra.mrb[8].mxu1 %v6342_v55  ;;  %8059 = vst [vmem:[#allocation30_spill] sm:$0xff] %v6468_v15 }
  0x6a   :  { %5017 = vmatprep.mubr.bf16.mxu1 %v6345_v56  ;;  %5062 = vmatpush3.bf16.msra.mxu1 %v5829_v52  ;;  %v6437_v52 = vunpack.c.l.s8.bf16 %v87_v46  ;;  %v6491_v46 = vunpack.c.l.s8.bf16 %v90_v35 }
  0x6b   :  { %5063 = vmatprep.subr.bf16.mxu1 %v5830_v58  ;;  %994 = vperm.xlu0 %5799, %v214_v36   ;;  %v224_v36 = vld [vmem:[%s7843_s1 + $0x100] sm:$0xff] }
  0x6c   :  { %459 = vmatpush1.bf16.msra.mxu0 %v6319_v48  ;;  %999 = vperm.xlu1 %5800, %v215_v43   ;;  %v110_v43 = vld [vmem:[%s7842_s0 + $0xd0] sm:$0xff] }
  0x6d   :  { %460 = vmatprep.subr.bf16.mxu0 %v7855_v0 }
  0x6e   :  { %5064 = vmatpush3.bf16.msra.mxu1 %v5830_v58  ;;  %v6443_v58 = vunpack.c.l.s8.bf16 %v104_v47  ;;  %v225_v47 = vld [vmem:[%s7843_s1 + $0x108] sm:$0xff] }
  0x6f   :  { %5065 = vmatprep.subr.bf16.mxu1 %v5831_v21  ;;  %1004 = vperm.xlu0 %5799, %v216_v49   ;;  %v6496_v49 = vunpack.c.h.s8.bf16 %v91_v60  ;;  %v228_v60 = vld [vmem:[%s7843_s1 + $0x120] sm:$0xff] }
  0x70   :  { %461 = vmatpush1.bf16.msra.mxu0 %v6336_v53  ;;  %8056 = vst [vmem:[#allocation27_spill] sm:$0xff] %v6443_v58  ;;  %1009 = vperm.xlu1 %5800, %v217_v50   ;;  %v6498_v50 = vunpack.c.h.s8.bf16 %v107_v62  ;;  %v94_v62 = vld [vmem:[%s7842_s0 + $0x50] sm:$0xff] }
  0x71   :  { %462 = vmatprep.subr.bf16.mxu0 %v7855_v0  ;;  %5018 = vmatmul.mubr.bf16.gmra.mrb[12].mxu1 %v6380_v24 }
  0x72   :  { %5021 = vmatprep.mubr.bf16.mxu1 %v6382_v27  ;;  %5066 = vmatpush3.bf16.msra.mxu1 %v5831_v21  ;;  %v221_v21 = vld [vmem:[%s7843_s1 + $0xe8] sm:$0xff]  ;;  %8061 = vst [vmem:[#allocation32_spill] sm:$0xff] %v6498_v50 }
  0x73   :  { %5067 = vmatprep.subr.bf16.mxu1 %v5832_v29  ;;  %1014 = vperm.xlu0 %5799, %v218_v51   ;;  %v226_v51 = vld [vmem:[%s7843_s1 + $0x110] sm:$0xff] }
  0x74   :  { %463 = vmatpush1.bf16.msra.mxu0 %v6354_v59  ;;  %1019 = vperm.xlu1 %5800, %v219_v61   ;;  %v6503_v61 = vunpack.c.l.s8.bf16 %v110_v43 }
  0x75   :  { %1899 = vmatprep.subr.bf16.mxu0 %v7855_v0 }
  0x76   :  { %5068 = vmatpush3.bf16.msra.mxu1 %v5832_v29  ;;  %v222_v29 = vld [vmem:[%s7843_s1 + $0xf0] sm:$0xff]  ;;  %8062 = vst [vmem:[#allocation33_spill] sm:$0xff] %v6503_v61 }
  0x77   :  { %465 = vmatmul.mubr.bf16.vlgmr.msra.gmra.mrb[0].mxu0 %v6374_v20  ;;  %1024 = vperm.xlu0 %5799, %v220_v63   ;;  %v227_v63 = vld [vmem:[%s7843_s1 + $0x118] sm:$0xff] }
  0x78   :  { %472 = vmatprep.mubr.bf16.mxu0 %v6378_v23  ;;  %1029 = vperm.xlu1 %5800, %v221_v21   ;;  %v113_v21 = vld [vmem:[%s7842_s0 + $0xe8] sm:$0xff] }
  0x79   :  { %5022 = vmatmul.mubr.bf16.gmra.mrb[16].mxu1 %v6411_v41  ;;  %v6533_v0 = vunpack.c.l.s8.bf16 %v113_v21 }
  0x7a   :  { %5025 = vmatprep.mubr.bf16.mxu1 %v6413_v42 }
  0x7b   :  { %1034 = vperm.xlu0 %5799, %v222_v29   ;;  %v6521_v29 = vunpack.c.h.s8.bf16 %v90_v35  ;;  %8066 = vst [vmem:[#allocation37_spill] sm:$0xff] %v6533_v0  ;;  %v231_v35 = vld [vmem:[%s7843_s1 + $0x138] sm:$0xff] }
  0x7c   :  { %1039 = vperm.xlu1 %5800, %v223_v34   ;;  %v229_v34 = vld [vmem:[%s7843_s1 + $0x128] sm:$0xff] }
  0x7d   :  { %8063 = vst [vmem:[#allocation34_spill] sm:$0xff] %v6521_v29 }
  0x7f   :  { %473 = vmatmul.mubr.bf16.gmra.mrb[4].mxu0 %v6407_v38  ;;  %1044 = vperm.xlu0 %5799, %v224_v36   ;;  %v6526_v36 = vunpack.c.l.s8.bf16 %v94_v62 }
  0x80   :  { %480 = vmatprep.mubr.bf16.mxu0 %v6409_v40  ;;  %1049 = vperm.xlu1 %5800, %v225_v47   ;;  %v6528_v47 = vunpack.c.h.s8.bf16 %v110_v43  ;;  %v93_v43 = vld [vmem:[%s7842_s0 + $0x48] sm:$0xff] }
  0x81   :  { %5026 = vmatmul.mubr.bf16.gmra.mrb[20].mxu1 %v6441_v57  ;;  %8064 = vst [vmem:[#allocation35_spill] sm:$0xff] %v6526_v36 }
  0x82   :  { %5029 = vmatprep.mubr.bf16.mxu1 %v6443_v58  ;;  %8065 = vst [vmem:[#allocation36_spill] sm:$0xff] %v6528_v47  ;;  %v5836_v58 = vld [vmem:[#allocation2 + $0x18] sm:$0xff]  }
  0x83   :  { %1054 = vperm.xlu0 %5799, %v226_v51   ;;  %v230_v51 = vld [vmem:[%s7843_s1 + $0x130] sm:$0xff] }
  0x84   :  { %1059 = vperm.xlu1 %5800, %v227_v63   ;;  %v232_v63 = vld [vmem:[%s7843_s1 + $0x140] sm:$0xff] }
  0x87   :  { %481 = vmatmul.mubr.bf16.gmra.mrb[8].mxu0 %v6437_v52  ;;  %1064 = vperm.xlu0 %5799, %v228_v60   ;;  %v116_v60 = vld [vmem:[%s7842_s0 + $0x100] sm:$0xff] }
  0x88   :  { %488 = vmatprep.mubr.bf16.mxu0 %v6439_v54  ;;  %1069 = vperm.xlu1 %5800, %v229_v34   ;;  %v6551_v34 = vunpack.c.l.s8.bf16 %v93_v43 }
  0x89   :  { %5030 = vmatmul.mubr.bf16.gmra.mrb[24].mxu1 %v6468_v15 }
  0x8a   :  { %5033 = vmatprep.mubr.bf16.mxu1 %v6473_v32  ;;  %v6588_v32 = vunpack.c.h.s8.bf16 %v116_v60 }
  0x8b   :  { %1074 = vperm.xlu0 %5799, %v230_v51   ;;  %v233_v51 = vld [vmem:[%s7843_s1 + $0x148] sm:$0xff] }
  0x8c   :  { %1079 = vperm.xlu1 %5800, %v231_v35   ;;  %v235_v35 = vld [vmem:[%s7843_s1 + $0x158] sm:$0xff]  ;;  %8070 = vst [vmem:[#allocation41_spill] sm:$0xff] %v6588_v32 }
  0x8f   :  { %489 = vmatmul.mubr.bf16.gmra.mrb[12].mxu0 %v6461_v14  ;;  %1084 = vperm.xlu0 %5799, %v232_v63   ;;  %v6581_v63 = vunpack.c.h.s8.bf16 %v93_v43  ;;  %v239_v43 = vld [vmem:[%s7843_s1 + $0x178] sm:$0xff] }
  0x90   :  { %496 = vmatprep.mubr.bf16.mxu0 %v6466_v28  ;;  %1089 = vperm.xlu1 %5800, %v233_v51   ;;  %v237_v51 = vld [vmem:[%s7843_s1 + $0x168] sm:$0xff] }
  0x91   :  { %5034 = vmatmul.mubr.bf16.gmra.mrb[28].mxu1 %v6498_v50  ;;  %v6563_v50 = vunpack.c.l.s8.bf16 %v116_v60  ;;  %v96_v60 = vld [vmem:[%s7842_s0 + $0x60] sm:$0xff] }
  0x92   :  { %5037 = vmatprep.mubr.bf16.mxu1 %v6503_v61  ;;  %v6556_v61 = vunpack.c.h.s8.bf16 %v94_v62  ;;  %v236_v62 = vld [vmem:[%s7843_s1 + $0x160] sm:$0xff] }
  0x93   :  { %8068 = vst [vmem:[#allocation39_spill] sm:$0xff] %v6563_v50 }
  0x94   :  { %1099 = vperm.xlu1 %5800, %v235_v35   ;;  %v5833_v35 = vld [vmem:[#allocation2] sm:$0xff]  }
  0x95   :  { %5117 = vmatprep.subr.bf16.mxu1 %v5833_v35 }
  0x97   :  { %497 = vmatmul.mubr.bf16.gmra.mrb[16].mxu0 %v6491_v46 }
  0x98   :  { %504 = vmatprep.mubr.bf16.mxu0 %v6496_v49  ;;  %1109 = vperm.xlu1 %5800, %v237_v51  }
  0x99   :  { %5038 = vmatmul.mubr.bf16.gmra.mrb[32].mxu1 %v6528_v47  ;;  %v6558_v47 = vunpack.c.h.s8.bf16 %v113_v21  ;;  %v97_v21 = vld [vmem:[%s7842_s0 + $0x68] sm:$0xff] }
  0x9a   :  { %5041 = vmatprep.mubr.bf16.mxu1 %v6533_v0  ;;  %v234_v0 = vld [vmem:[%s7843_s1 + $0x150] sm:$0xff] }
  0x9b   :  { %8067 = vst [vmem:[#allocation38_spill] sm:$0xff] %v6558_v47  ;;  %1094 = vperm.xlu0 %5799, %v234_v0   ;;  %v119_v0 = vld [vmem:[%s7842_s0 + $0x118] sm:$0xff] }
  0x9c   :  { %v6593_v15 = vunpack.c.l.s8.bf16 %v119_v0  ;;  %1119 = vperm.xlu1 %5800, %v239_v43   ;;  %v6609_v51 = vunpack.c.h.s8.bf16 %v119_v0  ;;  %v99_v0 = vld [vmem:[%s7842_s0 + $0x78] sm:$0xff] }
  0x9e   :  { %8071 = vst [vmem:[#allocation42_spill] sm:$0xff] %v6593_v15  ;;  %8074 = vst [vmem:[#allocation45_spill] sm:$0xff] %v6609_v51 }
  0x9f   :  { %505 = vmatmul.mubr.bf16.gmra.mrb[20].mxu0 %v6521_v29  ;;  %1104 = vperm.xlu0 %5799, %v236_v62   ;;  %v6605_v62 = vunpack.c.l.s8.bf16 %v96_v60 }
  0xa0   :  { %512 = vmatprep.mubr.bf16.mxu0 %v6526_v36 }
  0xa1   :  { %5042 = vmatmul.mubr.bf16.gmra.mrb[36].mxu1 %v6558_v47  ;;  %v6586_v47 = vunpack.c.l.s8.bf16 %v97_v21  ;;  %8072 = vst [vmem:[#allocation43_spill] sm:$0xff] %v6605_v62 }
  0xa2   :  { %5045 = vmatprep.mubr.bf16.mxu1 %v6563_v50  ;;  %v238_v50 = vld [vmem:[%s7843_s1 + $0x170] sm:$0xff] }
  0xa3   :  { %8069 = vst [vmem:[#allocation40_spill] sm:$0xff] %v6586_v47  ;;  %1114 = vperm.xlu0 %5799, %v238_v50   ;;  %v6607_v50 = vunpack.c.h.s8.bf16 %v97_v21  ;;  %v5834_v21 = vld [vmem:[#allocation2 + $0x8] sm:$0xff]  }
  0xa5   :  { %8073 = vst [vmem:[#allocation44_spill] sm:$0xff] %v6607_v50 }
  0xa7   :  { %513 = vmatmul.mubr.bf16.gmra.mrb[24].mxu0 %v6551_v34 }
  0xa8   :  { %520 = vmatprep.mubr.bf16.mxu0 %v6556_v61 }
  0xa9   :  { %5046 = vmatmul.mubr.bf16.gmra.mrb[40].mxu1 %v6588_v32  ;;  %v100_v32 = vld [vmem:[%s7842_s0 + $0x80] sm:$0xff] }
  0xaa   :  { %5049 = vmatprep.mubr.bf16.mxu1 %v6593_v15  ;;  %v6618_v15 = vunpack.c.h.s8.bf16 %v96_v60  ;;  %v6620_v43 = vunpack.c.l.s8.bf16 %v100_v32  ;;  %v6629_v60 = vunpack.c.l.s8.bf16 %v99_v0 }
  0xac   :  { %8075 = vst [vmem:[#allocation46_spill] sm:$0xff] %v6618_v15  ;;  %8076 = vst [vmem:[#allocation47_spill] sm:$0xff] %v6620_v43 }
  0xad   :  { %8077 = vst [vmem:[#allocation48_spill] sm:$0xff] %v6629_v60 }
  0xaf   :  { %521 = vmatmul.mubr.bf16.gmra.mrb[28].mxu0 %v6581_v63 }
  0xb0   :  { %528 = vmatprep.mubr.bf16.mxu0 %v6586_v47 }
  0xb1   :  { %5050 = vmatmul.mubr.bf16.gmra.mrb[44].mxu1 %v6609_v51  ;;  %v6631_v51 = vunpack.c.h.s8.bf16 %v100_v32  ;;  %v6640_v32 = vunpack.c.h.s8.bf16 %v99_v0 }
  0xb2   :  { %5069 = vmatprep.mubr.bf16.mxu1 %v6106_v1  ;;  %v5835_v1 = vld [vmem:[#allocation2 + $0x10] sm:$0xff]  }
  0xb3   :  { %8078 = vst [vmem:[#allocation49_spill] sm:$0xff] %v6631_v51  ;;  %8079 = vst [vmem:[#allocation50_spill] sm:$0xff] %v6640_v32 }
  0xb7   :  { %529 = vmatmul.mubr.bf16.gmra.mrb[32].mxu0 %v6605_v62 }
  0xb8   :  { %536 = vmatprep.mubr.bf16.mxu0 %v6607_v50 }
  0xb9   :  { %5070 = vmatmul.mubr.bf16.vlgmr.msra.gmra.mrb[48].mxu1 %v6112_v2  ;;  %v103_v2 = vld [vmem:[%s7842_s0 + $0x98] sm:$0xff] }
  0xba   :  { %5073 = vmatprep.mubr.bf16.mxu1 %v6119_v3  ;;  %5118 = vmatpush3.bf16.msra.mxu1 %v5833_v35  ;;  %v5837_v3 = vld [vmem:[#allocation2 + $0x20] sm:$0xff]   ;;  %v6642_v35 = vunpack.c.l.s8.bf16 %v103_v2 }
  0xbb   :  { %5119 = vmatprep.subr.bf16.mxu1 %v5834_v21 }
  0xbc   :  { %8080 = vst [vmem:[#allocation51_spill] sm:$0xff] %v6642_v35 }
  0xbe   :  { %5120 = vmatpush3.bf16.msra.mxu1 %v5834_v21  ;;  %v5838_v21 = vld [vmem:[#allocation2 + $0x28] sm:$0xff]  }
  0xbf   :  { %537 = vmatmul.mubr.bf16.gmra.mrb[36].mxu0 %v6618_v15  ;;  %5121 = vmatprep.subr.bf16.mxu1 %v5835_v1 }
  0xc0   :  { %544 = vmatprep.mubr.bf16.mxu0 %v6620_v43 }
  0xc1   :  { %5074 = vmatmul.mubr.bf16.gmra.mrb[52].mxu1 %v6130_v5  ;;  %v102_v5 = vld [vmem:[%s7842_s0 + $0x90] sm:$0xff] }
  0xc2   :  { %5077 = vmatprep.mubr.bf16.mxu1 %v6151_v8  ;;  %5122 = vmatpush3.bf16.msra.mxu1 %v5835_v1  ;;  %v5839_v8 = vld [vmem:[#allocation2 + $0x30] sm:$0xff]   ;;  %v6651_v0 = vunpack.c.l.s8.bf16 %v102_v5  ;;  %v5840_v1 = vld [vmem:[#allocation2 + $0x38] sm:$0xff]  }
  0xc3   :  { %5123 = vmatprep.subr.bf16.mxu1 %v5836_v58 }
  0xc4   :  { %8081 = vst [vmem:[#allocation52_spill] sm:$0xff] %v6651_v0 }
  0xc6   :  { %5124 = vmatpush3.bf16.msra.mxu1 %v5836_v58  ;;  %v6653_v58 = vunpack.c.h.s8.bf16 %v103_v2 }
  0xc7   :  { %545 = vmatmul.mubr.bf16.gmra.mrb[40].mxu0 %v6629_v60  ;;  %5125 = vmatprep.subr.bf16.mxu1 %v5837_v3 }
  0xc8   :  { %552 = vmatprep.mubr.bf16.mxu0 %v6631_v51  ;;  %8082 = vst [vmem:[#allocation53_spill] sm:$0xff] %v6653_v58 }
  0xc9   :  { %5078 = vmatmul.mubr.bf16.gmra.mrb[56].mxu1 %v6165_v10  ;;  %v106_v10 = vld [vmem:[%s7842_s0 + $0xb0] sm:$0xff] }
  0xca   :  { %5081 = vmatprep.mubr.bf16.mxu1 %v6179_v12  ;;  %5126 = vmatpush3.bf16.msra.mxu1 %v5837_v3  ;;  %v6662_v12 = vunpack.c.h.s8.bf16 %v102_v5  ;;  %v6664_v2 = vunpack.c.l.s8.bf16 %v106_v10  ;;  %v6675_v3 = vunpack.c.h.s8.bf16 %v106_v10 }
  0xcb   :  { %5127 = vmatprep.subr.bf16.mxu1 %v5838_v21 }
  0xcc   :  { %8083 = vst [vmem:[#allocation54_spill] sm:$0xff] %v6662_v12  ;;  %8084 = vst [vmem:[#allocation55_spill] sm:$0xff] %v6664_v2 }
  0xcd   :  { %8086 = vst [vmem:[#allocation57_spill] sm:$0xff] %v6675_v3 }
  0xce   :  { %5128 = vmatpush3.bf16.msra.mxu1 %v5838_v21  ;;  %v109_v21 = vld [vmem:[%s7842_s0 + $0xc8] sm:$0xff] }
  0xcf   :  { %553 = vmatmul.mubr.bf16.gmra.mrb[44].mxu0 %v6640_v32  ;;  %5129 = vmatprep.subr.bf16.mxu1 %v5839_v8 }
  0xd0   :  { %560 = vmatprep.mubr.bf16.mxu0 %v6642_v35 }
  0xd1   :  { %5082 = vmatmul.mubr.bf16.gmra.mrb[60].mxu1 %v6206_v18  ;;  %v105_v18 = vld [vmem:[%s7842_s0 + $0xa8] sm:$0xff] }
  0xd2   :  { %5085 = vmatprep.mubr.bf16.mxu1 %v6228_v22  ;;  %5130 = vmatpush3.bf16.msra.mxu1 %v5839_v8  ;;  %v6673_v22 = vunpack.c.l.s8.bf16 %v105_v18  ;;  %v6684_v5 = vunpack.c.h.s8.bf16 %v105_v18  ;;  %v6697_v8 = vunpack.c.h.s8.bf16 %v109_v21 }
  0xd3   :  { %5131 = vmatprep.subr.bf16.mxu1 %v5840_v1 }
  0xd4   :  { %8085 = vst [vmem:[#allocation56_spill] sm:$0xff] %v6673_v22  ;;  %8087 = vst [vmem:[#allocation58_spill] sm:$0xff] %v6684_v5 }
  0xd5   :  { %8090 = vst [vmem:[#allocation61_spill] sm:$0xff] %v6697_v8 }
  0xd6   :  { %5132 = vmatpush3.bf16.msra.mxu1 %v5840_v1 }
  0xd7   :  { %561 = vmatmul.mubr.bf16.gmra.mrb[48].mxu0 %v6651_v0 }
  0xd8   :  { %568 = vmatprep.mubr.bf16.mxu0 %v6653_v58 }
  0xd9   :  { %5086 = vmatmul.mubr.bf16.gmra.mrb[64].mxu1 %v6248_v26  ;;  %v6686_v26 = vunpack.c.l.s8.bf16 %v109_v21 }
  0xda   :  { %5089 = vmatprep.mubr.bf16.mxu1 %v6266_v30  ;;  %v108_v30 = vld [vmem:[%s7842_s0 + $0xc0] sm:$0xff] }
  0xdb   :  { %8088 = vst [vmem:[#allocation59_spill] sm:$0xff] %v6686_v26  ;;  %v6706_v1 = vunpack.c.h.s8.bf16 %v108_v30 }
  0xdd   :  { %8091 = vst [vmem:[#allocation62_spill] sm:$0xff] %v6706_v1 }
  0xdf   :  { %569 = vmatmul.mubr.bf16.gmra.mrb[52].mxu0 %v6662_v12  ;;  %v6790_v12 = vpop.permute.xlu1 %894 }
  0xe0   :  { %576 = vmatprep.mubr.bf16.mxu0 %v6664_v2  ;;  %8106 = vst [vmem:[#allocation77_spill] sm:$0xff] %v6790_v12 }
  0xe1   :  { %5090 = vmatmul.mubr.bf16.gmra.mrb[68].mxu1 %v6284_v37  ;;  %v6695_v37 = vunpack.c.l.s8.bf16 %v108_v30 }
  0xe2   :  { %5093 = vmatprep.mubr.bf16.mxu1 %v6295_v39  ;;  %v112_v39 = vld [vmem:[%s7842_s0 + $0xe0] sm:$0xff] }
  0xe3   :  { %8089 = vst [vmem:[#allocation60_spill] sm:$0xff] %v6695_v37  ;;  %v6719_v10 = vunpack.c.h.s8.bf16 %v112_v39  ;;  %v6798_v27 = vpop.permute.xlu1 %899 }
  0xe4   :  { %8107 = vst [vmem:[#allocation78_spill] sm:$0xff] %v6798_v27 }
  0xe5   :  { %8094 = vst [vmem:[#allocation65_spill] sm:$0xff] %v6719_v10 }
  0xe7   :  { %577 = vmatmul.mubr.bf16.gmra.mrb[56].mxu0 %v6673_v22  ;;  %v6812_v24 = vpop.permute.xlu1 %909 }
  0xe8   :  { %584 = vmatprep.mubr.bf16.mxu0 %v6675_v3  ;;  %8109 = vst [vmem:[#allocation80_spill] sm:$0xff] %v6812_v24 }
  0xe9   :  { %5094 = vmatmul.mubr.bf16.gmra.mrb[72].mxu1 %v6319_v48  ;;  %v6708_v48 = vunpack.c.l.s8.bf16 %v112_v39 }
  0xea   :  { %5097 = vmatprep.mubr.bf16.mxu1 %v6336_v53  ;;  %v111_v53 = vld [vmem:[%s7842_s0 + $0xd8] sm:$0xff] }
  0xeb   :  { %8092 = vst [vmem:[#allocation63_spill] sm:$0xff] %v6708_v48  ;;  %v6728_v18 = vunpack.c.h.s8.bf16 %v111_v53  ;;  %v6826_v56 = vpop.permute.xlu1 %919 }
  0xec   :  { %8111 = vst [vmem:[#allocation82_spill] sm:$0xff] %v6826_v56 }
  0xed   :  { %8095 = vst [vmem:[#allocation66_spill] sm:$0xff] %v6728_v18 }
  0xef   :  { %585 = vmatmul.mubr.bf16.gmra.mrb[60].mxu0 %v6684_v5 }
  0xf0   :  { %592 = vmatprep.mubr.bf16.mxu0 %v6686_v26 }
  0xf1   :  { %5098 = vmatmul.mubr.bf16.gmra.mrb[76].mxu1 %v6354_v59  ;;  %v6717_v59 = vunpack.c.l.s8.bf16 %v111_v53 }
  0xf2   :  { %5101 = vmatprep.mubr.bf16.mxu1 %v6125_v4  ;;  %v115_v4 = vld [vmem:[%s7842_s0 + $0xf8] sm:$0xff] }
  0xf3   :  { %8093 = vst [vmem:[#allocation64_spill] sm:$0xff] %v6717_v59  ;;  %v6741_v21 = vunpack.c.h.s8.bf16 %v115_v4 }
  0xf5   :  { %8098 = vst [vmem:[#allocation69_spill] sm:$0xff] %v6741_v21 }
  0xf7   :  { %593 = vmatmul.mubr.bf16.gmra.mrb[64].mxu0 %v6695_v37 }
  0xf8   :  { %600 = vmatprep.mubr.bf16.mxu0 %v6697_v8 }
  0xf9   :  { %5102 = vmatmul.mubr.bf16.gmra.mrb[80].mxu1 %v6137_v6  ;;  %v6730_v6 = vunpack.c.l.s8.bf16 %v115_v4 }
  0xfa   :  { %5105 = vmatprep.mubr.bf16.mxu1 %v6145_v7  ;;  %v114_v7 = vld [vmem:[%s7842_s0 + $0xf0] sm:$0xff] }
  0xfb   :  { %8096 = vst [vmem:[#allocation67_spill] sm:$0xff] %v6730_v6  ;;  %v6749_v30 = vunpack.c.h.s8.bf16 %v114_v7 }
  0xfd   :  { %8099 = vst [vmem:[#allocation70_spill] sm:$0xff] %v6749_v30 }
  0xff   :  { %601 = vmatmul.mubr.bf16.gmra.mrb[68].mxu0 %v6706_v1 }
 0x100   :  { %608 = vmatprep.mubr.bf16.mxu0 %v6708_v48 }
 0x101   :  { %5106 = vmatmul.mubr.bf16.gmra.mrb[84].mxu1 %v6159_v9  ;;  %v6739_v9 = vunpack.c.l.s8.bf16 %v114_v7 }
 0x102   :  { %5109 = vmatprep.mubr.bf16.mxu1 %v6173_v11  ;;  %v118_v11 = vld [vmem:[%s7842_s0 + $0x110] sm:$0xff] }
 0x103   :  { %8097 = vst [vmem:[#allocation68_spill] sm:$0xff] %v6739_v9  ;;  %v6751_v39 = vunpack.c.l.s8.bf16 %v118_v11  ;;  %v6760_v53 = vunpack.c.h.s8.bf16 %v118_v11 }
 0x105   :  { %8100 = vst [vmem:[#allocation71_spill] sm:$0xff] %v6751_v39  ;;  %8102 = vst [vmem:[#allocation73_spill] sm:$0xff] %v6760_v53 }
 0x107   :  { %609 = vmatmul.mubr.bf16.gmra.mrb[72].mxu0 %v6717_v59 }
 0x108   :  { %616 = vmatprep.mubr.bf16.mxu0 %v6719_v10 }
 0x109   :  { %5110 = vmatmul.mubr.bf16.gmra.mrb[88].mxu1 %v6187_v13  ;;  %v117_v13 = vld [vmem:[%s7842_s0 + $0x108] sm:$0xff] }
 0x10a   :  { %5113 = vmatprep.mubr.bf16.mxu1 %v6214_v19  ;;  %v6758_v19 = vunpack.c.l.s8.bf16 %v117_v13 }
 0x10c   :  { %8101 = vst [vmem:[#allocation72_spill] sm:$0xff] %v6758_v19 }
 0x10f   :  { %617 = vmatmul.mubr.bf16.gmra.mrb[76].mxu0 %v6728_v18 }
 0x110   :  { %624 = vmatprep.mubr.bf16.mxu0 %v6730_v6 }
 0x111   :  { %5114 = vmatmul.mubr.bf16.gmra.mrb[92].mxu1 %v6242_v25  ;;  %v6764_v25 = vunpack.c.h.s8.bf16 %v117_v13 }
 0x113   :  { %8103 = vst [vmem:[#allocation74_spill] sm:$0xff] %v6764_v25 }
 0x117   :  { %625 = vmatmul.mubr.bf16.gmra.mrb[80].mxu0 %v6739_v9 }
 0x118   :  { %632 = vmatprep.mubr.bf16.mxu0 %v6741_v21 }
 0x11f   :  { %633 = vmatmul.mubr.bf16.gmra.mrb[84].mxu0 %v6749_v30 }
 0x120   :  { %640 = vmatprep.mubr.bf16.mxu0 %v6751_v39 }
 0x127   :  { %641 = vmatmul.mubr.bf16.gmra.mrb[88].mxu0 %v6758_v19 }
 0x128   :  { %648 = vmatprep.mubr.bf16.mxu0 %v6760_v53  ;;  %v6776_v53 = vpop.permute.xlu0 %884 }
 0x129   :  { %8104 = vst [vmem:[#allocation75_spill] sm:$0xff] %v6776_v53 }
 0x12c   :  { %v5007_v4 = vpop.f32.mrb[0].mxu1  ;;  %v6784_v3 = vpop.permute.xlu0 %889 }
 0x12d   :  { %v691_v7 = vpop.f32.mrb[1].mxu1  ;;  %8105 = vst [vmem:[#allocation76_spill] sm:$0xff] %v6784_v3 }
 0x12e   :  { %v5008_v39 = vpop.f32.mrb[2].mxu1 }
 0x12f   :  { %649 = vmatmul.mubr.bf16.gmra.mrb[92].mxu0 %v6764_v25  ;;  %v694_v30 = vpop.f32.mrb[3].mxu1 }
 0x130   :  { %1931 = vmatprep.mubr.bf16.mxu0 %v6200_v17 }
 0x134   :  { %v5011_v21 = vpop.f32.mrb[4].mxu1 }
 0x135   :  { %v707_v9 = vpop.f32.mrb[5].mxu1 }
 0x136   :  { %v5012_v6 = vpop.f32.mrb[6].mxu1 }
 0x137   :  { %v710_v18 = vpop.f32.mrb[7].mxu1 }
 0x13c   :  { %v6768_v11 = vpop.f32.mrb[8].mxu1 }
 0x13d   :  { %v6770_v10 = vpop.f32.mrb[9].mxu1 }
 0x13e   :  { %v6772_v19 = vpop.f32.mrb[10].mxu1 }
 0x13f   :  { %v6774_v13 = vpop.f32.mrb[11].mxu1 }
 0x144   :  { %v6778_v48 = vpop.f32.mrb[12].mxu1 }
 0x145   :  { %v6780_v8 = vpop.f32.mrb[13].mxu1 }
 0x146   :  { %v6782_v5 = vpop.f32.mrb[14].mxu1 }
 0x147   :  { %v6786_v22 = vpop.f32.mrb[15].mxu1 }
 0x14a   :  { %v466_v25 = vpop.f32.mrb[0].mxu0 }
 0x14b   :  { %v692_v17 = vadd.f32 %v691_v7, %v466_v25  ;;  %v468_v59 = vpop.f32.mrb[1].mxu0 }
 0x14c   :  { %v469_v1 = vpop.f32.mrb[2].mxu0  ;;  %v6792_v58 = vpop.f32.mrb[16].mxu1 }
 0x14d   :  { %v695_v37 = vadd.f32 %v694_v30, %v469_v1  ;;  %v471_v26 = vpop.f32.mrb[3].mxu0  ;;  %v1122_v2 = vmul.f32 %v6776_v53, %v692_v17  ;;  %v6794_v1 = vpop.f32.mrb[17].mxu1 }
 0x14e   :  { %v6796_v0 = vpop.f32.mrb[18].mxu1 }
 0x14f   :  { %v1123_v57 = vmul.f32 %v6784_v3, %v695_v37  ;;  %v6800_v17 = vpop.f32.mrb[19].mxu1 }
 0x151   :  { %v1170_v59 = vpack.c.bf16 %v1123_v57, %v1122_v2 }
 0x152   :  { %v474_v25 = vpop.f32.mrb[4].mxu0 }
 0x153   :  { %v700_v7 = vadd.f32 %v5007_v4, %v474_v25  ;;  %v476_v42 = vpop.f32.mrb[5].mxu0  ;;  %5133 = vmatprep.mubr.bf16.mxu1 %v1170_v59 }
 0x154   :  { %v477_v26 = vpop.f32.mrb[6].mxu0  ;;  %v6804_v42 = vpop.permute.xlu0 %904 }
 0x155   :  { %v703_v30 = vadd.f32 %v5008_v39, %v477_v26  ;;  %v479_v41 = vpop.f32.mrb[7].mxu0  ;;  %v1124_v37 = vmul.f32 %v6790_v12, %v700_v7  ;;  %8108 = vst [vmem:[#allocation79_spill] sm:$0xff] %v6804_v42  ;;  %v6806_v3 = vpop.f32.mrb[20].mxu1 }
 0x156   :  { %v6808_v39 = vpop.f32.mrb[21].mxu1 }
 0x157   :  { %v1125_v57 = vmul.f32 %v6798_v27, %v703_v30  ;;  %v6810_v35 = vpop.f32.mrb[22].mxu1 }
 0x158   :  { %v6814_v7 = vpop.f32.mrb[23].mxu1 }
 0x159   :  { %v1171_v2 = vpack.c.bf16 %v1125_v57, %v1124_v37  ;;  %v6818_v57 = vpop.permute.xlu0 %914 }
 0x15a   :  { %v482_v4 = vpop.f32.mrb[8].mxu0  ;;  %8110 = vst [vmem:[#allocation81_spill] sm:$0xff] %v6818_v57 }
 0x15b   :  { %v708_v59 = vadd.f32 %v707_v9, %v482_v4  ;;  %v484_v25 = vpop.f32.mrb[9].mxu0  ;;  %5134 = vmatmul.mubr.bf16.vlgmr.msra.gmra.mrb[48].mxu1 %v1171_v2 }
 0x15c   :  { %v485_v41 = vpop.f32.mrb[10].mxu0  ;;  %v6820_v27 = vpop.f32.mrb[24].mxu1 }
 0x15d   :  { %v711_v26 = vadd.f32 %v710_v18, %v485_v41  ;;  %v487_v53 = vpop.f32.mrb[11].mxu0  ;;  %v1126_v30 = vmul.f32 %v6804_v42, %v708_v59 }
 0x15e   :  { %v6822_v53 = vpop.f32.mrb[25].mxu1 }
 0x15f   :  { %v1127_v37 = vmul.f32 %v6812_v24, %v711_v26  ;;  %v6824_v32 = vpop.f32.mrb[26].mxu1 }
 0x160   :  { %v6828_v59 = vpop.f32.mrb[27].mxu1 }
 0x161   :  { %v1172_v9 = vpack.c.bf16 %v1127_v37, %v1126_v30  ;;  %v6832_v37 = vpop.permute.xlu0 %924 }
 0x162   :  { %v490_v2 = vpop.f32.mrb[12].mxu0  ;;  %8112 = vst [vmem:[#allocation83_spill] sm:$0xff] %v6832_v37 }
 0x163   :  { %v716_v4 = vadd.f32 %v5011_v21, %v490_v2  ;;  %v492_v25 = vpop.f32.mrb[13].mxu0  ;;  %5137 = vmatprep.mubr.bf16.mxu1 %v1172_v9 }
 0x164   :  { %v493_v18 = vpop.f32.mrb[14].mxu0 }
 0x165   :  { %v719_v41 = vadd.f32 %v5012_v6, %v493_v18  ;;  %v495_v12 = vpop.f32.mrb[15].mxu0  ;;  %v1128_v26 = vmul.f32 %v6818_v57, %v716_v4  ;;  %v6835_v6 = vpop.f32.mrb[28].mxu1 }
 0x166   :  { %v6837_v18 = vpop.f32.mrb[29].mxu1  ;;  %v6842_v4 = vpop.permute.xlu1 %929 }
 0x167   :  { %v1129_v30 = vmul.f32 %v6826_v56, %v719_v41  ;;  %v6840_v51 = vpop.f32.mrb[30].mxu1  ;;  %8113 = vst [vmem:[#allocation84_spill] sm:$0xff] %v6842_v4 }
 0x168   :  { %v6844_v41 = vpop.f32.mrb[31].mxu1 }
 0x169   :  { %v1173_v21 = vpack.c.bf16 %v1129_v30, %v1128_v26 }
 0x16a   :  { %v498_v9 = vpop.f32.mrb[16].mxu0 }
 0x16b   :  { %v724_v2 = vadd.f32 %v6770_v10, %v498_v9  ;;  %v500_v25 = vpop.f32.mrb[17].mxu0  ;;  %5138 = vmatmul.mubr.bf16.gmra.mrb[52].mxu1 %v1173_v21  ;;  %v6848_v21 = vpop.permute.xlu0 %934 }
 0x16c   :  { %v501_v12 = vpop.f32.mrb[18].mxu0  ;;  %8114 = vst [vmem:[#allocation85_spill] sm:$0xff] %v6848_v21 }
 0x16d   :  { %v727_v24 = vadd.f32 %v6774_v13, %v501_v12  ;;  %v503_v42 = vpop.f32.mrb[19].mxu0  ;;  %v1130_v26 = vmul.f32 %v6832_v37, %v724_v2  ;;  %v6851_v13 = vpop.f32.mrb[32].mxu1 }
 0x16e   :  { %v6853_v12 = vpop.f32.mrb[33].mxu1  ;;  %v6858_v2 = vpop.permute.xlu1 %939 }
 0x16f   :  { %v1131_v10 = vmul.f32 %v6842_v4, %v727_v24  ;;  %v6856_v60 = vpop.f32.mrb[34].mxu1  ;;  %8115 = vst [vmem:[#allocation86_spill] sm:$0xff] %v6858_v2 }
 0x170   :  { %v6860_v24 = vpop.f32.mrb[35].mxu1 }
 0x171   :  { %v1174_v30 = vpack.c.bf16 %v1131_v10, %v1130_v26  ;;  %v6864_v10 = vpop.permute.xlu0 %944 }
 0x172   :  { %v506_v9 = vpop.f32.mrb[20].mxu0  ;;  %8116 = vst [vmem:[#allocation87_spill] sm:$0xff] %v6864_v10 }
 0x173   :  { %v732_v25 = vadd.f32 %v6768_v11, %v506_v9  ;;  %v508_v56 = vpop.f32.mrb[21].mxu0  ;;  %5141 = vmatprep.mubr.bf16.mxu1 %v1174_v30 }
 0x174   :  { %v509_v42 = vpop.f32.mrb[22].mxu0 }
 0x175   :  { %v735_v57 = vadd.f32 %v6772_v19, %v509_v42  ;;  %v511_v55 = vpop.f32.mrb[23].mxu0  ;;  %v1132_v26 = vmul.f32 %v6848_v21, %v732_v25  ;;  %v6867_v19 = vpop.f32.mrb[36].mxu1 }
 0x176   :  { %v6869_v42 = vpop.f32.mrb[37].mxu1  ;;  %v6874_v25 = vpop.permute.xlu1 %949 }
 0x177   :  { %v1133_v11 = vmul.f32 %v6858_v2, %v735_v57  ;;  %v6872_v43 = vpop.f32.mrb[38].mxu1  ;;  %8117 = vst [vmem:[#allocation88_spill] sm:$0xff] %v6874_v25 }
 0x178   :  { %v6876_v57 = vpop.f32.mrb[39].mxu1 }
 0x179   :  { %v1175_v56 = vpack.c.bf16 %v1133_v11, %v1132_v26  ;;  %v6880_v11 = vpop.permute.xlu0 %954 }
 0x17a   :  { %v514_v30 = vpop.f32.mrb[24].mxu0  ;;  %8118 = vst [vmem:[#allocation89_spill] sm:$0xff] %v6880_v11 }
 0x17b   :  { %v740_v9 = vadd.f32 %v6780_v8, %v514_v30  ;;  %v516_v4 = vpop.f32.mrb[25].mxu0  ;;  %5142 = vmatmul.mubr.bf16.gmra.mrb[56].mxu1 %v1175_v56 }
 0x17c   :  { %v517_v55 = vpop.f32.mrb[26].mxu0 }
 0x17d   :  { %v743_v37 = vadd.f32 %v6786_v22, %v517_v55  ;;  %v519_v45 = vpop.f32.mrb[27].mxu0  ;;  %v1134_v26 = vmul.f32 %v6864_v10, %v740_v9  ;;  %v6883_v22 = vpop.f32.mrb[40].mxu1 }
 0x17e   :  { %v6885_v55 = vpop.f32.mrb[41].mxu1  ;;  %v6890_v9 = vpop.permute.xlu1 %959 }
 0x17f   :  { %v1135_v8 = vmul.f32 %v6874_v25, %v743_v37  ;;  %v6888_v15 = vpop.f32.mrb[42].mxu1  ;;  %8119 = vst [vmem:[#allocation90_spill] sm:$0xff] %v6890_v9 }
 0x180   :  { %v6892_v37 = vpop.f32.mrb[43].mxu1 }
 0x181   :  { %v1176_v4 = vpack.c.bf16 %v1135_v8, %v1134_v26  ;;  %v6896_v8 = vpop.permute.xlu0 %964 }
 0x182   :  { %v522_v56 = vpop.f32.mrb[28].mxu0  ;;  %8120 = vst [vmem:[#allocation91_spill] sm:$0xff] %v6896_v8 }
 0x183   :  { %v748_v30 = vadd.f32 %v6778_v48, %v522_v56  ;;  %v524_v2 = vpop.f32.mrb[29].mxu0  ;;  %5145 = vmatprep.mubr.bf16.mxu1 %v1176_v4 }
 0x184   :  { %v525_v45 = vpop.f32.mrb[30].mxu0 }
 0x185   :  { %v751_v21 = vadd.f32 %v6782_v5, %v525_v45  ;;  %v527_v44 = vpop.f32.mrb[31].mxu0  ;;  %v1136_v26 = vmul.f32 %v6880_v11, %v748_v30  ;;  %v6899_v5 = vpop.f32.mrb[44].mxu1 }
 0x186   :  { %v6901_v45 = vpop.f32.mrb[45].mxu1  ;;  %v6906_v30 = vpop.permute.xlu1 %969 }
 0x187   :  { %v1137_v48 = vmul.f32 %v6890_v9, %v751_v21  ;;  %v6904_v50 = vpop.f32.mrb[46].mxu1 }
 0x188   :  { %v6908_v21 = vpop.f32.mrb[47].mxu1 }
 0x189   :  { %v1177_v2 = vpack.c.bf16 %v1137_v48, %v1136_v26 }
 0x18a   :  { %v530_v4 = vpop.f32.mrb[32].mxu0  ;;  %v6916_v11 = vpop.permute.xlu1 %979 }
 0x18b   :  { %v756_v56 = vadd.f32 %v6794_v1, %v530_v4  ;;  %v532_v25 = vpop.f32.mrb[33].mxu0  ;;  %5146 = vmatmul.mubr.bf16.gmra.mrb[60].mxu1 %v1177_v2 }
 0x18c   :  { %v533_v44 = vpop.f32.mrb[34].mxu0 }
 0x18d   :  { %v759_v10 = vadd.f32 %v6800_v17, %v533_v44  ;;  %v535_v33 = vpop.f32.mrb[35].mxu0  ;;  %v1138_v26 = vmul.f32 %v6896_v8, %v756_v56  ;;  %v6914_v44 = vpop.permute.xlu0 %974 }
 0x18f   :  { %v1139_v1 = vmul.f32 %v6906_v30, %v759_v10 }
 0x191   :  { %v1178_v25 = vpack.c.bf16 %v1139_v1, %v1138_v26 }
 0x192   :  { %v538_v48 = vpop.f32.mrb[36].mxu0 }
 0x193   :  { %v764_v2 = vadd.f32 %v6792_v58, %v538_v48  ;;  %v540_v4 = vpop.f32.mrb[37].mxu0  ;;  %5149 = vmatprep.mubr.bf16.mxu1 %v1178_v25 }
 0x194   :  { %v541_v9 = vpop.f32.mrb[38].mxu0 }
 0x195   :  { %v767_v17 = vadd.f32 %v6796_v0, %v541_v9  ;;  %v543_v33 = vpop.f32.mrb[39].mxu0  ;;  %v1140_v31 = vmul.f32 %v6914_v44, %v764_v2  ;;  %v6922_v0 = vpop.permute.xlu0 %984 }
 0x196   :  { %v6924_v9 = vpop.permute.xlu1 %989 }
 0x197   :  { %v1141_v56 = vmul.f32 %v6916_v11, %v767_v17 }
 0x199   :  { %v1179_v8 = vpack.c.bf16 %v1141_v56, %v1140_v31 }
 0x19a   :  { %v546_v10 = vpop.f32.mrb[40].mxu0 }
 0x19b   :  { %v772_v26 = vadd.f32 %v6808_v39, %v546_v10  ;;  %v548_v1 = vpop.f32.mrb[41].mxu0  ;;  %5150 = vmatmul.mubr.bf16.gmra.mrb[64].mxu1 %v1179_v8 }
 0x19c   :  { %v549_v58 = vpop.f32.mrb[42].mxu0  ;;  %v6932_v1 = vpop.permute.xlu1 %999 }
 0x19d   :  { %v775_v25 = vadd.f32 %v6814_v7, %v549_v58  ;;  %v551_v48 = vpop.f32.mrb[43].mxu0  ;;  %v1142_v4 = vmul.f32 %v6922_v0, %v772_v26  ;;  %v6930_v7 = vpop.permute.xlu0 %994 }
 0x19f   :  { %v1143_v2 = vmul.f32 %v6924_v9, %v775_v25 }
 0x1a1   :  { %v1180_v33 = vpack.c.bf16 %v1143_v2, %v1142_v4 }
 0x1a2   :  { %v554_v17 = vpop.f32.mrb[44].mxu0 }
 0x1a3   :  { %v780_v31 = vadd.f32 %v6806_v3, %v554_v17  ;;  %v556_v56 = vpop.f32.mrb[45].mxu0  ;;  %5153 = vmatprep.mubr.bf16.mxu1 %v1180_v33 }
 0x1a4   :  { %v557_v39 = vpop.f32.mrb[46].mxu0  ;;  %v6940_v56 = vpop.permute.xlu1 %1009 }
 0x1a5   :  { %v783_v8 = vadd.f32 %v6810_v35, %v557_v39  ;;  %v559_v10 = vpop.f32.mrb[47].mxu0  ;;  %v1144_v58 = vmul.f32 %v6930_v7, %v780_v31  ;;  %v6938_v35 = vpop.permute.xlu0 %1004 }
 0x1a7   :  { %v1145_v26 = vmul.f32 %v6932_v1, %v783_v8 }
 0x1a9   :  { %v1181_v48 = vpack.c.bf16 %v1145_v26, %v1144_v58 }
 0x1aa   :  { %v562_v25 = vpop.f32.mrb[48].mxu0 }
 0x1ab   :  { %v788_v4 = vadd.f32 %v6822_v53, %v562_v25  ;;  %v564_v2 = vpop.f32.mrb[49].mxu0  ;;  %5154 = vmatmul.mubr.bf16.gmra.mrb[68].mxu1 %v1181_v48 }
 0x1ac   :  { %v565_v3 = vpop.f32.mrb[50].mxu0  ;;  %v6948_v2 = vpop.permute.xlu1 %1019 }
 0x1ad   :  { %v791_v33 = vadd.f32 %v6828_v59, %v565_v3  ;;  %v567_v17 = vpop.f32.mrb[51].mxu0  ;;  %v1146_v39 = vmul.f32 %v6938_v35, %v788_v4  ;;  %v6946_v59 = vpop.permute.xlu0 %1014 }
 0x1af   :  { %v1147_v31 = vmul.f32 %v6940_v56, %v791_v33 }
 0x1b1   :  { %v1182_v10 = vpack.c.bf16 %v1147_v31, %v1146_v39 }
 0x1b2   :  { %v570_v8 = vpop.f32.mrb[52].mxu0 }
 0x1b3   :  { %v796_v58 = vadd.f32 %v6820_v27, %v570_v8  ;;  %v572_v26 = vpop.f32.mrb[53].mxu0  ;;  %5157 = vmatprep.mubr.bf16.mxu1 %v1182_v10 }
 0x1b4   :  { %v573_v53 = vpop.f32.mrb[54].mxu0  ;;  %v6956_v26 = vpop.permute.xlu1 %1029 }
 0x1b5   :  { %v799_v48 = vadd.f32 %v6824_v32, %v573_v53  ;;  %v575_v25 = vpop.f32.mrb[55].mxu0  ;;  %v1148_v3 = vmul.f32 %v6946_v59, %v796_v58  ;;  %v6954_v32 = vpop.permute.xlu0 %1024  ;;  %8121 = vst [vmem:[#allocation92_spill] sm:$0xff] %v6956_v26 }
 0x1b7   :  { %v1149_v4 = vmul.f32 %v6948_v2, %v799_v48 }
 0x1b9   :  { %v1183_v17 = vpack.c.bf16 %v1149_v4, %v1148_v3 }
 0x1ba   :  { %v578_v33 = vpop.f32.mrb[56].mxu0 }
 0x1bb   :  { %v804_v39 = vadd.f32 %v6837_v18, %v578_v33  ;;  %v580_v31 = vpop.f32.mrb[57].mxu0  ;;  %5158 = vmatmul.mubr.bf16.gmra.mrb[72].mxu1 %v1183_v17 }
 0x1bc   :  { %v581_v27 = vpop.f32.mrb[58].mxu0  ;;  %v6964_v31 = vpop.permute.xlu1 %1039 }
 0x1bd   :  { %v807_v10 = vadd.f32 %v6844_v41, %v581_v27  ;;  %v583_v8 = vpop.f32.mrb[59].mxu0  ;;  %v1150_v53 = vmul.f32 %v6954_v32, %v804_v39  ;;  %v6962_v41 = vpop.permute.xlu0 %1034  ;;  %8123 = vst [vmem:[#allocation94_spill] sm:$0xff] %v6964_v31 }
 0x1be   :  { %8122 = vst [vmem:[#allocation93_spill] sm:$0xff] %v6962_v41 }
 0x1bf   :  { %v1151_v58 = vmul.f32 %v6956_v26, %v807_v10 }
 0x1c1   :  { %v1184_v25 = vpack.c.bf16 %v1151_v58, %v1150_v53 }
 0x1c2   :  { %v586_v48 = vpop.f32.mrb[60].mxu0 }
 0x1c3   :  { %v812_v3 = vadd.f32 %v6835_v6, %v586_v48  ;;  %v588_v4 = vpop.f32.mrb[61].mxu0  ;;  %5161 = vmatprep.mubr.bf16.mxu1 %v1184_v25 }
 0x1c4   :  { %v589_v18 = vpop.f32.mrb[62].mxu0  ;;  %v6972_v4 = vpop.permute.xlu1 %1049 }
 0x1c5   :  { %v815_v17 = vadd.f32 %v6840_v51, %v589_v18  ;;  %v591_v33 = vpop.f32.mrb[63].mxu0  ;;  %v1152_v27 = vmul.f32 %v6962_v41, %v812_v3  ;;  %v6970_v51 = vpop.permute.xlu0 %1044  ;;  %8125 = vst [vmem:[#allocation96_spill] sm:$0xff] %v6972_v4 }
 0x1c6   :  { %8124 = vst [vmem:[#allocation95_spill] sm:$0xff] %v6970_v51 }
 0x1c7   :  { %v1153_v39 = vmul.f32 %v6964_v31, %v815_v17 }
 0x1c9   :  { %v1185_v8 = vpack.c.bf16 %v1153_v39, %v1152_v27 }
 0x1ca   :  { %v594_v10 = vpop.f32.mrb[64].mxu0 }
 0x1cb   :  { %v820_v53 = vadd.f32 %v6853_v12, %v594_v10  ;;  %v596_v58 = vpop.f32.mrb[65].mxu0  ;;  %5162 = vmatmul.mubr.bf16.gmra.mrb[76].mxu1 %v1185_v8 }
 0x1cc   :  { %v597_v6 = vpop.f32.mrb[66].mxu0  ;;  %v6980_v58 = vpop.permute.xlu1 %1059 }
 0x1cd   :  { %v823_v25 = vadd.f32 %v6860_v24, %v597_v6  ;;  %v599_v48 = vpop.f32.mrb[67].mxu0  ;;  %v1154_v18 = vmul.f32 %v6970_v51, %v820_v53  ;;  %v6978_v24 = vpop.permute.xlu0 %1054  ;;  %8127 = vst [vmem:[#allocation98_spill] sm:$0xff] %v6980_v58 }
 0x1ce   :  { %8126 = vst [vmem:[#allocation97_spill] sm:$0xff] %v6978_v24 }
 0x1cf   :  { %v1155_v3 = vmul.f32 %v6972_v4, %v823_v25 }
 0x1d1   :  { %v1186_v33 = vpack.c.bf16 %v1155_v3, %v1154_v18 }
 0x1d2   :  { %v602_v17 = vpop.f32.mrb[68].mxu0 }
 0x1d3   :  { %v828_v27 = vadd.f32 %v6851_v13, %v602_v17  ;;  %v604_v39 = vpop.f32.mrb[69].mxu0  ;;  %5165 = vmatprep.mubr.bf16.mxu1 %v1186_v33 }
 0x1d4   :  { %v605_v12 = vpop.f32.mrb[70].mxu0  ;;  %v6988_v39 = vpop.permute.xlu1 %1069 }
 0x1d5   :  { %v831_v8 = vadd.f32 %v6856_v60, %v605_v12  ;;  %v607_v10 = vpop.f32.mrb[71].mxu0  ;;  %v1156_v6 = vmul.f32 %v6978_v24, %v828_v27  ;;  %v6986_v60 = vpop.permute.xlu0 %1064  ;;  %8129 = vst [vmem:[#allocation100_spill] sm:$0xff] %v6988_v39 }
 0x1d6   :  { %8128 = vst [vmem:[#allocation99_spill] sm:$0xff] %v6986_v60 }
 0x1d7   :  { %v1157_v53 = vmul.f32 %v6980_v58, %v831_v8 }
 0x1d9   :  { %v1187_v48 = vpack.c.bf16 %v1157_v53, %v1156_v6 }
 0x1da   :  { %v610_v25 = vpop.f32.mrb[72].mxu0 }
 0x1db   :  { %v836_v18 = vadd.f32 %v6869_v42, %v610_v25  ;;  %v612_v3 = vpop.f32.mrb[73].mxu0  ;;  %5166 = vmatmul.mubr.bf16.gmra.mrb[80].mxu1 %v1187_v48 }
 0x1dc   :  { %v613_v13 = vpop.f32.mrb[74].mxu0  ;;  %v6996_v3 = vpop.permute.xlu1 %1079 }
 0x1dd   :  { %v839_v33 = vadd.f32 %v6876_v57, %v613_v13  ;;  %v615_v17 = vpop.f32.mrb[75].mxu0  ;;  %v1158_v12 = vmul.f32 %v6986_v60, %v836_v18  ;;  %v6994_v57 = vpop.permute.xlu0 %1074  ;;  %8131 = vst [vmem:[#allocation102_spill] sm:$0xff] %v6996_v3 }
 0x1de   :  { %8130 = vst [vmem:[#allocation101_spill] sm:$0xff] %v6994_v57 }
 0x1df   :  { %v1159_v27 = vmul.f32 %v6988_v39, %v839_v33 }
 0x1e1   :  { %v1188_v10 = vpack.c.bf16 %v1159_v27, %v1158_v12 }
 0x1e2   :  { %v618_v8 = vpop.f32.mrb[76].mxu0 }
 0x1e3   :  { %v844_v6 = vadd.f32 %v6867_v19, %v618_v8  ;;  %v620_v53 = vpop.f32.mrb[77].mxu0  ;;  %5169 = vmatprep.mubr.bf16.mxu1 %v1188_v10 }
 0x1e4   :  { %v621_v42 = vpop.f32.mrb[78].mxu0  ;;  %v7004_v53 = vpop.permute.xlu1 %1089 }
 0x1e5   :  { %v847_v48 = vadd.f32 %v6872_v43, %v621_v42  ;;  %v623_v25 = vpop.f32.mrb[79].mxu0  ;;  %v1160_v13 = vmul.f32 %v6994_v57, %v844_v6  ;;  %v7002_v43 = vpop.permute.xlu0 %1084  ;;  %8133 = vst [vmem:[#allocation104_spill] sm:$0xff] %v7004_v53 }
 0x1e6   :  { %8132 = vst [vmem:[#allocation103_spill] sm:$0xff] %v7002_v43 }
 0x1e7   :  { %v1161_v18 = vmul.f32 %v6996_v3, %v847_v48 }
 0x1e9   :  { %v1189_v17 = vpack.c.bf16 %v1161_v18, %v1160_v13 }
 0x1ea   :  { %v626_v33 = vpop.f32.mrb[80].mxu0 }
 0x1eb   :  { %v852_v12 = vadd.f32 %v6885_v55, %v626_v33  ;;  %v628_v27 = vpop.f32.mrb[81].mxu0  ;;  %5170 = vmatmul.mubr.bf16.gmra.mrb[84].mxu1 %v1189_v17 }
 0x1ec   :  { %v629_v19 = vpop.f32.mrb[82].mxu0  ;;  %v7012_v27 = vpop.permute.xlu1 %1099 }
 0x1ed   :  { %v855_v10 = vadd.f32 %v6892_v37, %v629_v19  ;;  %v631_v8 = vpop.f32.mrb[83].mxu0  ;;  %v1162_v42 = vmul.f32 %v7002_v43, %v852_v12  ;;  %v7010_v37 = vpop.permute.xlu0 %1094  ;;  %8135 = vst [vmem:[#allocation106_spill] sm:$0xff] %v7012_v27 }
 0x1ee   :  { %8134 = vst [vmem:[#allocation105_spill] sm:$0xff] %v7010_v37 }
 0x1ef   :  { %v1163_v6 = vmul.f32 %v7004_v53, %v855_v10 }
 0x1f1   :  { %v1190_v25 = vpack.c.bf16 %v1163_v6, %v1162_v42 }
 0x1f2   :  { %v634_v48 = vpop.f32.mrb[84].mxu0 }
 0x1f3   :  { %v860_v13 = vadd.f32 %v6883_v22, %v634_v48  ;;  %v636_v18 = vpop.f32.mrb[85].mxu0  ;;  %5173 = vmatprep.mubr.bf16.mxu1 %v1190_v25 }
 0x1f4   :  { %v637_v55 = vpop.f32.mrb[86].mxu0  ;;  %v7020_v18 = vpop.permute.xlu1 %1109 }
 0x1f5   :  { %v863_v17 = vadd.f32 %v6888_v15, %v637_v55  ;;  %v639_v33 = vpop.f32.mrb[87].mxu0  ;;  %v1164_v19 = vmul.f32 %v7010_v37, %v860_v13  ;;  %v7018_v15 = vpop.permute.xlu0 %1104  ;;  %8137 = vst [vmem:[#allocation108_spill] sm:$0xff] %v7020_v18 }
 0x1f6   :  { %8136 = vst [vmem:[#allocation107_spill] sm:$0xff] %v7018_v15 }
 0x1f7   :  { %v1165_v12 = vmul.f32 %v7012_v27, %v863_v17 }
 0x1f9   :  { %v1191_v8 = vpack.c.bf16 %v1165_v12, %v1164_v19 }
 0x1fa   :  { %v642_v10 = vpop.f32.mrb[88].mxu0 }
 0x1fb   :  { %v868_v42 = vadd.f32 %v6901_v45, %v642_v10  ;;  %v644_v6 = vpop.f32.mrb[89].mxu0  ;;  %5174 = vmatmul.mubr.bf16.gmra.mrb[88].mxu1 %v1191_v8 }
 0x1fc   :  { %v645_v22 = vpop.f32.mrb[90].mxu0  ;;  %v7028_v6 = vpop.permute.xlu1 %1119 }
 0x1fd   :  { %v871_v25 = vadd.f32 %v6908_v21, %v645_v22  ;;  %v647_v48 = vpop.f32.mrb[91].mxu0  ;;  %v1166_v55 = vmul.f32 %v7018_v15, %v868_v42  ;;  %v7026_v21 = vpop.permute.xlu0 %1114  ;;  %8139 = vst [vmem:[#allocation110_spill] sm:$0xff] %v7028_v6 }
 0x1fe   :  { %8138 = vst [vmem:[#allocation109_spill] sm:$0xff] %v7026_v21 }
 0x1ff   :  { %v1167_v13 = vmul.f32 %v7020_v18, %v871_v25 }
 0x201   :  { %v1192_v33 = vpack.c.bf16 %v1167_v13, %v1166_v55 }
 0x202   :  { %v650_v17 = vpop.f32.mrb[92].mxu0 }
 0x203   :  { %v876_v19 = vadd.f32 %v6899_v5, %v650_v17  ;;  %v652_v12 = vpop.f32.mrb[93].mxu0  ;;  %5177 = vmatprep.mubr.bf16.mxu1 %v1192_v33  ;;  %v7036_v5 = vld [vmem:[%s7846_s4] ss:$0 sm:$0xff] }
 0x204   :  { %v653_v45 = vpop.f32.mrb[94].mxu0 }
 0x205   :  { %v879_v8 = vadd.f32 %v6904_v50, %v653_v45  ;;  %v655_v10 = vpop.f32.mrb[95].mxu0  ;;  %v1168_v22 = vmul.f32 %v7026_v21, %v876_v19 }
 0x207   :  { %v1169_v42 = vmul.f32 %v7028_v6, %v879_v8 }
 0x209   :  { %v1193_v48 = vpack.c.bf16 %v1169_v42, %v1168_v22 }
 0x20b   :  { %5178 = vmatmul.mubr.bf16.gmra.mrb[92].mxu1 %v1193_v48 }
 0x20c   :  { %5197 = vmatprep.mubr.bf16.mxu1 %v6197_v16 }
 0x22e   :  { %v5135_v25 = vpop.f32.mrb[48].mxu1 }
 0x22f   :  { %v1781_v50 = vadd.f32 %v5135_v25, %v7036_v5  ;;  %v1581_v55 = vpop.f32.mrb[49].mxu1  ;;  %v8140_v25 = vmov 0  }
 0x230   :  { %v1779_v13 = vadd.f32 %v7036_v5, %v1581_v55  ;;  %v5136_v33 = vpop.f32.mrb[50].mxu1 }
 0x231   :  { %v1782_v17 = vadd.f32 %v5136_v33, %v7036_v5  ;;  %v1584_v19 = vpop.f32.mrb[51].mxu1  ;;  %v1829_v45 = vmax.f32 %v1781_v50, 0.0 }
 0x232   :  { %v1780_v12 = vadd.f32 %v7036_v5, %v1584_v19  ;;  %v1827_v10 = vmax.f32 %v1779_v13, 0.0 }
 0x233   :  { %v1830_v8 = vmax.f32 %v1782_v17, 0.0 }
 0x234   :  { %v1828_v22 = vmax.f32 %v1780_v12, 0.0 }
 0x235   :  { %v7042_v42 = vpack.c.bf16 %v1830_v8, %v1829_v45 }
 0x236   :  { %v7044_v48 = vpack.c.bf16 %v1828_v22, %v1827_v10 }
 0x238   :  { %1900 = vmatpush1.bf16.msra.mxu0 %v7044_v48 }
 0x239   :  { %1901 = vmatprep.subr.bf16.mxu0 %v8140_v25 }
 0x23c   :  { %1902 = vmatpush1.bf16.msra.mxu0 %v7042_v42 }
 0x23d   :  { %1903 = vmatprep.subr.bf16.mxu0 %v8140_v25 }
 0x23e   :  { %v5139_v55 = vpop.f32.mrb[52].mxu1 }
 0x23f   :  { %v1785_v33 = vadd.f32 %v5139_v55, %v7036_v5  ;;  %v1597_v19 = vpop.f32.mrb[53].mxu1 }
 0x240   :  { %v1783_v50 = vadd.f32 %v7036_v5, %v1597_v19  ;;  %v5140_v13 = vpop.f32.mrb[54].mxu1 }
 0x241   :  { %v1786_v17 = vadd.f32 %v5140_v13, %v7036_v5  ;;  %v1600_v12 = vpop.f32.mrb[55].mxu1  ;;  %v1833_v8 = vmax.f32 %v1785_v33, 0.0 }
 0x242   :  { %v1784_v45 = vadd.f32 %v7036_v5, %v1600_v12  ;;  %v1831_v22 = vmax.f32 %v1783_v50, 0.0 }
 0x243   :  { %v1834_v10 = vmax.f32 %v1786_v17, 0.0 }
 0x244   :  { %v1832_v16 = vmax.f32 %v1784_v45, 0.0 }
 0x245   :  { %v7054_v6 = vpack.c.bf16 %v1834_v10, %v1833_v8 }
 0x246   :  { %v7056_v21 = vpack.c.bf16 %v1832_v16, %v1831_v22 }
 0x248   :  { %1904 = vmatpush1.bf16.msra.mxu0 %v7056_v21 }
 0x249   :  { %1905 = vmatprep.subr.bf16.mxu0 %v8140_v25 }
 0x24c   :  { %1906 = vmatpush1.bf16.msra.mxu0 %v7054_v6 }
 0x24d   :  { %1907 = vmatprep.subr.bf16.mxu0 %v8140_v25 }
 0x24e   :  { %v5143_v55 = vpop.f32.mrb[56].mxu1 }
 0x24f   :  { %v1789_v19 = vadd.f32 %v5143_v55, %v7036_v5  ;;  %v1613_v13 = vpop.f32.mrb[57].mxu1 }
 0x250   :  { %v1787_v33 = vadd.f32 %v7036_v5, %v1613_v13  ;;  %v5144_v50 = vpop.f32.mrb[58].mxu1 }
 0x251   :  { %v1790_v17 = vadd.f32 %v5144_v50, %v7036_v5  ;;  %v1616_v12 = vpop.f32.mrb[59].mxu1  ;;  %v1837_v45 = vmax.f32 %v1789_v19, 0.0 }
 0x252   :  { %v1788_v16 = vadd.f32 %v7036_v5, %v1616_v12  ;;  %v1835_v10 = vmax.f32 %v1787_v33, 0.0 }
 0x253   :  { %v1838_v8 = vmax.f32 %v1790_v17, 0.0 }
 0x254   :  { %v1836_v22 = vmax.f32 %v1788_v16, 0.0 }
 0x255   :  { %v7066_v18 = vpack.c.bf16 %v1838_v8, %v1837_v45 }
 0x256   :  { %v7068_v15 = vpack.c.bf16 %v1836_v22, %v1835_v10 }
 0x258   :  { %1908 = vmatpush1.bf16.msra.mxu0 %v7068_v15 }
 0x259   :  { %1909 = vmatprep.subr.bf16.mxu0 %v8140_v25 }
 0x25c   :  { %1910 = vmatpush1.bf16.msra.mxu0 %v7066_v18 }
 0x25d   :  { %1911 = vmatprep.subr.bf16.mxu0 %v8140_v25 }
 0x25e   :  { %v5147_v55 = vpop.f32.mrb[60].mxu1 }
 0x25f   :  { %v1793_v13 = vadd.f32 %v5147_v55, %v7036_v5  ;;  %v1629_v50 = vpop.f32.mrb[61].mxu1 }
 0x260   :  { %v1791_v19 = vadd.f32 %v7036_v5, %v1629_v50  ;;  %v5148_v33 = vpop.f32.mrb[62].mxu1 }
 0x261   :  { %v1794_v17 = vadd.f32 %v5148_v33, %v7036_v5  ;;  %v1632_v12 = vpop.f32.mrb[63].mxu1  ;;  %v1841_v45 = vmax.f32 %v1793_v13, 0.0 }
 0x262   :  { %v1792_v16 = vadd.f32 %v7036_v5, %v1632_v12  ;;  %v1839_v10 = vmax.f32 %v1791_v19, 0.0 }
 0x263   :  { %v1842_v8 = vmax.f32 %v1794_v17, 0.0 }
 0x264   :  { %v1840_v22 = vmax.f32 %v1792_v16, 0.0 }
 0x265   :  { %v7078_v27 = vpack.c.bf16 %v1842_v8, %v1841_v45 }
 0x266   :  { %v7080_v37 = vpack.c.bf16 %v1840_v22, %v1839_v10 }
 0x268   :  { %1912 = vmatpush1.bf16.msra.mxu0 %v7080_v37 }
 0x269   :  { %1913 = vmatprep.subr.bf16.mxu0 %v8140_v25 }
 0x26c   :  { %1914 = vmatpush1.bf16.msra.mxu0 %v7078_v27 }
 0x26d   :  { %1915 = vmatprep.subr.bf16.mxu0 %v8140_v25 }
 0x26e   :  { %v5151_v55 = vpop.f32.mrb[64].mxu1 }
 0x26f   :  { %v1797_v50 = vadd.f32 %v5151_v55, %v7036_v5  ;;  %v1645_v33 = vpop.f32.mrb[65].mxu1 }
 0x270   :  { %v1795_v13 = vadd.f32 %v7036_v5, %v1645_v33  ;;  %v5152_v19 = vpop.f32.mrb[66].mxu1 }
 0x271   :  { %v1798_v17 = vadd.f32 %v5152_v19, %v7036_v5  ;;  %v1648_v12 = vpop.f32.mrb[67].mxu1  ;;  %v1845_v45 = vmax.f32 %v1797_v50, 0.0 }
 0x272   :  { %v1796_v16 = vadd.f32 %v7036_v5, %v1648_v12  ;;  %v1843_v10 = vmax.f32 %v1795_v13, 0.0 }
 0x273   :  { %v1846_v8 = vmax.f32 %v1798_v17, 0.0 }
 0x274   :  { %v1844_v22 = vmax.f32 %v1796_v16, 0.0 }
 0x275   :  { %v7090_v53 = vpack.c.bf16 %v1846_v8, %v1845_v45 }
 0x276   :  { %v7092_v43 = vpack.c.bf16 %v1844_v22, %v1843_v10 }
 0x278   :  { %1916 = vmatpush1.bf16.msra.mxu0 %v7092_v43 }
 0x279   :  { %1917 = vmatprep.subr.bf16.mxu0 %v8140_v25 }
 0x27c   :  { %1918 = vmatpush1.bf16.msra.mxu0 %v7090_v53 }
 0x27d   :  { %1919 = vmatprep.subr.bf16.mxu0 %v8140_v25 }
 0x27e   :  { %v5155_v55 = vpop.f32.mrb[68].mxu1 }
 0x27f   :  { %v1801_v33 = vadd.f32 %v5155_v55, %v7036_v5  ;;  %v1661_v19 = vpop.f32.mrb[69].mxu1 }
 0x280   :  { %v1799_v50 = vadd.f32 %v7036_v5, %v1661_v19  ;;  %v5156_v13 = vpop.f32.mrb[70].mxu1 }
 0x281   :  { %v1802_v17 = vadd.f32 %v5156_v13, %v7036_v5  ;;  %v1664_v12 = vpop.f32.mrb[71].mxu1  ;;  %v1849_v45 = vmax.f32 %v1801_v33, 0.0 }
 0x282   :  { %v1800_v16 = vadd.f32 %v7036_v5, %v1664_v12  ;;  %v1847_v10 = vmax.f32 %v1799_v50, 0.0 }
 0x283   :  { %v1850_v8 = vmax.f32 %v1802_v17, 0.0 }
 0x284   :  { %v1848_v22 = vmax.f32 %v1800_v16, 0.0 }
 0x285   :  { %v7102_v3 = vpack.c.bf16 %v1850_v8, %v1849_v45 }
 0x286   :  { %v7104_v57 = vpack.c.bf16 %v1848_v22, %v1847_v10 }
 0x288   :  { %1920 = vmatpush1.bf16.msra.mxu0 %v7104_v57 }
 0x289   :  { %1921 = vmatprep.subr.bf16.mxu0 %v8140_v25 }
 0x28c   :  { %1922 = vmatpush1.bf16.msra.mxu0 %v7102_v3 }
 0x28d   :  { %1923 = vmatprep.subr.bf16.mxu0 %v8140_v25 }
 0x28e   :  { %v5159_v55 = vpop.f32.mrb[72].mxu1 }
 0x28f   :  { %v1805_v19 = vadd.f32 %v5159_v55, %v7036_v5  ;;  %v1677_v13 = vpop.f32.mrb[73].mxu1 }
 0x290   :  { %v1803_v33 = vadd.f32 %v7036_v5, %v1677_v13  ;;  %v5160_v50 = vpop.f32.mrb[74].mxu1 }
 0x291   :  { %v1806_v17 = vadd.f32 %v5160_v50, %v7036_v5  ;;  %v1680_v12 = vpop.f32.mrb[75].mxu1  ;;  %v1853_v45 = vmax.f32 %v1805_v19, 0.0 }
 0x292   :  { %v1804_v16 = vadd.f32 %v7036_v5, %v1680_v12  ;;  %v1851_v10 = vmax.f32 %v1803_v33, 0.0 }
 0x293   :  { %v1854_v8 = vmax.f32 %v1806_v17, 0.0 }
 0x294   :  { %v1852_v22 = vmax.f32 %v1804_v16, 0.0 }
 0x295   :  { %v7114_v39 = vpack.c.bf16 %v1854_v8, %v1853_v45 }
 0x296   :  { %v7116_v60 = vpack.c.bf16 %v1852_v22, %v1851_v10 }
 0x298   :  { %1924 = vmatpush1.bf16.msra.mxu0 %v7116_v60 }
 0x299   :  { %1925 = vmatprep.subr.bf16.mxu0 %v8140_v25 }
 0x29c   :  { %1926 = vmatpush1.bf16.msra.mxu0 %v7114_v39 }
 0x29d   :  { %1927 = vmatprep.subr.bf16.mxu0 %v8140_v25 }
 0x29e   :  { %v5163_v55 = vpop.f32.mrb[76].mxu1 }
 0x29f   :  { %v1809_v13 = vadd.f32 %v5163_v55, %v7036_v5  ;;  %v1693_v50 = vpop.f32.mrb[77].mxu1 }
 0x2a0   :  { %v1807_v19 = vadd.f32 %v7036_v5, %v1693_v50  ;;  %v5164_v33 = vpop.f32.mrb[78].mxu1 }
 0x2a1   :  { %v1810_v17 = vadd.f32 %v5164_v33, %v7036_v5  ;;  %v1696_v12 = vpop.f32.mrb[79].mxu1  ;;  %v1857_v45 = vmax.f32 %v1809_v13, 0.0 }
 0x2a2   :  { %v1808_v16 = vadd.f32 %v7036_v5, %v1696_v12  ;;  %v1855_v10 = vmax.f32 %v1807_v19, 0.0 }
 0x2a3   :  { %v1858_v8 = vmax.f32 %v1810_v17, 0.0 }
 0x2a4   :  { %v1856_v22 = vmax.f32 %v1808_v16, 0.0 }
 0x2a5   :  { %v7126_v58 = vpack.c.bf16 %v1858_v8, %v1857_v45 }
 0x2a6   :  { %v7128_v24 = vpack.c.bf16 %v1856_v22, %v1855_v10 }
 0x2a8   :  { %1928 = vmatpush1.bf16.msra.mxu0 %v7128_v24 }
 0x2a9   :  { %1929 = vmatprep.subr.bf16.mxu0 %v8140_v25 }
 0x2ac   :  { %1930 = vmatpush1.bf16.msra.mxu0 %v7126_v58 }
 0x2ad   :  { %3126 = vmatprep.subr.bf16.mxu0 %v8140_v25 }
 0x2ae   :  { %v5167_v55 = vpop.f32.mrb[80].mxu1 }
 0x2af   :  { %v1813_v50 = vadd.f32 %v5167_v55, %v7036_v5  ;;  %v1709_v33 = vpop.f32.mrb[81].mxu1  ;;  %1932 = vmatmul.mubr.bf16.vlgmr.msra.gmra.mrb[96].mxu0 %v6374_v20 }
 0x2b0   :  { %v1811_v13 = vadd.f32 %v7036_v5, %v1709_v33  ;;  %v5168_v19 = vpop.f32.mrb[82].mxu1  ;;  %1939 = vmatprep.mubr.bf16.mxu0 %v6378_v23 }
 0x2b1   :  { %v1814_v17 = vadd.f32 %v5168_v19, %v7036_v5  ;;  %v1712_v12 = vpop.f32.mrb[83].mxu1  ;;  %v1861_v45 = vmax.f32 %v1813_v50, 0.0 }
 0x2b2   :  { %v1812_v16 = vadd.f32 %v7036_v5, %v1712_v12  ;;  %v1859_v10 = vmax.f32 %v1811_v13, 0.0 }
 0x2b3   :  { %v1862_v8 = vmax.f32 %v1814_v17, 0.0 }
 0x2b4   :  { %v1860_v22 = vmax.f32 %v1812_v16, 0.0 }
 0x2b5   :  { %v7140_v25 = vpack.c.bf16 %v1862_v8, %v1861_v45 }
 0x2b6   :  { %v7142_v55 = vpack.c.bf16 %v1860_v22, %v1859_v10 }
 0x2b7   :  { %1940 = vmatmul.mubr.bf16.gmra.mrb[100].mxu0 %v6407_v38 }
 0x2b8   :  { %5181 = vmatprep.subr.bf16.mxu1 %v7142_v55  ;;  %1947 = vmatprep.mubr.bf16.mxu0 %v6409_v40 }
 0x2b9   :  { %5182 = vmatpush3.bf16.msra.mxu1 %v7142_v55 }
 0x2ba   :  { %5183 = vmatprep.subr.bf16.mxu1 %v7140_v25 }
 0x2bd   :  { %5184 = vmatpush3.bf16.msra.mxu1 %v7140_v25 }
 0x2be   :  { %v5171_v50 = vpop.f32.mrb[84].mxu1 }
 0x2bf   :  { %v1817_v33 = vadd.f32 %v5171_v50, %v7036_v5  ;;  %v1725_v13 = vpop.f32.mrb[85].mxu1  ;;  %1948 = vmatmul.mubr.bf16.gmra.mrb[104].mxu0 %v6437_v52 }
 0x2c0   :  { %v1815_v19 = vadd.f32 %v7036_v5, %v1725_v13  ;;  %v5172_v17 = vpop.f32.mrb[86].mxu1  ;;  %1955 = vmatprep.mubr.bf16.mxu0 %v6439_v54 }
 0x2c1   :  { %v1818_v12 = vadd.f32 %v5172_v17, %v7036_v5  ;;  %v1728_v16 = vpop.f32.mrb[87].mxu1  ;;  %v1865_v8 = vmax.f32 %v1817_v33, 0.0 }
 0x2c2   :  { %v1816_v45 = vadd.f32 %v7036_v5, %v1728_v16  ;;  %v1863_v22 = vmax.f32 %v1815_v19, 0.0 }
 0x2c3   :  { %v1866_v10 = vmax.f32 %v1818_v12, 0.0 }
 0x2c4   :  { %v1864_v40 = vmax.f32 %v1816_v45, 0.0 }
 0x2c5   :  { %v7156_v38 = vpack.c.bf16 %v1866_v10, %v1865_v8 }
 0x2c6   :  { %v7158_v50 = vpack.c.bf16 %v1864_v40, %v1863_v22 }
 0x2c7   :  { %1956 = vmatmul.mubr.bf16.gmra.mrb[108].mxu0 %v6461_v14 }
 0x2c8   :  { %5185 = vmatprep.subr.bf16.mxu1 %v7158_v50  ;;  %1963 = vmatprep.mubr.bf16.mxu0 %v6466_v28 }
 0x2c9   :  { %5186 = vmatpush3.bf16.msra.mxu1 %v7158_v50 }
 0x2ca   :  { %5187 = vmatprep.subr.bf16.mxu1 %v7156_v38 }
 0x2cd   :  { %5188 = vmatpush3.bf16.msra.mxu1 %v7156_v38 }
 0x2ce   :  { %v5175_v33 = vpop.f32.mrb[88].mxu1 }
 0x2cf   :  { %v1821_v13 = vadd.f32 %v5175_v33, %v7036_v5  ;;  %v1741_v19 = vpop.f32.mrb[89].mxu1  ;;  %1964 = vmatmul.mubr.bf16.gmra.mrb[112].mxu0 %v6491_v46 }
 0x2d0   :  { %v1819_v40 = vadd.f32 %v7036_v5, %v1741_v19  ;;  %v5176_v17 = vpop.f32.mrb[90].mxu1  ;;  %1971 = vmatprep.mubr.bf16.mxu0 %v6496_v49 }
 0x2d1   :  { %v1822_v12 = vadd.f32 %v5176_v17, %v7036_v5  ;;  %v1744_v16 = vpop.f32.mrb[91].mxu1  ;;  %v1869_v8 = vmax.f32 %v1821_v13, 0.0 }
 0x2d2   :  { %v1820_v45 = vadd.f32 %v7036_v5, %v1744_v16  ;;  %v1867_v22 = vmax.f32 %v1819_v40, 0.0 }
 0x2d3   :  { %v1870_v10 = vmax.f32 %v1822_v12, 0.0 }
 0x2d4   :  { %v1868_v28 = vmax.f32 %v1820_v45, 0.0 }
 0x2d5   :  { %v7172_v14 = vpack.c.bf16 %v1870_v10, %v1869_v8 }
 0x2d6   :  { %v7174_v33 = vpack.c.bf16 %v1868_v28, %v1867_v22 }
 0x2d7   :  { %1972 = vmatmul.mubr.bf16.gmra.mrb[116].mxu0 %v6521_v29 }
 0x2d8   :  { %5189 = vmatprep.subr.bf16.mxu1 %v7174_v33  ;;  %1979 = vmatprep.mubr.bf16.mxu0 %v6526_v36 }
 0x2d9   :  { %5190 = vmatpush3.bf16.msra.mxu1 %v7174_v33 }
 0x2da   :  { %5191 = vmatprep.subr.bf16.mxu1 %v7172_v14 }
 0x2dd   :  { %5192 = vmatpush3.bf16.msra.mxu1 %v7172_v14 }
 0x2de   :  { %v5179_v13 = vpop.f32.mrb[92].mxu1 }
 0x2df   :  { %v1825_v19 = vadd.f32 %v5179_v13, %v7036_v5  ;;  %v1757_v40 = vpop.f32.mrb[93].mxu1  ;;  %1980 = vmatmul.mubr.bf16.gmra.mrb[120].mxu0 %v6551_v34 }
 0x2e0   :  { %v1823_v28 = vadd.f32 %v7036_v5, %v1757_v40  ;;  %v5180_v17 = vpop.f32.mrb[94].mxu1  ;;  %1987 = vmatprep.mubr.bf16.mxu0 %v6556_v61  ;;  %v5841_v40 = vld [vmem:[#allocation5 + $0x40] sm:$0xff]  }
 0x2e1   :  { %v1826_v12 = vadd.f32 %v5180_v17, %v7036_v5  ;;  %v1760_v16 = vpop.f32.mrb[95].mxu1  ;;  %v1873_v8 = vmax.f32 %v1825_v19, 0.0  ;;  %v8141_v19 = vld [vmem:[#allocation14_spill] sm:$0xff] }
 0x2e2   :  { %v1824_v45 = vadd.f32 %v7036_v5, %v1760_v16  ;;  %v1871_v22 = vmax.f32 %v1823_v28, 0.0  ;;  %v5842_v5 = vld [vmem:[#allocation5 + $0x48] sm:$0xff]   ;;  %v8143_v28 = vld [vmem:[#allocation15_spill] sm:$0xff]  ;;  %v5843_v17 = vld [vmem:[#allocation5 + $0x50] sm:$0xff]  }
 0x2e3   :  { %v1874_v10 = vmax.f32 %v1826_v12, 0.0  ;;  %v5844_v12 = vld [vmem:[#allocation5 + $0x58] sm:$0xff]  }
 0x2e4   :  { %v1872_v36 = vmax.f32 %v1824_v45, 0.0  ;;  %v8144_v16 = vld [vmem:[#allocation46_spill] sm:$0xff]  ;;  %v8145_v45 = vld [vmem:[#allocation16_spill] sm:$0xff] }
 0x2e5   :  { %v7188_v29 = vpack.c.bf16 %v1874_v10, %v1873_v8  ;;  %v8146_v8 = vld [vmem:[#allocation47_spill] sm:$0xff]  ;;  %v8147_v10 = vld [vmem:[#allocation17_spill] sm:$0xff] }
 0x2e6   :  { %v7190_v13 = vpack.c.bf16 %v1872_v36, %v1871_v22  ;;  %v8142_v36 = vld [vmem:[#allocation44_spill] sm:$0xff] }
 0x2e7   :  { %1988 = vmatmul.mubr.bf16.gmra.mrb[124].mxu0 %v6581_v63  ;;  %v5845_v22 = vld [vmem:[#allocation5 + $0x60] sm:$0xff]  }
 0x2e8   :  { %5193 = vmatprep.subr.bf16.mxu1 %v7190_v13  ;;  %1995 = vmatprep.mubr.bf16.mxu0 %v6586_v47 }
 0x2e9   :  { %5194 = vmatpush3.bf16.msra.mxu1 %v7190_v13 }
 0x2ea   :  { %5195 = vmatprep.subr.bf16.mxu1 %v7188_v29 }
 0x2ed   :  { %5196 = vmatpush3.bf16.msra.mxu1 %v7188_v29 }
 0x2ee   :  { %5245 = vmatprep.subr.bf16.mxu1 %v5841_v40 }
 0x2ef   :  { %1996 = vmatmul.mubr.bf16.gmra.mrb[128].mxu0 %v6605_v62  ;;  %v8149_v62 = vld [vmem:[#allocation18_spill] sm:$0xff] }
 0x2f0   :  { %5198 = vmatmul.mubr.bf16.vlgmr.msra.gmra.mrb[96].mxu1 %v8141_v19  ;;  %2003 = vmatprep.mubr.bf16.mxu0 %v8142_v36  ;;  %v5846_v36 = vld [vmem:[#allocation5 + $0x68] sm:$0xff]  }
 0x2f1   :  { %5201 = vmatprep.mubr.bf16.mxu1 %v8143_v28  ;;  %5246 = vmatpush3.bf16.msra.mxu1 %v5841_v40  ;;  %v8148_v40 = vld [vmem:[#allocation48_spill] sm:$0xff]  ;;  %v8151_v28 = vld [vmem:[#allocation19_spill] sm:$0xff] }
 0x2f2   :  { %5247 = vmatprep.subr.bf16.mxu1 %v5842_v5 }
 0x2f5   :  { %5248 = vmatpush3.bf16.msra.mxu1 %v5842_v5  ;;  %v8150_v5 = vld [vmem:[#allocation49_spill] sm:$0xff] }
 0x2f6   :  { %5249 = vmatprep.subr.bf16.mxu1 %v5843_v17 }
 0x2f7   :  { %2004 = vmatmul.mubr.bf16.gmra.mrb[132].mxu0 %v8144_v16  ;;  %v5847_v16 = vld [vmem:[#allocation5 + $0x70] sm:$0xff]  }
 0x2f8   :  { %5202 = vmatmul.mubr.bf16.gmra.mrb[100].mxu1 %v8145_v45  ;;  %2011 = vmatprep.mubr.bf16.mxu0 %v8146_v8  ;;  %v5848_v8 = vld [vmem:[#allocation5 + $0x78] sm:$0xff]   ;;  %v8155_v45 = vld [vmem:[#allocation21_spill] sm:$0xff] }
 0x2f9   :  { %5205 = vmatprep.mubr.bf16.mxu1 %v8147_v10  ;;  %5250 = vmatpush3.bf16.msra.mxu1 %v5843_v17  ;;  %v8152_v17 = vld [vmem:[#allocation50_spill] sm:$0xff]  ;;  %v8153_v10 = vld [vmem:[#allocation20_spill] sm:$0xff] }
 0x2fa   :  { %5251 = vmatprep.subr.bf16.mxu1 %v5844_v12 }
 0x2fd   :  { %5252 = vmatpush3.bf16.msra.mxu1 %v5844_v12  ;;  %v8154_v12 = vld [vmem:[#allocation51_spill] sm:$0xff] }
 0x2fe   :  { %5253 = vmatprep.subr.bf16.mxu1 %v5845_v22 }
 0x2ff   :  { %2012 = vmatmul.mubr.bf16.gmra.mrb[136].mxu0 %v8148_v40  ;;  %v8157_v40 = vld [vmem:[#allocation24_spill] sm:$0xff] }
 0x300   :  { %5206 = vmatmul.mubr.bf16.gmra.mrb[104].mxu1 %v8149_v62  ;;  %2019 = vmatprep.mubr.bf16.mxu0 %v8150_v5  ;;  %v8156_v5 = vld [vmem:[#allocation52_spill] sm:$0xff]  ;;  %v8182_v62 = vld [vmem:[#allocation65_spill] sm:$0xff] }
 0x301   :  { %5209 = vmatprep.mubr.bf16.mxu1 %v8151_v28  ;;  %5254 = vmatpush3.bf16.msra.mxu1 %v5845_v22  ;;  %v8158_v22 = vld [vmem:[#allocation53_spill] sm:$0xff]  ;;  %v8160_v28 = vld [vmem:[#allocation54_spill] sm:$0xff] }
 0x302   :  { %5255 = vmatprep.subr.bf16.mxu1 %v5846_v36 }
 0x305   :  { %5256 = vmatpush3.bf16.msra.mxu1 %v5846_v36  ;;  %v8159_v36 = vld [vmem:[#allocation25_spill] sm:$0xff] }
 0x306   :  { %5257 = vmatprep.subr.bf16.mxu1 %v5847_v16 }
 0x307   :  { %2020 = vmatmul.mubr.bf16.gmra.mrb[140].mxu0 %v8152_v17  ;;  %v8161_v17 = vld [vmem:[#allocation26_spill] sm:$0xff] }
 0x308   :  { %5210 = vmatmul.mubr.bf16.gmra.mrb[108].mxu1 %v8153_v10  ;;  %2027 = vmatprep.mubr.bf16.mxu0 %v8154_v12  ;;  %v8162_v10 = vld [vmem:[#allocation55_spill] sm:$0xff] }
 0x309   :  { %5213 = vmatprep.mubr.bf16.mxu1 %v8155_v45  ;;  %5258 = vmatpush3.bf16.msra.mxu1 %v5847_v16  ;;  %v8163_v12 = vld [vmem:[#allocation27_spill] sm:$0xff]  ;;  %v8164_v45 = vld [vmem:[#allocation56_spill] sm:$0xff]  ;;  %v8165_v16 = vld [vmem:[#allocation30_spill] sm:$0xff] }
 0x30a   :  { %5259 = vmatprep.subr.bf16.mxu1 %v5848_v8 }
 0x30d   :  { %5260 = vmatpush3.bf16.msra.mxu1 %v5848_v8  ;;  %v8166_v8 = vld [vmem:[#allocation57_spill] sm:$0xff] }
 0x30f   :  { %2028 = vmatmul.mubr.bf16.gmra.mrb[144].mxu0 %v8156_v5  ;;  %v8167_v5 = vld [vmem:[#allocation31_spill] sm:$0xff] }
 0x310   :  { %5214 = vmatmul.mubr.bf16.gmra.mrb[112].mxu1 %v8157_v40  ;;  %2035 = vmatprep.mubr.bf16.mxu0 %v8158_v22  ;;  %v8168_v40 = vld [vmem:[#allocation58_spill] sm:$0xff]  ;;  %v8169_v22 = vld [vmem:[#allocation32_spill] sm:$0xff] }
 0x311   :  { %5217 = vmatprep.mubr.bf16.mxu1 %v8159_v36  ;;  %v8170_v36 = vld [vmem:[#allocation59_spill] sm:$0xff] }
 0x317   :  { %2036 = vmatmul.mubr.bf16.gmra.mrb[148].mxu0 %v8160_v28  ;;  %v5849_v28 = vld [vmem:[#allocation5] sm:$0xff]  }
 0x318   :  { %5218 = vmatmul.mubr.bf16.gmra.mrb[116].mxu1 %v8161_v17  ;;  %2043 = vmatprep.mubr.bf16.mxu0 %v8162_v10  ;;  %v8171_v17 = vld [vmem:[#allocation33_spill] sm:$0xff]  ;;  %v8172_v10 = vld [vmem:[#allocation60_spill] sm:$0xff] }
 0x319   :  { %5221 = vmatprep.mubr.bf16.mxu1 %v8163_v12  ;;  %5309 = vmatprep.subr.bf16.mxu1 %v5849_v28  ;;  %v8173_v12 = vld [vmem:[#allocation36_spill] sm:$0xff] }
 0x31f   :  { %2044 = vmatmul.mubr.bf16.gmra.mrb[152].mxu0 %v8164_v45  ;;  %v8174_v45 = vld [vmem:[#allocation61_spill] sm:$0xff] }
 0x320   :  { %5222 = vmatmul.mubr.bf16.gmra.mrb[120].mxu1 %v8165_v16  ;;  %2051 = vmatprep.mubr.bf16.mxu0 %v8166_v8  ;;  %v8175_v16 = vld [vmem:[#allocation37_spill] sm:$0xff]  ;;  %v8176_v8 = vld [vmem:[#allocation62_spill] sm:$0xff] }
 0x321   :  { %5225 = vmatprep.mubr.bf16.mxu1 %v8167_v5  ;;  %v8177_v5 = vld [vmem:[#allocation38_spill] sm:$0xff] }
 0x327   :  { %2052 = vmatmul.mubr.bf16.gmra.mrb[156].mxu0 %v8168_v40  ;;  %v8178_v40 = vld [vmem:[#allocation63_spill] sm:$0xff] }
 0x328   :  { %5226 = vmatmul.mubr.bf16.gmra.mrb[124].mxu1 %v8169_v22  ;;  %2059 = vmatprep.mubr.bf16.mxu0 %v8170_v36  ;;  %v8179_v22 = vld [vmem:[#allocation39_spill] sm:$0xff]  ;;  %v8180_v36 = vld [vmem:[#allocation64_spill] sm:$0xff] }
 0x329   :  { %5229 = vmatprep.mubr.bf16.mxu1 %v8171_v17  ;;  %v8181_v17 = vld [vmem:[#allocation41_spill] sm:$0xff] }
 0x32f   :  { %2060 = vmatmul.mubr.bf16.gmra.mrb[160].mxu0 %v8172_v10  ;;  %v8183_v10 = vld [vmem:[#allocation42_spill] sm:$0xff] }
 0x330   :  { %5230 = vmatmul.mubr.bf16.gmra.mrb[128].mxu1 %v8173_v12  ;;  %2067 = vmatprep.mubr.bf16.mxu0 %v8174_v45  ;;  %v8184_v12 = vld [vmem:[#allocation66_spill] sm:$0xff]  ;;  %v8185_v45 = vld [vmem:[#allocation45_spill] sm:$0xff] }
 0x331   :  { %5233 = vmatprep.mubr.bf16.mxu1 %v8175_v16  ;;  %v8186_v16 = vld [vmem:[#allocation67_spill] sm:$0xff] }
 0x337   :  { %2068 = vmatmul.mubr.bf16.gmra.mrb[164].mxu0 %v8176_v8  ;;  %v5850_v8 = vld [vmem:[#allocation5 + $0x8] sm:$0xff]  }
 0x338   :  { %5234 = vmatmul.mubr.bf16.gmra.mrb[132].mxu1 %v8177_v5  ;;  %2075 = vmatprep.mubr.bf16.mxu0 %v8178_v40  ;;  %v8187_v40 = vld [vmem:[#allocation68_spill] sm:$0xff] }
 0x339   :  { %5237 = vmatprep.mubr.bf16.mxu1 %v8179_v22  ;;  %v8198_v22 = vld [vmem:[#allocation76_spill] sm:$0xff] }
 0x33f   :  { %2076 = vmatmul.mubr.bf16.gmra.mrb[168].mxu0 %v8180_v36  ;;  %v8188_v36 = vld [vmem:[#allocation69_spill] sm:$0xff] }
 0x340   :  { %5238 = vmatmul.mubr.bf16.gmra.mrb[136].mxu1 %v8181_v17  ;;  %2083 = vmatprep.mubr.bf16.mxu0 %v8182_v62  ;;  %v5851_v62 = vld [vmem:[#allocation5 + $0x10] sm:$0xff]   ;;  %v8197_v17 = vld [vmem:[#allocation75_spill] sm:$0xff] }
 0x341   :  { %5241 = vmatprep.mubr.bf16.mxu1 %v8183_v10 }
 0x347   :  { %2084 = vmatmul.mubr.bf16.gmra.mrb[172].mxu0 %v8184_v12  ;;  %v5852_v12 = vld [vmem:[#allocation5 + $0x18] sm:$0xff]  }
 0x348   :  { %5242 = vmatmul.mubr.bf16.gmra.mrb[140].mxu1 %v8185_v45  ;;  %2091 = vmatprep.mubr.bf16.mxu0 %v8186_v16  ;;  %v8189_v45 = vld [vmem:[#allocation70_spill] sm:$0xff] }
 0x349   :  { %5261 = vmatprep.mubr.bf16.mxu1 %v7044_v48  ;;  %v8190_v48 = vld [vmem:[#allocation71_spill] sm:$0xff] }
 0x34f   :  { %2092 = vmatmul.mubr.bf16.gmra.mrb[176].mxu0 %v8187_v40  ;;  %v8195_v40 = vld [vmem:[#allocation77_spill] sm:$0xff] }
 0x350   :  { %5262 = vmatmul.mubr.bf16.vlgmr.msra.gmra.mrb[144].mxu1 %v7042_v42  ;;  %2099 = vmatprep.mubr.bf16.mxu0 %v8188_v36  ;;  %v5853_v42 = vld [vmem:[#allocation5 + $0x20] sm:$0xff]  }
 0x351   :  { %5265 = vmatprep.mubr.bf16.mxu1 %v7056_v21  ;;  %5310 = vmatpush3.bf16.msra.mxu1 %v5849_v28  ;;  %v5854_v21 = vld [vmem:[#allocation5 + $0x28] sm:$0xff]  }
 0x352   :  { %5311 = vmatprep.subr.bf16.mxu1 %v5850_v8  ;;  %v8191_v28 = vld [vmem:[#allocation72_spill] sm:$0xff] }
 0x355   :  { %5312 = vmatpush3.bf16.msra.mxu1 %v5850_v8  ;;  %v8192_v8 = vld [vmem:[#allocation73_spill] sm:$0xff] }
 0x356   :  { %5313 = vmatprep.subr.bf16.mxu1 %v5851_v62 }
 0x357   :  { %2100 = vmatmul.mubr.bf16.gmra.mrb[180].mxu0 %v8189_v45 }
 0x358   :  { %5266 = vmatmul.mubr.bf16.gmra.mrb[148].mxu1 %v7054_v6  ;;  %2107 = vmatprep.mubr.bf16.mxu0 %v8190_v48  ;;  %v5855_v6 = vld [vmem:[#allocation5 + $0x30] sm:$0xff]  }
 0x359   :  { %5269 = vmatprep.mubr.bf16.mxu1 %v7068_v15  ;;  %5314 = vmatpush3.bf16.msra.mxu1 %v5851_v62  ;;  %v5856_v15 = vld [vmem:[#allocation5 + $0x38] sm:$0xff]  }
 0x35a   :  { %5315 = vmatprep.subr.bf16.mxu1 %v5852_v12  ;;  %v8193_v62 = vld [vmem:[#allocation74_spill] sm:$0xff] }
 0x35d   :  { %5316 = vmatpush3.bf16.msra.mxu1 %v5852_v12  ;;  %v8194_v12 = vld [vmem:[#allocation13_spill] sm:$0xff] }
 0x35e   :  { %5317 = vmatprep.subr.bf16.mxu1 %v5853_v42 }
 0x35f   :  { %2108 = vmatmul.mubr.bf16.gmra.mrb[184].mxu0 %v8191_v28 }
 0x360   :  { %5270 = vmatmul.mubr.bf16.gmra.mrb[152].mxu1 %v7066_v18  ;;  %2115 = vmatprep.mubr.bf16.mxu0 %v8192_v8 }
 0x361   :  { %5273 = vmatprep.mubr.bf16.mxu1 %v7080_v37  ;;  %5318 = vmatpush3.bf16.msra.mxu1 %v5853_v42 }
 0x362   :  { %5319 = vmatprep.subr.bf16.mxu1 %v5854_v21 }
 0x365   :  { %5320 = vmatpush3.bf16.msra.mxu1 %v5854_v21 }
 0x366   :  { %5321 = vmatprep.subr.bf16.mxu1 %v5855_v6 }
 0x367   :  { %2116 = vmatmul.mubr.bf16.gmra.mrb[188].mxu0 %v8193_v62 }
 0x368   :  { %5274 = vmatmul.mubr.bf16.gmra.mrb[156].mxu1 %v7078_v27  ;;  %3158 = vmatprep.mubr.bf16.mxu0 %v8194_v12 }
 0x369   :  { %5277 = vmatprep.mubr.bf16.mxu1 %v7092_v43  ;;  %5322 = vmatpush3.bf16.msra.mxu1 %v5855_v6 }
 0x36a   :  { %5323 = vmatprep.subr.bf16.mxu1 %v5856_v15 }
 0x36d   :  { %5324 = vmatpush3.bf16.msra.mxu1 %v5856_v15 }
 0x370   :  { %5278 = vmatmul.mubr.bf16.gmra.mrb[160].mxu1 %v7090_v53 }
 0x371   :  { %5281 = vmatprep.mubr.bf16.mxu1 %v7104_v57 }
 0x378   :  { %5282 = vmatmul.mubr.bf16.gmra.mrb[164].mxu1 %v7102_v3 }
 0x379   :  { %5285 = vmatprep.mubr.bf16.mxu1 %v7116_v60 }
 0x380   :  { %5286 = vmatmul.mubr.bf16.gmra.mrb[168].mxu1 %v7114_v39 }
 0x381   :  { %5289 = vmatprep.mubr.bf16.mxu1 %v7128_v24 }
 0x382   :  { %v1933_v37 = vpop.f32.mrb[96].mxu0 }
 0x383   :  { %v1935_v27 = vpop.f32.mrb[97].mxu0 }
 0x384   :  { %v1936_v18 = vpop.f32.mrb[98].mxu0 }
 0x385   :  { %v1938_v42 = vpop.f32.mrb[99].mxu0 }
 0x388   :  { %5290 = vmatmul.mubr.bf16.gmra.mrb[172].mxu1 %v7126_v58 }
 0x389   :  { %5293 = vmatprep.mubr.bf16.mxu1 %v7142_v55 }
 0x38a   :  { %v1941_v43 = vpop.f32.mrb[100].mxu0 }
 0x38b   :  { %v1943_v53 = vpop.f32.mrb[101].mxu0 }
 0x38c   :  { %v1944_v21 = vpop.f32.mrb[102].mxu0 }
 0x38d   :  { %v1946_v57 = vpop.f32.mrb[103].mxu0 }
 0x390   :  { %5294 = vmatmul.mubr.bf16.gmra.mrb[176].mxu1 %v7140_v25 }
 0x391   :  { %5297 = vmatprep.mubr.bf16.mxu1 %v7158_v50 }
 0x392   :  { %v1949_v60 = vpop.f32.mrb[104].mxu0 }
 0x393   :  { %v1951_v39 = vpop.f32.mrb[105].mxu0 }
 0x394   :  { %v1952_v3 = vpop.f32.mrb[106].mxu0 }
 0x395   :  { %v1954_v24 = vpop.f32.mrb[107].mxu0 }
 0x398   :  { %5298 = vmatmul.mubr.bf16.gmra.mrb[180].mxu1 %v7156_v38 }
 0x399   :  { %5301 = vmatprep.mubr.bf16.mxu1 %v7174_v33 }
 0x39a   :  { %v1957_v6 = vpop.f32.mrb[108].mxu0 }
 0x39b   :  { %v1959_v58 = vpop.f32.mrb[109].mxu0 }
 0x39c   :  { %v1960_v15 = vpop.f32.mrb[110].mxu0 }
 0x39d   :  { %v1962_v55 = vpop.f32.mrb[111].mxu0 }
 0x3a0   :  { %5302 = vmatmul.mubr.bf16.gmra.mrb[184].mxu1 %v7172_v14 }
 0x3a1   :  { %5305 = vmatprep.mubr.bf16.mxu1 %v7190_v13 }
 0x3a2   :  { %v1965_v12 = vpop.f32.mrb[112].mxu0 }
 0x3a3   :  { %v1967_v25 = vpop.f32.mrb[113].mxu0 }
 0x3a4   :  { %v7276_v27 = vpop.f32.mrb[114].mxu0 }
 0x3a5   :  { %v1970_v50 = vpop.f32.mrb[115].mxu0 }
 0x3a8   :  { %5306 = vmatmul.mubr.bf16.gmra.mrb[188].mxu1 %v7188_v29 }
 0x3aa   :  { %v1973_v42 = vpop.f32.mrb[116].mxu0 }
 0x3ab   :  { %v1975_v53 = vpop.f32.mrb[117].mxu0 }
 0x3ac   :  { %v1976_v38 = vpop.f32.mrb[118].mxu0 }
 0x3ad   :  { %v1978_v57 = vpop.f32.mrb[119].mxu0 }
 0x3b2   :  { %v7279_v33 = vpop.f32.mrb[120].mxu0 }
 0x3b3   :  { %v1983_v39 = vpop.f32.mrb[121].mxu0 }
 0x3b4   :  { %v7281_v24 = vpop.f32.mrb[122].mxu0 }
 0x3b5   :  { %v1986_v58 = vpop.f32.mrb[123].mxu0 }
 0x3ba   :  { %v7283_v14 = vpop.f32.mrb[124].mxu0 }
 0x3bb   :  { %v1991_v13 = vpop.f32.mrb[125].mxu0 }
 0x3bc   :  { %v7285_v55 = vpop.f32.mrb[126].mxu0  ;;  %v8196_v13 = vld [vmem:[#allocation78_spill] sm:$0xff] }
 0x3bd   :  { %v1994_v25 = vpop.f32.mrb[127].mxu0 }
 0x3c2   :  { %v7287_v62 = vpop.f32.mrb[128].mxu0 }
 0x3c3   :  { %v5199_v50 = vpop.f32.mrb[96].mxu1  ;;  %v1999_v29 = vpop.f32.mrb[129].mxu0 }
 0x3c4   :  { %v2167_v8 = vadd.f32 %v5199_v50, %v1941_v43  ;;  %v2158_v53 = vpop.f32.mrb[97].mxu1  ;;  %v7289_v28 = vpop.f32.mrb[130].mxu0 }
 0x3c5   :  { %v2159_v57 = vadd.f32 %v2158_v53, %v1933_v37  ;;  %v5200_v48 = vpop.f32.mrb[98].mxu1  ;;  %v2002_v39 = vpop.f32.mrb[131].mxu0 }
 0x3c6   :  { %v2170_v45 = vadd.f32 %v5200_v48, %v1944_v21  ;;  %v2161_v36 = vpop.f32.mrb[99].mxu1  ;;  %v2351_v16 = vmul.f32 %v2167_v8, %v8195_v40 }
 0x3c7   :  { %v2162_v58 = vadd.f32 %v2161_v36, %v1936_v18  ;;  %v2349_v25 = vmul.f32 %v2159_v57, %v8197_v17  ;;  %v8199_v57 = vld [vmem:[#allocation81_spill] sm:$0xff] }
 0x3c8   :  { %v2352_v10 = vmul.f32 %v2170_v45, %v8196_v13 }
 0x3c9   :  { %v2350_v5 = vmul.f32 %v2162_v58, %v8198_v22  ;;  %v8201_v22 = vld [vmem:[#allocation79_spill] sm:$0xff] }
 0x3ca   :  { %v2398_v19 = vpack.c.bf16 %v2352_v10, %v2351_v16  ;;  %v7295_v29 = vpop.f32.mrb[132].mxu0  ;;  %v8200_v10 = vld [vmem:[#allocation82_spill] sm:$0xff] }
 0x3cb   :  { %v5203_v43 = vpop.f32.mrb[100].mxu1  ;;  %v2397_v50 = vpack.c.bf16 %v2350_v5, %v2349_v25  ;;  %v2007_v47 = vpop.f32.mrb[133].mxu0  ;;  %v8202_v5 = vld [vmem:[#allocation80_spill] sm:$0xff] }
 0x3cc   :  { %v2183_v37 = vadd.f32 %v5203_v43, %v1957_v6  ;;  %v2174_v53 = vpop.f32.mrb[101].mxu1  ;;  %v7297_v39 = vpop.f32.mrb[134].mxu0 }
 0x3cd   :  { %v2175_v48 = vadd.f32 %v2174_v53, %v1949_v60  ;;  %v5204_v36 = vpop.f32.mrb[102].mxu1  ;;  %5325 = vmatprep.mubr.bf16.mxu1 %v2397_v50  ;;  %v2010_v8 = vpop.f32.mrb[135].mxu0 }
 0x3ce   :  { %v2186_v18 = vadd.f32 %v5204_v36, %v1960_v15  ;;  %v2177_v45 = vpop.f32.mrb[103].mxu1  ;;  %5326 = vmatmul.mubr.bf16.vlgmr.msra.gmra.mrb[144].mxu1 %v2398_v19  ;;  %v2355_v58 = vmul.f32 %v2183_v37, %v8199_v57 }
 0x3cf   :  { %v2178_v21 = vadd.f32 %v2177_v45, %v1952_v3  ;;  %v2353_v17 = vmul.f32 %v2175_v48, %v8201_v22  ;;  %v8203_v45 = vld [vmem:[#allocation85_spill] sm:$0xff] }
 0x3d0   :  { %v2356_v16 = vmul.f32 %v2186_v18, %v8200_v10 }
 0x3d1   :  { %v2354_v47 = vmul.f32 %v2178_v21, %v8202_v5  ;;  %v8205_v5 = vld [vmem:[#allocation83_spill] sm:$0xff] }
 0x3d2   :  { %v2400_v6 = vpack.c.bf16 %v2356_v16, %v2355_v58  ;;  %v7303_v25 = vpop.f32.mrb[136].mxu0  ;;  %v8204_v58 = vld [vmem:[#allocation86_spill] sm:$0xff] }
 0x3d3   :  { %v5207_v43 = vpop.f32.mrb[104].mxu1  ;;  %v2399_v60 = vpack.c.bf16 %v2354_v47, %v2353_v17  ;;  %v2015_v53 = vpop.f32.mrb[137].mxu0  ;;  %v8206_v47 = vld [vmem:[#allocation84_spill] sm:$0xff] }
 0x3d4   :  { %v2199_v50 = vadd.f32 %v5207_v43, %v1973_v42  ;;  %v2190_v8 = vpop.f32.mrb[105].mxu1  ;;  %v7305_v15 = vpop.f32.mrb[138].mxu0 }
 0x3d5   :  { %v2191_v19 = vadd.f32 %v2190_v8, %v1965_v12  ;;  %v5208_v3 = vpop.f32.mrb[106].mxu1  ;;  %5329 = vmatprep.mubr.bf16.mxu1 %v2399_v60  ;;  %v2018_v37 = vpop.f32.mrb[139].mxu0 }
 0x3d6   :  { %v2202_v36 = vadd.f32 %v5208_v3, %v1976_v38  ;;  %v2193_v18 = vpop.f32.mrb[107].mxu1  ;;  %5330 = vmatmul.mubr.bf16.gmra.mrb[148].mxu1 %v2400_v6  ;;  %v2359_v21 = vmul.f32 %v2199_v50, %v8203_v45 }
 0x3d7   :  { %v2194_v48 = vadd.f32 %v2193_v18, %v7276_v27  ;;  %v2357_v17 = vmul.f32 %v2191_v19, %v8205_v5  ;;  %v8207_v18 = vld [vmem:[#allocation89_spill] sm:$0xff] }
 0x3d8   :  { %v2360_v16 = vmul.f32 %v2202_v36, %v8204_v58 }
 0x3d9   :  { %v2358_v42 = vmul.f32 %v2194_v48, %v8206_v47 }
 0x3da   :  { %v2402_v43 = vpack.c.bf16 %v2360_v16, %v2359_v21  ;;  %v2021_v53 = vpop.f32.mrb[140].mxu0  ;;  %v8208_v21 = vld [vmem:[#allocation90_spill] sm:$0xff] }
 0x3db   :  { %v5211_v22 = vpop.f32.mrb[108].mxu1  ;;  %v2401_v12 = vpack.c.bf16 %v2358_v42, %v2357_v17  ;;  %v2023_v8 = vpop.f32.mrb[141].mxu0  ;;  %v8209_v17 = vld [vmem:[#allocation87_spill] sm:$0xff] }
 0x3dc   :  { %v2215_v60 = vadd.f32 %v5211_v22, %v7283_v14  ;;  %v2206_v38 = vpop.f32.mrb[109].mxu1  ;;  %v2024_v3 = vpop.f32.mrb[142].mxu0  ;;  %v8210_v22 = vld [vmem:[#allocation88_spill] sm:$0xff] }
 0x3dd   :  { %v2207_v6 = vadd.f32 %v2206_v38, %v7279_v33  ;;  %v5212_v27 = vpop.f32.mrb[110].mxu1  ;;  %5333 = vmatprep.mubr.bf16.mxu1 %v2401_v12  ;;  %v2026_v50 = vpop.f32.mrb[143].mxu0 }
 0x3de   :  { %v2218_v37 = vadd.f32 %v5212_v27, %v7285_v55  ;;  %v2209_v36 = vpop.f32.mrb[111].mxu1  ;;  %5334 = vmatmul.mubr.bf16.gmra.mrb[152].mxu1 %v2402_v43  ;;  %v2363_v48 = vmul.f32 %v2215_v60, %v8207_v18 }
 0x3df   :  { %v2210_v19 = vadd.f32 %v2209_v36, %v7281_v24  ;;  %v2361_v42 = vmul.f32 %v2207_v6, %v8209_v17 }
 0x3e0   :  { %v2364_v16 = vmul.f32 %v2218_v37, %v8208_v21 }
 0x3e1   :  { %v2362_v14 = vmul.f32 %v2210_v19, %v8210_v22 }
 0x3e2   :  { %v2404_v8 = vpack.c.bf16 %v2364_v16, %v2363_v48  ;;  %v2029_v47 = vpop.f32.mrb[144].mxu0  ;;  %v8211_v16 = vld [vmem:[#allocation91_spill] sm:$0xff] }
 0x3e3   :  { %v5215_v33 = vpop.f32.mrb[112].mxu1  ;;  %v2403_v38 = vpack.c.bf16 %v2362_v14, %v2361_v42  ;;  %v2031_v12 = vpop.f32.mrb[145].mxu0 }
 0x3e4   :  { %v2231_v50 = vadd.f32 %v5215_v33, %v7295_v29  ;;  %v2222_v55 = vpop.f32.mrb[113].mxu1  ;;  %v2032_v27 = vpop.f32.mrb[146].mxu0 }
 0x3e5   :  { %v2223_v43 = vadd.f32 %v2222_v55, %v7287_v62  ;;  %v5216_v24 = vpop.f32.mrb[114].mxu1  ;;  %5337 = vmatprep.mubr.bf16.mxu1 %v2403_v38  ;;  %v2034_v60 = vpop.f32.mrb[147].mxu0 }
 0x3e6   :  { %v2234_v37 = vadd.f32 %v5216_v24, %v7297_v39  ;;  %v2225_v36 = vpop.f32.mrb[115].mxu1  ;;  %5338 = vmatmul.mubr.bf16.gmra.mrb[156].mxu1 %v2404_v8  ;;  %v2367_v19 = vmul.f32 %v2231_v50, %v6914_v44 }
 0x3e7   :  { %v2226_v6 = vadd.f32 %v2225_v36, %v7289_v28  ;;  %v2365_v42 = vmul.f32 %v2223_v43, %v8211_v16 }
 0x3e8   :  { %v2368_v48 = vmul.f32 %v2234_v37, %v6916_v11 }
 0x3e9   :  { %v2366_v29 = vmul.f32 %v2226_v6, %v6906_v30 }
 0x3ea   :  { %v2406_v14 = vpack.c.bf16 %v2368_v48, %v2367_v19  ;;  %v2037_v33 = vpop.f32.mrb[148].mxu0 }
 0x3eb   :  { %v5219_v62 = vpop.f32.mrb[116].mxu1  ;;  %v2405_v12 = vpack.c.bf16 %v2366_v29, %v2365_v42  ;;  %v2039_v38 = vpop.f32.mrb[149].mxu0 }
 0x3ec   :  { %v2247_v55 = vadd.f32 %v5219_v62, %v2021_v53  ;;  %v2238_v60 = vpop.f32.mrb[117].mxu1  ;;  %v2040_v39 = vpop.f32.mrb[150].mxu0 }
 0x3ed   :  { %v2239_v8 = vadd.f32 %v2238_v60, %v7303_v25  ;;  %v5220_v24 = vpop.f32.mrb[118].mxu1  ;;  %5341 = vmatprep.mubr.bf16.mxu1 %v2405_v12  ;;  %v2042_v28 = vpop.f32.mrb[151].mxu0 }
 0x3ee   :  { %v2250_v50 = vadd.f32 %v5220_v24, %v2024_v3  ;;  %v2241_v36 = vpop.f32.mrb[119].mxu1  ;;  %5342 = vmatmul.mubr.bf16.gmra.mrb[160].mxu1 %v2406_v14  ;;  %v2371_v37 = vmul.f32 %v2247_v55, %v6930_v7 }
 0x3ef   :  { %v2242_v43 = vadd.f32 %v2241_v36, %v7305_v15  ;;  %v2369_v19 = vmul.f32 %v2239_v8, %v6922_v0 }
 0x3f0   :  { %v2372_v6 = vmul.f32 %v2250_v50, %v6932_v1 }
 0x3f1   :  { %v2370_v53 = vmul.f32 %v2242_v43, %v6924_v9 }
 0x3f2   :  { %v2408_v48 = vpack.c.bf16 %v2372_v6, %v2371_v37  ;;  %v2045_v42 = vpop.f32.mrb[152].mxu0 }
 0x3f3   :  { %v5223_v29 = vpop.f32.mrb[120].mxu1  ;;  %v2407_v25 = vpack.c.bf16 %v2370_v53, %v2369_v19  ;;  %v2047_v62 = vpop.f32.mrb[153].mxu0 }
 0x3f4   :  { %v2263_v12 = vadd.f32 %v5223_v29, %v2037_v33  ;;  %v2254_v38 = vpop.f32.mrb[121].mxu1  ;;  %v2048_v3 = vpop.f32.mrb[154].mxu0 }
 0x3f5   :  { %v2255_v60 = vadd.f32 %v2254_v38, %v2029_v47  ;;  %v5224_v14 = vpop.f32.mrb[122].mxu1  ;;  %5345 = vmatprep.mubr.bf16.mxu1 %v2407_v25  ;;  %v2050_v15 = vpop.f32.mrb[155].mxu0 }
 0x3f6   :  { %v2266_v24 = vadd.f32 %v5224_v14, %v2040_v39  ;;  %v2257_v55 = vpop.f32.mrb[123].mxu1  ;;  %5346 = vmatmul.mubr.bf16.gmra.mrb[164].mxu1 %v2408_v48  ;;  %v2375_v8 = vmul.f32 %v2263_v12, %v6946_v59 }
 0x3f7   :  { %v2258_v28 = vadd.f32 %v2257_v55, %v2032_v27  ;;  %v2373_v36 = vmul.f32 %v2255_v60, %v6938_v35 }
 0x3f8   :  { %v2376_v50 = vmul.f32 %v2266_v24, %v6948_v2 }
 0x3f9   :  { %v2374_v43 = vmul.f32 %v2258_v28, %v6940_v56 }
 0x3fa   :  { %v2053_v37 = vpop.f32.mrb[156].mxu0  ;;  %v2410_v33 = vpack.c.bf16 %v2376_v50, %v2375_v8 }
 0x3fb   :  { %v5227_v6 = vpop.f32.mrb[124].mxu1  ;;  %v2055_v19 = vpop.f32.mrb[157].mxu0  ;;  %v2409_v47 = vpack.c.bf16 %v2374_v43, %v2373_v36 }
 0x3fc   :  { %v2279_v53 = vadd.f32 %v5227_v6, %v2053_v37  ;;  %v2270_v29 = vpop.f32.mrb[125].mxu1  ;;  %v2056_v25 = vpop.f32.mrb[158].mxu0 }
 0x3fd   :  { %v2271_v39 = vadd.f32 %v2270_v29, %v2045_v42  ;;  %v5228_v62 = vpop.f32.mrb[126].mxu1  ;;  %5349 = vmatprep.mubr.bf16.mxu1 %v2409_v47  ;;  %v2058_v27 = vpop.f32.mrb[159].mxu0 }
 0x3fe   :  { %v2282_v48 = vadd.f32 %v5228_v62, %v2056_v25  ;;  %v2273_v12 = vpop.f32.mrb[127].mxu1  ;;  %5350 = vmatmul.mubr.bf16.gmra.mrb[168].mxu1 %v2410_v33  ;;  %v2379_v60 = vmul.f32 %v2279_v53, %v6962_v41 }
 0x3ff   :  { %v2274_v38 = vadd.f32 %v2273_v12, %v2048_v3  ;;  %v2377_v15 = vmul.f32 %v2271_v39, %v6954_v32 }
 0x400   :  { %v2380_v14 = vmul.f32 %v2282_v48, %v6964_v31 }
 0x401   :  { %v2378_v24 = vmul.f32 %v2274_v38, %v6956_v26 }
 0x402   :  { %v2061_v55 = vpop.f32.mrb[160].mxu0  ;;  %v2412_v28 = vpack.c.bf16 %v2380_v14, %v2379_v60 }
 0x403   :  { %v5231_v8 = vpop.f32.mrb[128].mxu1  ;;  %v2063_v50 = vpop.f32.mrb[161].mxu0  ;;  %v2411_v42 = vpack.c.bf16 %v2378_v24, %v2377_v15  ;;  %v8212_v24 = vld [vmem:[#allocation97_spill] sm:$0xff] }
 0x404   :  { %v2286_v36 = vpop.f32.mrb[129].mxu1  ;;  %v2064_v43 = vpop.f32.mrb[162].mxu0 }
 0x405   :  { %v2287_v37 = vadd.f32 %v2286_v36, %v2061_v55  ;;  %v5232_v6 = vpop.f32.mrb[130].mxu1  ;;  %5353 = vmatprep.mubr.bf16.mxu1 %v2411_v42  ;;  %v2066_v33 = vpop.f32.mrb[163].mxu0 }
 0x406   :  { %v2289_v3 = vpop.f32.mrb[131].mxu1  ;;  %5354 = vmatmul.mubr.bf16.gmra.mrb[172].mxu1 %v2412_v28  ;;  %v8213_v28 = vld [vmem:[#allocation98_spill] sm:$0xff] }
 0x407   :  { %v2290_v19 = vadd.f32 %v2289_v3, %v2064_v43  ;;  %v2381_v47 = vmul.f32 %v2287_v37, %v6970_v51 }
 0x409   :  { %v2382_v53 = vmul.f32 %v2290_v19, %v6972_v4 }
 0x40a   :  { %v2069_v29 = vpop.f32.mrb[164].mxu0 }
 0x40b   :  { %v2295_v25 = vadd.f32 %v5231_v8, %v2069_v29  ;;  %v2071_v39 = vpop.f32.mrb[165].mxu0  ;;  %v2413_v62 = vpack.c.bf16 %v2382_v53, %v2381_v47  ;;  %v5235_v27 = vpop.f32.mrb[132].mxu1  ;;  %v8214_v29 = vld [vmem:[#allocation99_spill] sm:$0xff] }
 0x40c   :  { %v2072_v48 = vpop.f32.mrb[166].mxu0  ;;  %v2302_v12 = vpop.f32.mrb[133].mxu1 }
 0x40d   :  { %v2298_v38 = vadd.f32 %v5232_v6, %v2072_v48  ;;  %5357 = vmatprep.mubr.bf16.mxu1 %v2413_v62  ;;  %v2074_v60 = vpop.f32.mrb[167].mxu0  ;;  %v5236_v14 = vpop.f32.mrb[134].mxu1  ;;  %v2383_v55 = vmul.f32 %v2295_v25, %v8212_v24  ;;  %v8215_v62 = vld [vmem:[#allocation100_spill] sm:$0xff] }
 0x40e   :  { %v2305_v15 = vpop.f32.mrb[135].mxu1 }
 0x40f   :  { %v2384_v50 = vmul.f32 %v2298_v38, %v8213_v28 }
 0x411   :  { %v2414_v42 = vpack.c.bf16 %v2384_v50, %v2383_v55 }
 0x412   :  { %v2077_v36 = vpop.f32.mrb[168].mxu0 }
 0x413   :  { %v2303_v43 = vadd.f32 %v2302_v12, %v2077_v36  ;;  %v2079_v37 = vpop.f32.mrb[169].mxu0  ;;  %5358 = vmatmul.mubr.bf16.gmra.mrb[176].mxu1 %v2414_v42  ;;  %v5239_v8 = vpop.f32.mrb[136].mxu1 }
 0x414   :  { %v2080_v33 = vpop.f32.mrb[170].mxu0  ;;  %v2318_v3 = vpop.f32.mrb[137].mxu1 }
 0x415   :  { %v2306_v19 = vadd.f32 %v2305_v15, %v2080_v33  ;;  %v2082_v47 = vpop.f32.mrb[171].mxu0  ;;  %v5240_v53 = vpop.f32.mrb[138].mxu1  ;;  %v2385_v39 = vmul.f32 %v2303_v43, %v8214_v29  ;;  %v8216_v15 = vld [vmem:[#allocation101_spill] sm:$0xff] }
 0x416   :  { %v2321_v6 = vpop.f32.mrb[139].mxu1  ;;  %v8217_v47 = vld [vmem:[#allocation102_spill] sm:$0xff] }
 0x417   :  { %v2386_v48 = vmul.f32 %v2306_v19, %v8215_v62 }
 0x419   :  { %v2415_v60 = vpack.c.bf16 %v2386_v48, %v2385_v39 }
 0x41a   :  { %v2085_v25 = vpop.f32.mrb[172].mxu0 }
 0x41b   :  { %v2311_v24 = vadd.f32 %v5235_v27, %v2085_v25  ;;  %v2087_v38 = vpop.f32.mrb[173].mxu0  ;;  %5361 = vmatprep.mubr.bf16.mxu1 %v2415_v60  ;;  %v5243_v55 = vpop.f32.mrb[140].mxu1  ;;  %v8218_v60 = vld [vmem:[#allocation103_spill] sm:$0xff] }
 0x41c   :  { %v2088_v12 = vpop.f32.mrb[174].mxu0  ;;  %v2334_v50 = vpop.f32.mrb[141].mxu1  ;;  %v8219_v38 = vld [vmem:[#allocation104_spill] sm:$0xff] }
 0x41d   :  { %v2314_v42 = vadd.f32 %v5236_v14, %v2088_v12  ;;  %v2090_v36 = vpop.f32.mrb[175].mxu0  ;;  %v5244_v37 = vpop.f32.mrb[142].mxu1  ;;  %v2387_v33 = vmul.f32 %v2311_v24, %v8216_v15 }
 0x41e   :  { %v2337_v28 = vpop.f32.mrb[143].mxu1 }
 0x41f   :  { %v2388_v4 = vmul.f32 %v2314_v42, %v8217_v47 }
 0x421   :  { %v2416_v51 = vpack.c.bf16 %v2388_v4, %v2387_v33  ;;  %v8220_v4 = vld [vmem:[#allocation105_spill] sm:$0xff] }
 0x422   :  { %v2093_v43 = vpop.f32.mrb[176].mxu0 }
 0x423   :  { %v2319_v29 = vadd.f32 %v2318_v3, %v2093_v43  ;;  %v2095_v19 = vpop.f32.mrb[177].mxu0  ;;  %5362 = vmatmul.mubr.bf16.gmra.mrb[180].mxu1 %v2416_v51  ;;  %v8221_v3 = vld [vmem:[#allocation106_spill] sm:$0xff] }
 0x424   :  { %v2096_v39 = vpop.f32.mrb[178].mxu0 }
 0x425   :  { %v2322_v27 = vadd.f32 %v2321_v6, %v2096_v39  ;;  %v2098_v48 = vpop.f32.mrb[179].mxu0  ;;  %v2389_v25 = vmul.f32 %v2319_v29, %v8218_v60 }
 0x427   :  { %v2390_v62 = vmul.f32 %v2322_v27, %v8219_v38 }
 0x429   :  { %v2417_v14 = vpack.c.bf16 %v2390_v62, %v2389_v25  ;;  %v8222_v62 = vld [vmem:[#allocation107_spill] sm:$0xff] }
 0x42a   :  { %v2101_v12 = vpop.f32.mrb[180].mxu0 }
 0x42b   :  { %v2327_v36 = vadd.f32 %v5239_v8, %v2101_v12  ;;  %v2103_v31 = vpop.f32.mrb[181].mxu0  ;;  %5365 = vmatprep.mubr.bf16.mxu1 %v2417_v14  ;;  %v8223_v8 = vld [vmem:[#allocation108_spill] sm:$0xff] }
 0x42c   :  { %v2104_v24 = vpop.f32.mrb[182].mxu0 }
 0x42d   :  { %v2330_v15 = vadd.f32 %v5240_v53, %v2104_v24  ;;  %v2106_v42 = vpop.f32.mrb[183].mxu0  ;;  %v2391_v33 = vmul.f32 %v2327_v36, %v8220_v4 }
 0x42f   :  { %v2392_v43 = vmul.f32 %v2330_v15, %v8221_v3 }
 0x431   :  { %v2418_v51 = vpack.c.bf16 %v2392_v43, %v2391_v33  ;;  %v8224_v33 = vld [vmem:[#allocation109_spill] sm:$0xff] }
 0x432   :  { %v2109_v19 = vpop.f32.mrb[184].mxu0 }
 0x433   :  { %v2335_v6 = vadd.f32 %v2334_v50, %v2109_v19  ;;  %v2111_v39 = vpop.f32.mrb[185].mxu0  ;;  %5366 = vmatmul.mubr.bf16.gmra.mrb[184].mxu1 %v2418_v51  ;;  %v8225_v50 = vld [vmem:[#allocation110_spill] sm:$0xff] }
 0x434   :  { %v2112_v29 = vpop.f32.mrb[186].mxu0 }
 0x435   :  { %v2338_v48 = vadd.f32 %v2337_v28, %v2112_v29  ;;  %v2114_v27 = vpop.f32.mrb[187].mxu0  ;;  %v2393_v25 = vmul.f32 %v2335_v6, %v8222_v62  ;;  %v8226_v28 = vld [vmem:[#allocation12_spill] sm:$0xff]  ;;  %v7362_v6 = vld [vmem:[%s7848_s6] ss:$0 sm:$0xff] }
 0x437   :  { %v2394_v31 = vmul.f32 %v2338_v48, %v8223_v8 }
 0x439   :  { %v2419_v14 = vpack.c.bf16 %v2394_v31, %v2393_v25 }
 0x43a   :  { %v2117_v12 = vpop.f32.mrb[188].mxu0 }
 0x43b   :  { %v2343_v53 = vadd.f32 %v5243_v55, %v2117_v12  ;;  %v2119_v24 = vpop.f32.mrb[189].mxu0  ;;  %5369 = vmatprep.mubr.bf16.mxu1 %v2419_v14 }
 0x43c   :  { %v2120_v36 = vpop.f32.mrb[190].mxu0 }
 0x43d   :  { %v2346_v42 = vadd.f32 %v5244_v37, %v2120_v36  ;;  %v2122_v15 = vpop.f32.mrb[191].mxu0  ;;  %v2395_v43 = vmul.f32 %v2343_v53, %v8224_v33 }
 0x43f   :  { %v2396_v19 = vmul.f32 %v2346_v42, %v8225_v50 }
 0x441   :  { %v2420_v51 = vpack.c.bf16 %v2396_v19, %v2395_v43 }
 0x443   :  { %5370 = vmatmul.mubr.bf16.gmra.mrb[188].mxu1 %v2420_v51 }
 0x444   :  { %5389 = vmatprep.mubr.bf16.mxu1 %v8226_v28 }
 0x4a1   :  { %v5327_v39 = vpop.f32.mrb[144].mxu1 }
 0x4a2   :  { %v3008_v55 = vadd.f32 %v5327_v39, %v7362_v6  ;;  %v2808_v29 = vpop.f32.mrb[145].mxu1 }
 0x4a3   :  { %v3006_v37 = vadd.f32 %v7362_v6, %v2808_v29  ;;  %v5328_v48 = vpop.f32.mrb[146].mxu1 }
 0x4a4   :  { %v3009_v27 = vadd.f32 %v5328_v48, %v7362_v6  ;;  %v2811_v25 = vpop.f32.mrb[147].mxu1  ;;  %v3056_v14 = vmax.f32 %v3008_v55, 0.0  ;;  %v8227_v55 = vmov 0  }
 0x4a5   :  { %v3007_v31 = vadd.f32 %v7362_v6, %v2811_v25  ;;  %v3054_v53 = vmax.f32 %v3006_v37, 0.0 }
 0x4a6   :  { %v3057_v12 = vmax.f32 %v3009_v27, 0.0 }
 0x4a7   :  { %v3055_v24 = vmax.f32 %v3007_v31, 0.0 }
 0x4a8   :  { %v7368_v36 = vpack.c.bf16 %v3057_v12, %v3056_v14 }
 0x4a9   :  { %v7370_v42 = vpack.c.bf16 %v3055_v24, %v3054_v53  ;;  %v5331_v15 = vpop.f32.mrb[148].mxu1 }
 0x4aa   :  { %v3012_v43 = vadd.f32 %v5331_v15, %v7362_v6  ;;  %v2824_v19 = vpop.f32.mrb[149].mxu1 }
 0x4ab   :  { %v3010_v51 = vadd.f32 %v7362_v6, %v2824_v19  ;;  %v5332_v28 = vpop.f32.mrb[150].mxu1  ;;  %3127 = vmatpush1.bf16.msra.mxu0 %v7370_v42 }
 0x4ac   :  { %v3013_v39 = vadd.f32 %v5332_v28, %v7362_v6  ;;  %v2827_v29 = vpop.f32.mrb[151].mxu1  ;;  %3128 = vmatprep.subr.bf16.mxu0 %v8227_v55  ;;  %v3060_v48 = vmax.f32 %v3012_v43, 0.0 }
 0x4ad   :  { %v3011_v37 = vadd.f32 %v7362_v6, %v2827_v29  ;;  %v3058_v25 = vmax.f32 %v3010_v51, 0.0 }
 0x4ae   :  { %v3061_v27 = vmax.f32 %v3013_v39, 0.0 }
 0x4af   :  { %v3059_v31 = vmax.f32 %v3011_v37, 0.0  ;;  %3129 = vmatpush1.bf16.msra.mxu0 %v7368_v36 }
 0x4b0   :  { %v7379_v14 = vpack.c.bf16 %v3061_v27, %v3060_v48  ;;  %3130 = vmatprep.subr.bf16.mxu0 %v8227_v55 }
 0x4b1   :  { %v7382_v12 = vpack.c.bf16 %v3059_v31, %v3058_v25  ;;  %v5335_v53 = vpop.f32.mrb[152].mxu1 }
 0x4b2   :  { %v3016_v24 = vadd.f32 %v5335_v53, %v7362_v6  ;;  %v2840_v15 = vpop.f32.mrb[153].mxu1 }
 0x4b3   :  { %v3014_v19 = vadd.f32 %v7362_v6, %v2840_v15  ;;  %v5336_v28 = vpop.f32.mrb[154].mxu1  ;;  %3131 = vmatpush1.bf16.msra.mxu0 %v7382_v12 }
 0x4b4   :  { %v3017_v43 = vadd.f32 %v5336_v28, %v7362_v6  ;;  %v2843_v51 = vpop.f32.mrb[155].mxu1  ;;  %3132 = vmatprep.subr.bf16.mxu0 %v8227_v55  ;;  %v3064_v29 = vmax.f32 %v3016_v24, 0.0 }
 0x4b5   :  { %v3015_v39 = vadd.f32 %v7362_v6, %v2843_v51  ;;  %v3062_v48 = vmax.f32 %v3014_v19, 0.0 }
 0x4b6   :  { %v3065_v37 = vmax.f32 %v3017_v43, 0.0 }
 0x4b7   :  { %v3063_v27 = vmax.f32 %v3015_v39, 0.0  ;;  %3133 = vmatpush1.bf16.msra.mxu0 %v7379_v14 }
 0x4b8   :  { %v7391_v25 = vpack.c.bf16 %v3065_v37, %v3064_v29  ;;  %3134 = vmatprep.subr.bf16.mxu0 %v8227_v55 }
 0x4b9   :  { %v7394_v31 = vpack.c.bf16 %v3063_v27, %v3062_v48  ;;  %v5339_v53 = vpop.f32.mrb[156].mxu1 }
 0x4ba   :  { %v3020_v15 = vadd.f32 %v5339_v53, %v7362_v6  ;;  %v2856_v28 = vpop.f32.mrb[157].mxu1 }
 0x4bb   :  { %v3018_v50 = vadd.f32 %v7362_v6, %v2856_v28  ;;  %v5340_v33 = vpop.f32.mrb[158].mxu1  ;;  %3135 = vmatpush1.bf16.msra.mxu0 %v7394_v31 }
 0x4bc   :  { %v3021_v24 = vadd.f32 %v5340_v33, %v7362_v6  ;;  %v2859_v19 = vpop.f32.mrb[159].mxu1  ;;  %3136 = vmatprep.subr.bf16.mxu0 %v8227_v55  ;;  %v3068_v51 = vmax.f32 %v3020_v15, 0.0 }
 0x4bd   :  { %v3019_v43 = vadd.f32 %v7362_v6, %v2859_v19  ;;  %v3066_v29 = vmax.f32 %v3018_v50, 0.0 }
 0x4be   :  { %v3069_v39 = vmax.f32 %v3021_v24, 0.0 }
 0x4bf   :  { %v3067_v37 = vmax.f32 %v3019_v43, 0.0  ;;  %3137 = vmatpush1.bf16.msra.mxu0 %v7391_v25 }
 0x4c0   :  { %v7403_v48 = vpack.c.bf16 %v3069_v39, %v3068_v51  ;;  %3138 = vmatprep.subr.bf16.mxu0 %v8227_v55 }
 0x4c1   :  { %v7406_v27 = vpack.c.bf16 %v3067_v37, %v3066_v29  ;;  %v5343_v53 = vpop.f32.mrb[160].mxu1 }
 0x4c2   :  { %v3024_v33 = vadd.f32 %v5343_v53, %v7362_v6  ;;  %v2872_v28 = vpop.f32.mrb[161].mxu1 }
 0x4c3   :  { %v3022_v8 = vadd.f32 %v7362_v6, %v2872_v28  ;;  %v5344_v62 = vpop.f32.mrb[162].mxu1  ;;  %3139 = vmatpush1.bf16.msra.mxu0 %v7406_v27 }
 0x4c4   :  { %v3025_v50 = vadd.f32 %v5344_v62, %v7362_v6  ;;  %v2875_v15 = vpop.f32.mrb[163].mxu1  ;;  %3140 = vmatprep.subr.bf16.mxu0 %v8227_v55  ;;  %v3072_v19 = vmax.f32 %v3024_v33, 0.0 }
 0x4c5   :  { %v3023_v24 = vadd.f32 %v7362_v6, %v2875_v15  ;;  %v3070_v51 = vmax.f32 %v3022_v8, 0.0 }
 0x4c6   :  { %v3073_v43 = vmax.f32 %v3025_v50, 0.0 }
 0x4c7   :  { %v3071_v39 = vmax.f32 %v3023_v24, 0.0  ;;  %3141 = vmatpush1.bf16.msra.mxu0 %v7403_v48 }
 0x4c8   :  { %v7415_v29 = vpack.c.bf16 %v3073_v43, %v3072_v19  ;;  %3142 = vmatprep.subr.bf16.mxu0 %v8227_v55 }
 0x4c9   :  { %v7418_v37 = vpack.c.bf16 %v3071_v39, %v3070_v51  ;;  %v5347_v53 = vpop.f32.mrb[164].mxu1 }
 0x4ca   :  { %v3028_v62 = vadd.f32 %v5347_v53, %v7362_v6  ;;  %v2888_v28 = vpop.f32.mrb[165].mxu1 }
 0x4cb   :  { %v3026_v3 = vadd.f32 %v7362_v6, %v2888_v28  ;;  %v5348_v4 = vpop.f32.mrb[166].mxu1  ;;  %3143 = vmatpush1.bf16.msra.mxu0 %v7418_v37 }
 0x4cc   :  { %v3029_v8 = vadd.f32 %v5348_v4, %v7362_v6  ;;  %v2891_v33 = vpop.f32.mrb[167].mxu1  ;;  %3144 = vmatprep.subr.bf16.mxu0 %v8227_v55  ;;  %v3076_v15 = vmax.f32 %v3028_v62, 0.0 }
 0x4cd   :  { %v3027_v50 = vadd.f32 %v7362_v6, %v2891_v33  ;;  %v3074_v19 = vmax.f32 %v3026_v3, 0.0 }
 0x4ce   :  { %v3077_v24 = vmax.f32 %v3029_v8, 0.0 }
 0x4cf   :  { %v3075_v43 = vmax.f32 %v3027_v50, 0.0  ;;  %3145 = vmatpush1.bf16.msra.mxu0 %v7415_v29 }
 0x4d0   :  { %v7427_v51 = vpack.c.bf16 %v3077_v24, %v3076_v15  ;;  %3146 = vmatprep.subr.bf16.mxu0 %v8227_v55 }
 0x4d1   :  { %v7430_v39 = vpack.c.bf16 %v3075_v43, %v3074_v19  ;;  %v5351_v53 = vpop.f32.mrb[168].mxu1 }
 0x4d2   :  { %v3032_v4 = vadd.f32 %v5351_v53, %v7362_v6  ;;  %v2904_v28 = vpop.f32.mrb[169].mxu1 }
 0x4d3   :  { %v3030_v38 = vadd.f32 %v7362_v6, %v2904_v28  ;;  %v5352_v60 = vpop.f32.mrb[170].mxu1  ;;  %3147 = vmatpush1.bf16.msra.mxu0 %v7430_v39 }
 0x4d4   :  { %v3033_v3 = vadd.f32 %v5352_v60, %v7362_v6  ;;  %v2907_v62 = vpop.f32.mrb[171].mxu1  ;;  %3148 = vmatprep.subr.bf16.mxu0 %v8227_v55  ;;  %v3080_v33 = vmax.f32 %v3032_v4, 0.0 }
 0x4d5   :  { %v3031_v8 = vadd.f32 %v7362_v6, %v2907_v62  ;;  %v3078_v15 = vmax.f32 %v3030_v38, 0.0 }
 0x4d6   :  { %v3081_v50 = vmax.f32 %v3033_v3, 0.0 }
 0x4d7   :  { %v3079_v24 = vmax.f32 %v3031_v8, 0.0  ;;  %3149 = vmatpush1.bf16.msra.mxu0 %v7427_v51 }
 0x4d8   :  { %v7439_v19 = vpack.c.bf16 %v3081_v50, %v3080_v33  ;;  %3150 = vmatprep.subr.bf16.mxu0 %v8227_v55 }
 0x4d9   :  { %v7442_v43 = vpack.c.bf16 %v3079_v24, %v3078_v15  ;;  %v5355_v53 = vpop.f32.mrb[172].mxu1 }
 0x4da   :  { %v3036_v60 = vadd.f32 %v5355_v53, %v7362_v6  ;;  %v2920_v28 = vpop.f32.mrb[173].mxu1 }
 0x4db   :  { %v3034_v47 = vadd.f32 %v7362_v6, %v2920_v28  ;;  %v5356_v41 = vpop.f32.mrb[174].mxu1  ;;  %3151 = vmatpush1.bf16.msra.mxu0 %v7442_v43 }
 0x4dc   :  { %v3037_v38 = vadd.f32 %v5356_v41, %v7362_v6  ;;  %v2923_v4 = vpop.f32.mrb[175].mxu1  ;;  %3152 = vmatprep.subr.bf16.mxu0 %v8227_v55  ;;  %v3084_v62 = vmax.f32 %v3036_v60, 0.0 }
 0x4dd   :  { %v3035_v3 = vadd.f32 %v7362_v6, %v2923_v4  ;;  %v3082_v33 = vmax.f32 %v3034_v47, 0.0 }
 0x4de   :  { %v3085_v8 = vmax.f32 %v3037_v38, 0.0 }
 0x4df   :  { %v3083_v50 = vmax.f32 %v3035_v3, 0.0  ;;  %3153 = vmatpush1.bf16.msra.mxu0 %v7439_v19 }
 0x4e0   :  { %v7451_v15 = vpack.c.bf16 %v3085_v8, %v3084_v62  ;;  %3154 = vmatprep.subr.bf16.mxu0 %v8227_v55 }
 0x4e1   :  { %v7454_v24 = vpack.c.bf16 %v3083_v50, %v3082_v33 }
 0x4e3   :  { %3155 = vmatpush1.bf16.msra.mxu0 %v7454_v24 }
 0x4e4   :  { %3156 = vmatprep.subr.bf16.mxu0 %v8227_v55 }
 0x4e6   :  { %v5359_v41 = vpop.f32.mrb[176].mxu1 }
 0x4e7   :  { %v3040_v53 = vadd.f32 %v5359_v41, %v7362_v6  ;;  %v2936_v28 = vpop.f32.mrb[177].mxu1  ;;  %3157 = vmatpush1.bf16.msra.mxu0 %v7451_v15 }
 0x4e8   :  { %v3038_v47 = vadd.f32 %v7362_v6, %v2936_v28  ;;  %v5360_v60 = vpop.f32.mrb[178].mxu1  ;;  %v8228_v28 = vld [vmem:[#allocation22_spill] sm:$0xff] }
 0x4e9   :  { %v3041_v38 = vadd.f32 %v5360_v60, %v7362_v6  ;;  %v2939_v4 = vpop.f32.mrb[179].mxu1  ;;  %v3088_v62 = vmax.f32 %v3040_v53, 0.0  ;;  %v8229_v60 = vld [vmem:[#allocation23_spill] sm:$0xff] }
 0x4ea   :  { %v3039_v3 = vadd.f32 %v7362_v6, %v2939_v4  ;;  %3159 = vmatmul.mubr.bf16.vlgmr.msra.gmra.mrb[192].mxu0 %v6374_v20  ;;  %v3086_v55 = vmax.f32 %v3038_v47, 0.0 }
 0x4eb   :  { %v3089_v8 = vmax.f32 %v3041_v38, 0.0  ;;  %3166 = vmatprep.mubr.bf16.mxu0 %v6378_v23 }
 0x4ec   :  { %v3087_v33 = vmax.f32 %v3039_v3, 0.0 }
 0x4ed   :  { %v7465_v50 = vpack.c.bf16 %v3089_v8, %v3088_v62 }
 0x4ee   :  { %v7467_v41 = vpack.c.bf16 %v3087_v33, %v3086_v55 }
 0x4f0   :  { %5373 = vmatprep.subr.bf16.mxu1 %v7467_v41 }
 0x4f1   :  { %5374 = vmatpush3.bf16.msra.mxu1 %v7467_v41 }
 0x4f2   :  { %3167 = vmatmul.mubr.bf16.gmra.mrb[196].mxu0 %v8228_v28  ;;  %5375 = vmatprep.subr.bf16.mxu1 %v7465_v50 }
 0x4f3   :  { %3174 = vmatprep.mubr.bf16.mxu0 %v8229_v60 }
 0x4f5   :  { %5376 = vmatpush3.bf16.msra.mxu1 %v7465_v50 }
 0x4f6   :  { %v5363_v20 = vpop.f32.mrb[180].mxu1 }
 0x4f7   :  { %v3044_v23 = vadd.f32 %v5363_v20, %v7362_v6  ;;  %v2952_v53 = vpop.f32.mrb[181].mxu1 }
 0x4f8   :  { %v3042_v47 = vadd.f32 %v7362_v6, %v2952_v53  ;;  %v5364_v38 = vpop.f32.mrb[182].mxu1  ;;  %v8230_v53 = vld [vmem:[#allocation28_spill] sm:$0xff] }
 0x4f9   :  { %v3045_v4 = vadd.f32 %v5364_v38, %v7362_v6  ;;  %v2955_v3 = vpop.f32.mrb[183].mxu1  ;;  %v3092_v8 = vmax.f32 %v3044_v23, 0.0  ;;  %v5857_v38 = vld [vmem:[#allocation7 + $0x40] sm:$0xff]  }
 0x4fa   :  { %v3043_v62 = vadd.f32 %v7362_v6, %v2955_v3  ;;  %3175 = vmatmul.mubr.bf16.gmra.mrb[200].mxu0 %v6437_v52  ;;  %v3090_v33 = vmax.f32 %v3042_v47, 0.0  ;;  %v8231_v52 = vld [vmem:[#allocation29_spill] sm:$0xff]  ;;  %5437 = vmatprep.subr.bf16.mxu0 %v5857_v38 }
 0x4fb   :  { %v3093_v55 = vmax.f32 %v3045_v4, 0.0  ;;  %3182 = vmatprep.mubr.bf16.mxu0 %v6439_v54  ;;  %5438 = vmatpush3.bf16.msra.mxu0 %v5857_v38 }
 0x4fc   :  { %v3091_v28 = vmax.f32 %v3043_v62, 0.0 }
 0x4fd   :  { %v7481_v60 = vpack.c.bf16 %v3093_v55, %v3092_v8 }
 0x4fe   :  { %v7483_v20 = vpack.c.bf16 %v3091_v28, %v3090_v33  ;;  %v5858_v33 = vld [vmem:[#allocation7 + $0x48] sm:$0xff]  }
 0x4ff   :  { %5439 = vmatprep.subr.bf16.mxu0 %v5858_v33 }
 0x500   :  { %5377 = vmatprep.subr.bf16.mxu1 %v7483_v20  ;;  %5440 = vmatpush3.bf16.msra.mxu0 %v5858_v33 }
 0x501   :  { %5378 = vmatpush3.bf16.msra.mxu1 %v7483_v20 }
 0x502   :  { %3183 = vmatmul.mubr.bf16.gmra.mrb[204].mxu0 %v8230_v53  ;;  %5379 = vmatprep.subr.bf16.mxu1 %v7481_v60 }
 0x503   :  { %3190 = vmatprep.mubr.bf16.mxu0 %v8231_v52 }
 0x505   :  { %5380 = vmatpush3.bf16.msra.mxu1 %v7481_v60 }
 0x506   :  { %v5367_v54 = vpop.f32.mrb[184].mxu1 }
 0x507   :  { %v3048_v23 = vadd.f32 %v5367_v54, %v7362_v6  ;;  %v2968_v47 = vpop.f32.mrb[185].mxu1 }
 0x508   :  { %v3046_v4 = vadd.f32 %v7362_v6, %v2968_v47  ;;  %v5368_v3 = vpop.f32.mrb[186].mxu1 }
 0x509   :  { %v3049_v62 = vadd.f32 %v5368_v3, %v7362_v6  ;;  %v2971_v8 = vpop.f32.mrb[187].mxu1  ;;  %v3096_v28 = vmax.f32 %v3048_v23, 0.0  ;;  %v5859_v3 = vld [vmem:[#allocation7 + $0x50] sm:$0xff]   ;;  %v8233_v23 = vld [vmem:[#allocation35_spill] sm:$0xff] }
 0x50a   :  { %v3047_v55 = vadd.f32 %v7362_v6, %v2971_v8  ;;  %3191 = vmatmul.mubr.bf16.gmra.mrb[208].mxu0 %v6491_v46  ;;  %v3094_v38 = vmax.f32 %v3046_v4, 0.0  ;;  %v8232_v8 = vld [vmem:[#allocation34_spill] sm:$0xff]  ;;  %5441 = vmatprep.subr.bf16.mxu0 %v5859_v3 }
 0x50b   :  { %v3097_v53 = vmax.f32 %v3049_v62, 0.0  ;;  %3198 = vmatprep.mubr.bf16.mxu0 %v6496_v49  ;;  %v5860_v46 = vld [vmem:[#allocation7 + $0x58] sm:$0xff]   ;;  %5442 = vmatpush3.bf16.msra.mxu0 %v5859_v3  ;;  %v5862_v3 = vld [vmem:[#allocation7 + $0x68] sm:$0xff]  }
 0x50c   :  { %v3095_v52 = vmax.f32 %v3047_v55, 0.0  ;;  %5443 = vmatprep.subr.bf16.mxu0 %v5860_v46 }
 0x50d   :  { %v7497_v54 = vpack.c.bf16 %v3097_v53, %v3096_v28  ;;  %v5861_v28 = vld [vmem:[#allocation7 + $0x60] sm:$0xff]  }
 0x50e   :  { %v7499_v47 = vpack.c.bf16 %v3095_v52, %v3094_v38 }
 0x50f   :  { %5444 = vmatpush3.bf16.msra.mxu0 %v5860_v46 }
 0x510   :  { %5381 = vmatprep.subr.bf16.mxu1 %v7499_v47  ;;  %5445 = vmatprep.subr.bf16.mxu0 %v5861_v28 }
 0x511   :  { %5382 = vmatpush3.bf16.msra.mxu1 %v7499_v47 }
 0x512   :  { %3199 = vmatmul.mubr.bf16.gmra.mrb[212].mxu0 %v8232_v8  ;;  %5383 = vmatprep.subr.bf16.mxu1 %v7497_v54 }
 0x513   :  { %3206 = vmatprep.mubr.bf16.mxu0 %v8233_v23  ;;  %5446 = vmatpush3.bf16.msra.mxu0 %v5861_v28  ;;  %v8240_v28 = vld [vmem:[#allocation17_spill] sm:$0xff] }
 0x514   :  { %5447 = vmatprep.subr.bf16.mxu0 %v5862_v3 }
 0x515   :  { %5384 = vmatpush3.bf16.msra.mxu1 %v7497_v54 }
 0x516   :  { %v5371_v49 = vpop.f32.mrb[188].mxu1 }
 0x517   :  { %v3052_v4 = vadd.f32 %v5371_v49, %v7362_v6  ;;  %v2984_v62 = vpop.f32.mrb[189].mxu1  ;;  %5448 = vmatpush3.bf16.msra.mxu0 %v5862_v3  ;;  %v8244_v3 = vld [vmem:[#allocation19_spill] sm:$0xff] }
 0x518   :  { %v3050_v55 = vadd.f32 %v7362_v6, %v2984_v62  ;;  %v5372_v33 = vpop.f32.mrb[190].mxu1 }
 0x519   :  { %v3053_v53 = vadd.f32 %v5372_v33, %v7362_v6  ;;  %v2987_v38 = vpop.f32.mrb[191].mxu1  ;;  %v3100_v8 = vmax.f32 %v3052_v4, 0.0  ;;  %v8236_v4 = vld [vmem:[#allocation15_spill] sm:$0xff]  ;;  %v8238_v33 = vld [vmem:[#allocation44_spill] sm:$0xff] }
 0x51a   :  { %v3051_v52 = vadd.f32 %v7362_v6, %v2987_v38  ;;  %3207 = vmatmul.mubr.bf16.gmra.mrb[216].mxu0 %v6551_v34  ;;  %v3098_v49 = vmax.f32 %v3050_v55, 0.0  ;;  %v5863_v6 = vld [vmem:[#allocation7 + $0x70] sm:$0xff]   ;;  %v8234_v34 = vld [vmem:[#allocation40_spill] sm:$0xff]  ;;  %v8237_v55 = vld [vmem:[#allocation43_spill] sm:$0xff] }
 0x51b   :  { %v3101_v23 = vmax.f32 %v3053_v53, 0.0  ;;  %3214 = vmatprep.mubr.bf16.mxu0 %v6556_v61  ;;  %5449 = vmatprep.subr.bf16.mxu0 %v5863_v6  ;;  %v5864_v61 = vld [vmem:[#allocation7 + $0x78] sm:$0xff]  }
 0x51c   :  { %v3099_v26 = vmax.f32 %v3051_v52, 0.0  ;;  %5450 = vmatpush3.bf16.msra.mxu0 %v5863_v6  ;;  %v8241_v53 = vld [vmem:[#allocation46_spill] sm:$0xff]  ;;  %v8242_v38 = vld [vmem:[#allocation47_spill] sm:$0xff]  ;;  %v8248_v6 = vld [vmem:[#allocation21_spill] sm:$0xff] }
 0x51d   :  { %v7513_v62 = vpack.c.bf16 %v3101_v23, %v3100_v8  ;;  %5451 = vmatprep.subr.bf16.mxu0 %v5864_v61  ;;  %v8243_v52 = vld [vmem:[#allocation18_spill] sm:$0xff]  ;;  %v8245_v8 = vld [vmem:[#allocation48_spill] sm:$0xff]  ;;  %v8246_v23 = vld [vmem:[#allocation49_spill] sm:$0xff] }
 0x51e   :  { %v7515_v46 = vpack.c.bf16 %v3099_v26, %v3098_v49  ;;  %v8235_v26 = vld [vmem:[#allocation14_spill] sm:$0xff]  ;;  %v8247_v49 = vld [vmem:[#allocation20_spill] sm:$0xff] }
 0x520   :  { %5385 = vmatprep.subr.bf16.mxu1 %v7515_v46  ;;  %5452 = vmatpush3.bf16.msra.mxu0 %v5864_v61  ;;  %v8250_v61 = vld [vmem:[#allocation51_spill] sm:$0xff] }
 0x521   :  { %5386 = vmatpush3.bf16.msra.mxu1 %v7515_v46 }
 0x522   :  { %3215 = vmatmul.mubr.bf16.gmra.mrb[220].mxu0 %v6581_v63  ;;  %5387 = vmatprep.subr.bf16.mxu1 %v7513_v62  ;;  %v8239_v63 = vld [vmem:[#allocation16_spill] sm:$0xff] }
 0x523   :  { %3222 = vmatprep.mubr.bf16.mxu0 %v8234_v34  ;;  %v8249_v34 = vld [vmem:[#allocation50_spill] sm:$0xff] }
 0x525   :  { %5388 = vmatpush3.bf16.msra.mxu1 %v7513_v62 }
 0x528   :  { %5390 = vmatmul.mubr.bf16.vlgmr.msra.gmra.mrb[192].mxu1 %v8235_v26  ;;  %v8251_v26 = vld [vmem:[#allocation24_spill] sm:$0xff] }
 0x529   :  { %5393 = vmatprep.mubr.bf16.mxu1 %v8236_v4  ;;  %v8252_v4 = vld [vmem:[#allocation25_spill] sm:$0xff] }
 0x52a   :  { %3223 = vmatmul.mubr.bf16.gmra.mrb[224].mxu0 %v8237_v55  ;;  %v8253_v55 = vld [vmem:[#allocation52_spill] sm:$0xff] }
 0x52b   :  { %3230 = vmatprep.mubr.bf16.mxu0 %v8238_v33  ;;  %v8254_v33 = vld [vmem:[#allocation53_spill] sm:$0xff] }
 0x530   :  { %5394 = vmatmul.mubr.bf16.gmra.mrb[196].mxu1 %v8239_v63  ;;  %v8255_v63 = vld [vmem:[#allocation26_spill] sm:$0xff] }
 0x531   :  { %5397 = vmatprep.mubr.bf16.mxu1 %v8240_v28  ;;  %v8256_v28 = vld [vmem:[#allocation27_spill] sm:$0xff] }
 0x532   :  { %3231 = vmatmul.mubr.bf16.gmra.mrb[228].mxu0 %v8241_v53  ;;  %v8257_v53 = vld [vmem:[#allocation54_spill] sm:$0xff] }
 0x533   :  { %3238 = vmatprep.mubr.bf16.mxu0 %v8242_v38  ;;  %v8258_v38 = vld [vmem:[#allocation55_spill] sm:$0xff] }
 0x538   :  { %5398 = vmatmul.mubr.bf16.gmra.mrb[200].mxu1 %v8243_v52  ;;  %v8259_v52 = vld [vmem:[#allocation30_spill] sm:$0xff] }
 0x539   :  { %5401 = vmatprep.mubr.bf16.mxu1 %v8244_v3  ;;  %v8260_v3 = vld [vmem:[#allocation31_spill] sm:$0xff] }
 0x53a   :  { %3239 = vmatmul.mubr.bf16.gmra.mrb[232].mxu0 %v8245_v8  ;;  %v8261_v8 = vld [vmem:[#allocation56_spill] sm:$0xff] }
 0x53b   :  { %3246 = vmatprep.mubr.bf16.mxu0 %v8246_v23  ;;  %v8262_v23 = vld [vmem:[#allocation57_spill] sm:$0xff] }
 0x540   :  { %5402 = vmatmul.mubr.bf16.gmra.mrb[204].mxu1 %v8247_v49  ;;  %v8263_v49 = vld [vmem:[#allocation32_spill] sm:$0xff] }
 0x541   :  { %5405 = vmatprep.mubr.bf16.mxu1 %v8248_v6  ;;  %v8264_v6 = vld [vmem:[#allocation33_spill] sm:$0xff] }
 0x542   :  { %3247 = vmatmul.mubr.bf16.gmra.mrb[236].mxu0 %v8249_v34  ;;  %v8265_v34 = vld [vmem:[#allocation58_spill] sm:$0xff] }
 0x543   :  { %3254 = vmatprep.mubr.bf16.mxu0 %v8250_v61  ;;  %v8266_v61 = vld [vmem:[#allocation59_spill] sm:$0xff] }
 0x548   :  { %5406 = vmatmul.mubr.bf16.gmra.mrb[208].mxu1 %v8251_v26  ;;  %v8267_v26 = vld [vmem:[#allocation36_spill] sm:$0xff] }
 0x549   :  { %5409 = vmatprep.mubr.bf16.mxu1 %v8252_v4  ;;  %v5865_v4 = vld [vmem:[#allocation7] sm:$0xff]  }
 0x54a   :  { %3255 = vmatmul.mubr.bf16.gmra.mrb[240].mxu0 %v8253_v55  ;;  %v8268_v55 = vld [vmem:[#allocation37_spill] sm:$0xff]  ;;  %5501 = vmatprep.subr.bf16.mxu0 %v5865_v4 }
 0x54b   :  { %3262 = vmatprep.mubr.bf16.mxu0 %v8254_v33  ;;  %v8269_v33 = vld [vmem:[#allocation60_spill] sm:$0xff] }
 0x550   :  { %5410 = vmatmul.mubr.bf16.gmra.mrb[212].mxu1 %v8255_v63  ;;  %v8270_v63 = vld [vmem:[#allocation61_spill] sm:$0xff] }
 0x551   :  { %5413 = vmatprep.mubr.bf16.mxu1 %v8256_v28  ;;  %v8271_v28 = vld [vmem:[#allocation38_spill] sm:$0xff] }
 0x552   :  { %3263 = vmatmul.mubr.bf16.gmra.mrb[244].mxu0 %v8257_v53  ;;  %v8272_v53 = vld [vmem:[#allocation39_spill] sm:$0xff] }
 0x553   :  { %3270 = vmatprep.mubr.bf16.mxu0 %v8258_v38  ;;  %v8273_v38 = vld [vmem:[#allocation62_spill] sm:$0xff] }
 0x558   :  { %5414 = vmatmul.mubr.bf16.gmra.mrb[216].mxu1 %v8259_v52  ;;  %v8274_v52 = vld [vmem:[#allocation63_spill] sm:$0xff] }
 0x559   :  { %5417 = vmatprep.mubr.bf16.mxu1 %v8260_v3  ;;  %v8275_v3 = vld [vmem:[#allocation41_spill] sm:$0xff] }
 0x55a   :  { %3271 = vmatmul.mubr.bf16.gmra.mrb[248].mxu0 %v8261_v8  ;;  %v8276_v8 = vld [vmem:[#allocation42_spill] sm:$0xff] }
 0x55b   :  { %3278 = vmatprep.mubr.bf16.mxu0 %v8262_v23  ;;  %v8277_v23 = vld [vmem:[#allocation64_spill] sm:$0xff] }
 0x560   :  { %5418 = vmatmul.mubr.bf16.gmra.mrb[220].mxu1 %v8263_v49  ;;  %v8278_v49 = vld [vmem:[#allocation65_spill] sm:$0xff] }
 0x561   :  { %5421 = vmatprep.mubr.bf16.mxu1 %v8264_v6  ;;  %v8279_v6 = vld [vmem:[#allocation45_spill] sm:$0xff] }
 0x562   :  { %3279 = vmatmul.mubr.bf16.gmra.mrb[252].mxu0 %v8265_v34  ;;  %v8280_v34 = vld [vmem:[#allocation66_spill] sm:$0xff] }
 0x563   :  { %3286 = vmatprep.mubr.bf16.mxu0 %v8266_v61  ;;  %v8281_v61 = vld [vmem:[#allocation67_spill] sm:$0xff] }
 0x568   :  { %5422 = vmatmul.mubr.bf16.gmra.mrb[224].mxu1 %v8267_v26  ;;  %v8282_v26 = vld [vmem:[#allocation68_spill] sm:$0xff] }
 0x569   :  { %5425 = vmatprep.mubr.bf16.mxu1 %v8268_v55  ;;  %v8283_v55 = vld [vmem:[#allocation69_spill] sm:$0xff] }
 0x56a   :  { %3287 = vmatmul.mubr.bf16.gmra.mrb[0].mxu0 %v8269_v33  ;;  %v8284_v33 = vld [vmem:[#allocation70_spill] sm:$0xff] }
 0x56b   :  { %3294 = vmatprep.mubr.bf16.mxu0 %v8270_v63  ;;  %v8285_v63 = vld [vmem:[#allocation71_spill] sm:$0xff] }
 0x570   :  { %5426 = vmatmul.mubr.bf16.gmra.mrb[228].mxu1 %v8271_v28  ;;  %v8286_v28 = vld [vmem:[#allocation72_spill] sm:$0xff] }
 0x571   :  { %5429 = vmatprep.mubr.bf16.mxu1 %v8272_v53  ;;  %v8287_v53 = vld [vmem:[#allocation73_spill] sm:$0xff] }
 0x572   :  { %3295 = vmatmul.mubr.bf16.gmra.mrb[4].mxu0 %v8273_v38  ;;  %v8288_v38 = vld [vmem:[#allocation74_spill] sm:$0xff] }
 0x573   :  { %3302 = vmatprep.mubr.bf16.mxu0 %v8274_v52  ;;  %v5866_v52 = vld [vmem:[#allocation7 + $0x8] sm:$0xff]  }
 0x578   :  { %5430 = vmatmul.mubr.bf16.gmra.mrb[232].mxu1 %v8275_v3  ;;  %v5867_v3 = vld [vmem:[#allocation7 + $0x10] sm:$0xff]  }
 0x579   :  { %5433 = vmatprep.mubr.bf16.mxu1 %v8276_v8  ;;  %v5868_v8 = vld [vmem:[#allocation7 + $0x18] sm:$0xff]  }
 0x57a   :  { %3303 = vmatmul.mubr.bf16.gmra.mrb[8].mxu0 %v8277_v23  ;;  %v5869_v23 = vld [vmem:[#allocation7 + $0x20] sm:$0xff]  }
 0x57b   :  { %3310 = vmatprep.mubr.bf16.mxu0 %v8278_v49 }
 0x580   :  { %5434 = vmatmul.mubr.bf16.gmra.mrb[236].mxu1 %v8279_v6 }
 0x582   :  { %3311 = vmatmul.mubr.bf16.gmra.mrb[12].mxu0 %v8280_v34 }
 0x583   :  { %3318 = vmatprep.mubr.bf16.mxu0 %v8281_v61 }
 0x58a   :  { %3319 = vmatmul.mubr.bf16.gmra.mrb[16].mxu0 %v8282_v26 }
 0x58b   :  { %3326 = vmatprep.mubr.bf16.mxu0 %v8283_v55 }
 0x592   :  { %3327 = vmatmul.mubr.bf16.gmra.mrb[20].mxu0 %v8284_v33 }
 0x593   :  { %3334 = vmatprep.mubr.bf16.mxu0 %v8285_v63 }
 0x59a   :  { %3335 = vmatmul.mubr.bf16.gmra.mrb[24].mxu0 %v8286_v28 }
 0x59b   :  { %3342 = vmatprep.mubr.bf16.mxu0 %v8287_v53 }
 0x5a2   :  { %3343 = vmatmul.mubr.bf16.gmra.mrb[28].mxu0 %v8288_v38 }
 0x5a3   :  { %5453 = vmatprep.mubr.bf16.mxu0 %v7370_v42  ;;  %v5870_v42 = vld [vmem:[#allocation7 + $0x28] sm:$0xff]  }
 0x5aa   :  { %5454 = vmatmul.mubr.bf16.vlgmr.msra.gmra.mrb[32].mxu0 %v7368_v36  ;;  %v5871_v36 = vld [vmem:[#allocation7 + $0x30] sm:$0xff]  }
 0x5ab   :  { %5457 = vmatprep.mubr.bf16.mxu0 %v7382_v12  ;;  %5502 = vmatpush3.bf16.msra.mxu0 %v5865_v4 }
 0x5ac   :  { %5503 = vmatprep.subr.bf16.mxu0 %v5866_v52 }
 0x5af   :  { %5504 = vmatpush3.bf16.msra.mxu0 %v5866_v52 }
 0x5b0   :  { %5505 = vmatprep.subr.bf16.mxu0 %v5867_v3 }
 0x5b2   :  { %5458 = vmatmul.mubr.bf16.gmra.mrb[36].mxu0 %v7379_v14 }
 0x5b3   :  { %5461 = vmatprep.mubr.bf16.mxu0 %v7394_v31  ;;  %5506 = vmatpush3.bf16.msra.mxu0 %v5867_v3  ;;  %v5872_v31 = vld [vmem:[#allocation7 + $0x38] sm:$0xff]  }
 0x5b4   :  { %5507 = vmatprep.subr.bf16.mxu0 %v5868_v8 }
 0x5b7   :  { %5508 = vmatpush3.bf16.msra.mxu0 %v5868_v8 }
 0x5b8   :  { %5509 = vmatprep.subr.bf16.mxu0 %v5869_v23 }
 0x5ba   :  { %5462 = vmatmul.mubr.bf16.gmra.mrb[40].mxu0 %v7391_v25 }
 0x5bb   :  { %5465 = vmatprep.mubr.bf16.mxu0 %v7406_v27  ;;  %5510 = vmatpush3.bf16.msra.mxu0 %v5869_v23 }
 0x5bc   :  { %5511 = vmatprep.subr.bf16.mxu0 %v5870_v42 }
 0x5bd   :  { %v3160_v12 = vpop.f32.mrb[192].mxu0 }
 0x5be   :  { %v3162_v4 = vpop.f32.mrb[193].mxu0 }
 0x5bf   :  { %v3163_v49 = vpop.f32.mrb[194].mxu0  ;;  %5512 = vmatpush3.bf16.msra.mxu0 %v5870_v42 }
 0x5c0   :  { %v3165_v14 = vpop.f32.mrb[195].mxu0  ;;  %5513 = vmatprep.subr.bf16.mxu0 %v5871_v36 }
 0x5c2   :  { %5466 = vmatmul.mubr.bf16.gmra.mrb[44].mxu0 %v7403_v48 }
 0x5c3   :  { %5469 = vmatprep.mubr.bf16.mxu0 %v7418_v37  ;;  %5514 = vmatpush3.bf16.msra.mxu0 %v5871_v36 }
 0x5c4   :  { %5515 = vmatprep.subr.bf16.mxu0 %v5872_v31 }
 0x5c5   :  { %v3168_v6 = vpop.f32.mrb[196].mxu0 }
 0x5c6   :  { %v3170_v25 = vpop.f32.mrb[197].mxu0 }
 0x5c7   :  { %v3171_v34 = vpop.f32.mrb[198].mxu0  ;;  %5516 = vmatpush3.bf16.msra.mxu0 %v5872_v31 }
 0x5c8   :  { %v3173_v27 = vpop.f32.mrb[199].mxu0 }
 0x5ca   :  { %5470 = vmatmul.mubr.bf16.gmra.mrb[48].mxu0 %v7415_v29 }
 0x5cb   :  { %5473 = vmatprep.mubr.bf16.mxu0 %v7430_v39 }
 0x5cd   :  { %v3176_v61 = vpop.f32.mrb[200].mxu0 }
 0x5ce   :  { %v3178_v26 = vpop.f32.mrb[201].mxu0 }
 0x5cf   :  { %v7588_v55 = vpop.f32.mrb[202].mxu0 }
 0x5d0   :  { %v3181_v33 = vpop.f32.mrb[203].mxu0 }
 0x5d2   :  { %5474 = vmatmul.mubr.bf16.gmra.mrb[52].mxu0 %v7427_v51 }
 0x5d3   :  { %5477 = vmatprep.mubr.bf16.mxu0 %v7442_v43 }
 0x5d5   :  { %v3184_v48 = vpop.f32.mrb[204].mxu0 }
 0x5d6   :  { %v3186_v37 = vpop.f32.mrb[205].mxu0 }
 0x5d7   :  { %v3187_v63 = vpop.f32.mrb[206].mxu0 }
 0x5d8   :  { %v3189_v28 = vpop.f32.mrb[207].mxu0 }
 0x5da   :  { %5478 = vmatmul.mubr.bf16.gmra.mrb[56].mxu0 %v7439_v19 }
 0x5db   :  { %5481 = vmatprep.mubr.bf16.mxu0 %v7454_v24 }
 0x5dd   :  { %v7594_v29 = vpop.f32.mrb[208].mxu0 }
 0x5de   :  { %v3194_v39 = vpop.f32.mrb[209].mxu0 }
 0x5df   :  { %v7596_v53 = vpop.f32.mrb[210].mxu0  ;;  %v8289_v39 = vld [vmem:[#allocation75_spill] sm:$0xff] }
 0x5e0   :  { %v3197_v38 = vpop.f32.mrb[211].mxu0 }
 0x5e2   :  { %5482 = vmatmul.mubr.bf16.gmra.mrb[60].mxu0 %v7451_v15 }
 0x5e3   :  { %5485 = vmatprep.mubr.bf16.mxu0 %v7467_v41 }
 0x5e5   :  { %v3200_v51 = vpop.f32.mrb[212].mxu0 }
 0x5e6   :  { %v3202_v43 = vpop.f32.mrb[213].mxu0 }
 0x5e7   :  { %v3203_v52 = vpop.f32.mrb[214].mxu0 }
 0x5e8   :  { %v3205_v3 = vpop.f32.mrb[215].mxu0 }
 0x5ea   :  { %5486 = vmatmul.mubr.bf16.gmra.mrb[64].mxu0 %v7465_v50 }
 0x5eb   :  { %5489 = vmatprep.mubr.bf16.mxu0 %v7483_v20 }
 0x5ed   :  { %v7602_v19 = vpop.f32.mrb[216].mxu0 }
 0x5ee   :  { %v3210_v24 = vpop.f32.mrb[217].mxu0 }
 0x5ef   :  { %v7604_v8 = vpop.f32.mrb[218].mxu0 }
 0x5f0   :  { %v3213_v23 = vpop.f32.mrb[219].mxu0 }
 0x5f2   :  { %5490 = vmatmul.mubr.bf16.gmra.mrb[68].mxu0 %v7481_v60 }
 0x5f3   :  { %5493 = vmatprep.mubr.bf16.mxu0 %v7499_v47 }
 0x5f5   :  { %v7608_v15 = vpop.f32.mrb[220].mxu0 }
 0x5f6   :  { %v3218_v41 = vpop.f32.mrb[221].mxu0 }
 0x5f7   :  { %v7610_v42 = vpop.f32.mrb[222].mxu0 }
 0x5f8   :  { %v3221_v36 = vpop.f32.mrb[223].mxu0 }
 0x5fa   :  { %5494 = vmatmul.mubr.bf16.gmra.mrb[72].mxu0 %v7497_v54 }
 0x5fb   :  { %v5391_v50 = vpop.f32.mrb[192].mxu1  ;;  %5497 = vmatprep.mubr.bf16.mxu0 %v7515_v46  ;;  %v8290_v46 = vld [vmem:[#allocation76_spill] sm:$0xff] }
 0x5fc   :  { %v3394_v20 = vadd.f32 %v5391_v50, %v3168_v6  ;;  %v3385_v4 = vpop.f32.mrb[193].mxu1 }
 0x5fd   :  { %v3386_v14 = vadd.f32 %v3385_v4, %v3160_v12  ;;  %v5392_v31 = vpop.f32.mrb[194].mxu1  ;;  %v7614_v25 = vpop.f32.mrb[224].mxu0 }
 0x5fe   :  { %v3397_v60 = vadd.f32 %v5392_v31, %v3171_v34  ;;  %v3388_v27 = vpop.f32.mrb[195].mxu1  ;;  %v3226_v47 = vpop.f32.mrb[225].mxu0  ;;  %v3578_v37 = vmul.f32 %v3394_v20, %v8195_v40 }
 0x5ff   :  { %v3389_v26 = vadd.f32 %v3388_v27, %v3163_v49  ;;  %v7616_v33 = vpop.f32.mrb[226].mxu0  ;;  %v3576_v38 = vmul.f32 %v3386_v14, %v8289_v39  ;;  %v8292_v27 = vld [vmem:[#allocation80_spill] sm:$0xff] }
 0x600   :  { %v3579_v28 = vmul.f32 %v3397_v60, %v8196_v13  ;;  %v3229_v54 = vpop.f32.mrb[227].mxu0 }
 0x601   :  { %v3577_v6 = vmul.f32 %v3389_v26, %v8290_v46 }
 0x602   :  { %v3625_v43 = vpack.c.bf16 %v3579_v28, %v3578_v37  ;;  %5498 = vmatmul.mubr.bf16.gmra.mrb[76].mxu0 %v7513_v62  ;;  %v8291_v62 = vld [vmem:[#allocation79_spill] sm:$0xff] }
 0x603   :  { %v5395_v12 = vpop.f32.mrb[196].mxu1  ;;  %v3624_v3 = vpack.c.bf16 %v3577_v6, %v3576_v38 }
 0x604   :  { %v3410_v34 = vadd.f32 %v5395_v12, %v3184_v48  ;;  %v3401_v24 = vpop.f32.mrb[197].mxu1 }
 0x605   :  { %v3402_v23 = vadd.f32 %v3401_v24, %v3176_v61  ;;  %v5396_v49 = vpop.f32.mrb[198].mxu1  ;;  %5517 = vmatprep.mubr.bf16.mxu0 %v3624_v3  ;;  %v3232_v41 = vpop.f32.mrb[228].mxu0 }
 0x606   :  { %v3413_v36 = vadd.f32 %v5396_v49, %v3187_v63  ;;  %v3404_v40 = vpop.f32.mrb[199].mxu1  ;;  %v3234_v50 = vpop.f32.mrb[229].mxu0  ;;  %v3582_v4 = vmul.f32 %v3410_v34, %v8199_v57 }
 0x607   :  { %v3405_v13 = vadd.f32 %v3404_v40, %v7588_v55  ;;  %v3235_v20 = vpop.f32.mrb[230].mxu0  ;;  %v3580_v60 = vmul.f32 %v3402_v23, %v8291_v62 }
 0x608   :  { %v3583_v14 = vmul.f32 %v3413_v36, %v8200_v10  ;;  %v3237_v31 = vpop.f32.mrb[231].mxu0 }
 0x609   :  { %v3581_v48 = vmul.f32 %v3405_v13, %v8292_v27 }
 0x60a   :  { %v3627_v47 = vpack.c.bf16 %v3583_v14, %v3582_v4  ;;  %5518 = vmatmul.mubr.bf16.vlgmr.msra.gmra.mrb[32].mxu0 %v3625_v43 }
 0x60b   :  { %v5399_v61 = vpop.f32.mrb[200].mxu1  ;;  %v3626_v26 = vpack.c.bf16 %v3581_v48, %v3580_v60 }
 0x60c   :  { %v3426_v37 = vadd.f32 %v5399_v61, %v3200_v51  ;;  %v3417_v63 = vpop.f32.mrb[201].mxu1  ;;  %v8293_v51 = vld [vmem:[#allocation84_spill] sm:$0xff] }
 0x60d   :  { %v3418_v28 = vadd.f32 %v3417_v63, %v7594_v29  ;;  %v5400_v54 = vpop.f32.mrb[202].mxu1  ;;  %5521 = vmatprep.mubr.bf16.mxu0 %v3626_v26  ;;  %v3240_v55 = vpop.f32.mrb[232].mxu0 }
 0x60e   :  { %v3429_v39 = vadd.f32 %v5400_v54, %v3203_v52  ;;  %v3420_v57 = vpop.f32.mrb[203].mxu1  ;;  %v3242_v38 = vpop.f32.mrb[233].mxu0  ;;  %v3586_v6 = vmul.f32 %v3426_v37, %v8203_v45 }
 0x60f   :  { %v3421_v10 = vadd.f32 %v3420_v57, %v7596_v53  ;;  %v3243_v46 = vpop.f32.mrb[234].mxu0  ;;  %v3584_v3 = vmul.f32 %v3418_v28, %v8205_v5 }
 0x610   :  { %v3587_v12 = vmul.f32 %v3429_v39, %v8204_v58  ;;  %v3245_v43 = vpop.f32.mrb[235].mxu0 }
 0x611   :  { %v3585_v34 = vmul.f32 %v3421_v10, %v8293_v51 }
 0x612   :  { %v3629_v24 = vpack.c.bf16 %v3587_v12, %v3586_v6  ;;  %5522 = vmatmul.mubr.bf16.gmra.mrb[36].mxu0 %v3627_v47 }
 0x613   :  { %v5403_v29 = vpop.f32.mrb[204].mxu1  ;;  %v3628_v23 = vpack.c.bf16 %v3585_v34, %v3584_v3 }
 0x614   :  { %v3442_v52 = vadd.f32 %v5403_v29, %v7608_v15  ;;  %v3433_v49 = vpop.f32.mrb[205].mxu1 }
 0x615   :  { %v3434_v36 = vadd.f32 %v3433_v49, %v7602_v19  ;;  %v5404_v53 = vpop.f32.mrb[206].mxu1  ;;  %5525 = vmatprep.mubr.bf16.mxu0 %v3628_v23  ;;  %v3248_v40 = vpop.f32.mrb[236].mxu0 }
 0x616   :  { %v3445_v45 = vadd.f32 %v5404_v53, %v7610_v42  ;;  %v3436_v58 = vpop.f32.mrb[207].mxu1  ;;  %v3250_v50 = vpop.f32.mrb[237].mxu0  ;;  %v3590_v4 = vmul.f32 %v3442_v52, %v8207_v18 }
 0x617   :  { %v3437_v5 = vadd.f32 %v3436_v58, %v7604_v8  ;;  %v3251_v13 = vpop.f32.mrb[238].mxu0  ;;  %v3588_v15 = vmul.f32 %v3434_v36, %v8209_v17 }
 0x618   :  { %v3591_v14 = vmul.f32 %v3445_v45, %v8208_v21  ;;  %v3253_v31 = vpop.f32.mrb[239].mxu0 }
 0x619   :  { %v3589_v62 = vmul.f32 %v3437_v5, %v8210_v22 }
 0x61a   :  { %v3631_v19 = vpack.c.bf16 %v3591_v14, %v3590_v4  ;;  %5526 = vmatmul.mubr.bf16.gmra.mrb[40].mxu0 %v3629_v24 }
 0x61b   :  { %v5407_v60 = vpop.f32.mrb[208].mxu1  ;;  %v3630_v27 = vpack.c.bf16 %v3589_v62, %v3588_v15 }
 0x61c   :  { %v3458_v48 = vadd.f32 %v5407_v60, %v3232_v41  ;;  %v3449_v42 = vpop.f32.mrb[209].mxu1 }
 0x61d   :  { %v3450_v47 = vadd.f32 %v3449_v42, %v7614_v25  ;;  %v5408_v61 = vpop.f32.mrb[210].mxu1  ;;  %5529 = vmatprep.mubr.bf16.mxu0 %v3630_v27  ;;  %v3256_v8 = vpop.f32.mrb[240].mxu0 }
 0x61e   :  { %v3461_v26 = vadd.f32 %v5408_v61, %v3235_v20  ;;  %v3452_v18 = vpop.f32.mrb[211].mxu1  ;;  %v3258_v37 = vpop.f32.mrb[241].mxu0  ;;  %v3594_v17 = vmul.f32 %v3458_v48, %v6914_v44 }
 0x61f   :  { %v3453_v21 = vadd.f32 %v3452_v18, %v7616_v33  ;;  %v3259_v63 = vpop.f32.mrb[242].mxu0  ;;  %v3592_v54 = vmul.f32 %v3450_v47, %v8211_v16  ;;  %v8296_v37 = vld [vmem:[#allocation94_spill] sm:$0xff] }
 0x620   :  { %v3595_v22 = vmul.f32 %v3461_v26, %v6916_v11  ;;  %v3261_v28 = vpop.f32.mrb[243].mxu0  ;;  %v8295_v26 = vld [vmem:[#allocation93_spill] sm:$0xff] }
 0x621   :  { %v3593_v41 = vmul.f32 %v3453_v21, %v6906_v30 }
 0x622   :  { %v3633_v39 = vpack.c.bf16 %v3595_v22, %v3594_v17  ;;  %5530 = vmatmul.mubr.bf16.gmra.mrb[44].mxu0 %v3631_v19 }
 0x623   :  { %v5411_v25 = vpop.f32.mrb[212].mxu1  ;;  %v3632_v57 = vpack.c.bf16 %v3593_v41, %v3592_v54 }
 0x624   :  { %v3474_v38 = vadd.f32 %v5411_v25, %v3248_v40  ;;  %v3465_v20 = vpop.f32.mrb[213].mxu1 }
 0x625   :  { %v3466_v10 = vadd.f32 %v3465_v20, %v3240_v55  ;;  %v5412_v6 = vpop.f32.mrb[214].mxu1  ;;  %5533 = vmatprep.mubr.bf16.mxu0 %v3632_v57  ;;  %v3264_v33 = vpop.f32.mrb[244].mxu0 }
 0x626   :  { %v3477_v12 = vadd.f32 %v5412_v6, %v3251_v13  ;;  %v3468_v43 = vpop.f32.mrb[215].mxu1  ;;  %v3266_v44 = vpop.f32.mrb[245].mxu0  ;;  %v3598_v51 = vmul.f32 %v3474_v38, %v6930_v7 }
 0x627   :  { %v3469_v3 = vadd.f32 %v3468_v43, %v3243_v46  ;;  %v3267_v11 = vpop.f32.mrb[246].mxu0  ;;  %v3596_v34 = vmul.f32 %v3466_v10, %v6922_v0  ;;  %v8297_v10 = vld [vmem:[#allocation95_spill] sm:$0xff] }
 0x628   :  { %v3599_v16 = vmul.f32 %v3477_v12, %v6932_v1  ;;  %v3269_v30 = vpop.f32.mrb[247].mxu0 }
 0x629   :  { %v3597_v24 = vmul.f32 %v3469_v3, %v6924_v9 }
 0x62a   :  { %v3635_v29 = vpack.c.bf16 %v3599_v16, %v3598_v51  ;;  %5534 = vmatmul.mubr.bf16.gmra.mrb[48].mxu0 %v3633_v39 }
 0x62b   :  { %v5415_v55 = vpop.f32.mrb[216].mxu1  ;;  %v3634_v23 = vpack.c.bf16 %v3597_v24, %v3596_v34 }
 0x62c   :  { %v3490_v52 = vadd.f32 %v5415_v55, %v3264_v33  ;;  %v3481_v49 = vpop.f32.mrb[217].mxu1  ;;  %v8298_v33 = vld [vmem:[#allocation96_spill] sm:$0xff] }
 0x62d   :  { %v3482_v36 = vadd.f32 %v3481_v49, %v3256_v8  ;;  %v5416_v53 = vpop.f32.mrb[218].mxu1  ;;  %5537 = vmatprep.mubr.bf16.mxu0 %v3634_v23  ;;  %v3272_v46 = vpop.f32.mrb[248].mxu0  ;;  %v8294_v8 = vld [vmem:[#allocation92_spill] sm:$0xff]  ;;  %v8299_v23 = vld [vmem:[#allocation97_spill] sm:$0xff]  ;;  %v8300_v49 = vld [vmem:[#allocation98_spill] sm:$0xff] }
 0x62e   :  { %v3493_v40 = vadd.f32 %v5416_v53, %v3267_v11  ;;  %v3484_v45 = vpop.f32.mrb[219].mxu1  ;;  %v3274_v7 = vpop.f32.mrb[249].mxu0  ;;  %v3602_v50 = vmul.f32 %v3490_v52, %v6946_v59 }
 0x62f   :  { %v3485_v58 = vadd.f32 %v3484_v45, %v3259_v63  ;;  %v3275_v1 = vpop.f32.mrb[250].mxu0  ;;  %v3600_v5 = vmul.f32 %v3482_v36, %v6938_v35 }
 0x630   :  { %v3603_v0 = vmul.f32 %v3493_v40, %v6948_v2  ;;  %v3277_v9 = vpop.f32.mrb[251].mxu0 }
 0x631   :  { %v3601_v13 = vmul.f32 %v3485_v58, %v6940_v56 }
 0x632   :  { %v3637_v4 = vpack.c.bf16 %v3603_v0, %v3602_v50  ;;  %5538 = vmatmul.mubr.bf16.gmra.mrb[52].mxu0 %v3635_v29 }
 0x633   :  { %v5419_v14 = vpop.f32.mrb[220].mxu1  ;;  %v3636_v31 = vpack.c.bf16 %v3601_v13, %v3600_v5  ;;  %v8301_v13 = vld [vmem:[#allocation99_spill] sm:$0xff] }
 0x634   :  { %v3497_v15 = vpop.f32.mrb[221].mxu1 }
 0x635   :  { %v3498_v62 = vadd.f32 %v3497_v15, %v3272_v46  ;;  %v3280_v19 = vpop.f32.mrb[252].mxu0  ;;  %v5420_v60 = vpop.f32.mrb[222].mxu1  ;;  %5541 = vmatprep.mubr.bf16.mxu0 %v3636_v31 }
 0x636   :  { %v3506_v27 = vadd.f32 %v5419_v14, %v3280_v19  ;;  %v3282_v48 = vpop.f32.mrb[253].mxu0  ;;  %v3500_v42 = vpop.f32.mrb[223].mxu1  ;;  %v8302_v14 = vld [vmem:[#allocation100_spill] sm:$0xff] }
 0x637   :  { %v3501_v59 = vadd.f32 %v3500_v42, %v3275_v1  ;;  %v3283_v47 = vpop.f32.mrb[254].mxu0  ;;  %v3604_v35 = vmul.f32 %v3498_v62, %v6954_v32 }
 0x638   :  { %v3509_v2 = vadd.f32 %v5420_v60, %v3283_v47  ;;  %v3285_v61 = vpop.f32.mrb[255].mxu0  ;;  %v3606_v18 = vmul.f32 %v3506_v27, %v8295_v26 }
 0x639   :  { %v3605_v56 = vmul.f32 %v3501_v59, %v8294_v8 }
 0x63a   :  { %v3607_v21 = vmul.f32 %v3509_v2, %v8296_v37  ;;  %5542 = vmatmul.mubr.bf16.gmra.mrb[56].mxu0 %v3637_v4 }
 0x63b   :  { %v5423_v63 = vpop.f32.mrb[224].mxu1  ;;  %v3638_v17 = vpack.c.bf16 %v3605_v56, %v3604_v35  ;;  %v8303_v35 = vld [vmem:[#allocation101_spill] sm:$0xff]  ;;  %v8304_v56 = vld [vmem:[#allocation102_spill] sm:$0xff] }
 0x63c   :  { %v3639_v22 = vpack.c.bf16 %v3607_v21, %v3606_v18  ;;  %v3513_v28 = vpop.f32.mrb[225].mxu1 }
 0x63d   :  { %v3288_v54 = vpop.f32.mrb[0].mxu0  ;;  %5545 = vmatprep.mubr.bf16.mxu0 %v3638_v17  ;;  %v5424_v41 = vpop.f32.mrb[226].mxu1 }
 0x63e   :  { %v3514_v39 = vadd.f32 %v3513_v28, %v3288_v54  ;;  %v3290_v25 = vpop.f32.mrb[1].mxu0  ;;  %v3516_v57 = vpop.f32.mrb[227].mxu1  ;;  %v8305_v54 = vld [vmem:[#allocation103_spill] sm:$0xff] }
 0x63f   :  { %v3291_v38 = vpop.f32.mrb[2].mxu0 }
 0x640   :  { %v3517_v20 = vadd.f32 %v3516_v57, %v3291_v38  ;;  %v3293_v32 = vpop.f32.mrb[3].mxu0  ;;  %v3608_v6 = vmul.f32 %v3514_v39, %v8297_v10  ;;  %v8306_v39 = vld [vmem:[#allocation104_spill] sm:$0xff] }
 0x642   :  { %v3609_v12 = vmul.f32 %v3517_v20, %v8298_v33  ;;  %5546 = vmatmul.mubr.bf16.gmra.mrb[60].mxu0 %v3639_v22 }
 0x643   :  { %v5427_v43 = vpop.f32.mrb[228].mxu1 }
 0x644   :  { %v3640_v44 = vpack.c.bf16 %v3609_v12, %v3608_v6  ;;  %v3529_v3 = vpop.f32.mrb[229].mxu1  ;;  %v8307_v12 = vld [vmem:[#allocation105_spill] sm:$0xff] }
 0x645   :  { %v3296_v11 = vpop.f32.mrb[4].mxu0  ;;  %v5428_v51 = vpop.f32.mrb[230].mxu1 }
 0x646   :  { %v3522_v16 = vadd.f32 %v5423_v63, %v3296_v11  ;;  %v3298_v30 = vpop.f32.mrb[5].mxu0  ;;  %5549 = vmatprep.mubr.bf16.mxu0 %v3640_v44  ;;  %v3532_v34 = vpop.f32.mrb[231].mxu1  ;;  %v8308_v44 = vld [vmem:[#allocation106_spill] sm:$0xff] }
 0x647   :  { %v3299_v24 = vpop.f32.mrb[6].mxu0 }
 0x648   :  { %v3525_v29 = vadd.f32 %v5424_v41, %v3299_v24  ;;  %v3301_v55 = vpop.f32.mrb[7].mxu0  ;;  %v3610_v52 = vmul.f32 %v3522_v16, %v8299_v23 }
 0x649   :  { %v8309_v55 = vld [vmem:[#allocation107_spill] sm:$0xff] }
 0x64a   :  { %v3611_v36 = vmul.f32 %v3525_v29, %v8300_v49 }
 0x64b   :  { %v5431_v53 = vpop.f32.mrb[232].mxu1 }
 0x64c   :  { %v3641_v46 = vpack.c.bf16 %v3611_v36, %v3610_v52  ;;  %v3545_v40 = vpop.f32.mrb[233].mxu1  ;;  %v8310_v52 = vld [vmem:[#allocation108_spill] sm:$0xff] }
 0x64d   :  { %v3304_v45 = vpop.f32.mrb[8].mxu0  ;;  %v5432_v7 = vpop.f32.mrb[234].mxu1 }
 0x64e   :  { %v3530_v58 = vadd.f32 %v3529_v3, %v3304_v45  ;;  %v3306_v1 = vpop.f32.mrb[9].mxu0  ;;  %5550 = vmatmul.mubr.bf16.gmra.mrb[64].mxu0 %v3641_v46  ;;  %v3548_v50 = vpop.f32.mrb[235].mxu1 }
 0x64f   :  { %v3307_v0 = vpop.f32.mrb[10].mxu0  ;;  %v8311_v1 = vld [vmem:[#allocation109_spill] sm:$0xff] }
 0x650   :  { %v3533_v9 = vadd.f32 %v3532_v34, %v3307_v0  ;;  %v3309_v5 = vpop.f32.mrb[11].mxu0  ;;  %v3612_v4 = vmul.f32 %v3530_v58, %v8301_v13  ;;  %v8312_v0 = vld [vmem:[#allocation110_spill] sm:$0xff]  ;;  %v5978_v13 = vmov 1983009808  }
 0x652   :  { %v3613_v31 = vmul.f32 %v3533_v9, %v8302_v14  ;;  %v4359_v14 = vlaneseq }
 0x653   :  { %v5435_v15 = vpop.f32.mrb[236].mxu1 }
 0x654   :  { %v3642_v62 = vpack.c.bf16 %v3613_v31, %v3612_v4  ;;  %v3561_v19 = vpop.f32.mrb[237].mxu1  ;;  %v4357_v4 = vunpack.c.l.s4 %v5978_v13 }
 0x655   :  { %v3312_v60 = vpop.f32.mrb[12].mxu0  ;;  %v5436_v27 = vpop.f32.mrb[238].mxu1 }
 0x656   :  { %v3538_v48 = vadd.f32 %v5427_v43, %v3312_v60  ;;  %v3314_v42 = vpop.f32.mrb[13].mxu0  ;;  %5553 = vmatprep.mubr.bf16.mxu0 %v3642_v62  ;;  %v3564_v59 = vpop.f32.mrb[239].mxu1  ;;  %v4358_v31 = vunpack.c.0.s8 %v4357_v4  ;;  %v4360_v62 = vshrl.u32 %v4359_v14, 7 }
 0x657   :  { %v3315_v47 = vpop.f32.mrb[14].mxu0 }
 0x658   :  { %v3541_v2 = vadd.f32 %v5428_v51, %v3315_v47  ;;  %v3317_v61 = vpop.f32.mrb[15].mxu0  ;;  %v3614_v8 = vmul.f32 %v3538_v48, %v8303_v35  ;;  %v7686_v48 = vld [vmem:[%s7850_s8] ss:$0 sm:$0xff] }
 0x65a   :  { %v3615_v26 = vmul.f32 %v3541_v2, %v8304_v56 }
 0x65c   :  { %v3643_v18 = vpack.c.bf16 %v3615_v26, %v3614_v8 }
 0x65d   :  { %v3320_v37 = vpop.f32.mrb[16].mxu0 }
 0x65e   :  { %v3546_v21 = vadd.f32 %v3545_v40, %v3320_v37  ;;  %v3322_v63 = vpop.f32.mrb[17].mxu0  ;;  %5554 = vmatmul.mubr.bf16.gmra.mrb[68].mxu0 %v3643_v18 }
 0x65f   :  { %v3323_v17 = vpop.f32.mrb[18].mxu0 }
 0x660   :  { %v3549_v22 = vadd.f32 %v3548_v50, %v3323_v17  ;;  %v3325_v28 = vpop.f32.mrb[19].mxu0  ;;  %v3616_v41 = vmul.f32 %v3546_v21, %v8305_v54 }
 0x662   :  { %v3617_v25 = vmul.f32 %v3549_v22, %v8306_v39 }
 0x664   :  { %v3644_v57 = vpack.c.bf16 %v3617_v25, %v3616_v41 }
 0x665   :  { %v3328_v38 = vpop.f32.mrb[20].mxu0 }
 0x666   :  { %v3554_v20 = vadd.f32 %v5431_v53, %v3328_v38  ;;  %v3330_v32 = vpop.f32.mrb[21].mxu0  ;;  %5557 = vmatprep.mubr.bf16.mxu0 %v3644_v57 }
 0x667   :  { %v3331_v10 = vpop.f32.mrb[22].mxu0 }
 0x668   :  { %v3557_v6 = vadd.f32 %v5432_v7, %v3331_v10  ;;  %v3333_v33 = vpop.f32.mrb[23].mxu0  ;;  %v3618_v43 = vmul.f32 %v3554_v20, %v8307_v12 }
 0x66a   :  { %v3619_v3 = vmul.f32 %v3557_v6, %v8308_v44 }
 0x66c   :  { %v3645_v11 = vpack.c.bf16 %v3619_v3, %v3618_v43 }
 0x66d   :  { %v3336_v51 = vpop.f32.mrb[24].mxu0 }
 0x66e   :  { %v3562_v16 = vadd.f32 %v3561_v19, %v3336_v51  ;;  %v3338_v30 = vpop.f32.mrb[25].mxu0  ;;  %5558 = vmatmul.mubr.bf16.gmra.mrb[72].mxu0 %v3645_v11  ;;  %v4361_v19 = vsub.s32 %v4358_v31, %v4360_v62 }
 0x66f   :  { %v3339_v34 = vpop.f32.mrb[26].mxu0 }
 0x670   :  { %v3565_v24 = vadd.f32 %v3564_v59, %v3339_v34  ;;  %v3341_v29 = vpop.f32.mrb[27].mxu0  ;;  %v3620_v23 = vmul.f32 %v3562_v16, %v8309_v55 }
 0x672   :  { %v3621_v49 = vmul.f32 %v3565_v24, %v8310_v52 }
 0x674   :  { %v3646_v36 = vpack.c.bf16 %v3621_v49, %v3620_v23 }
 0x675   :  { %v3344_v53 = vpop.f32.mrb[28].mxu0 }
 0x676   :  { %v3570_v46 = vadd.f32 %v5435_v15, %v3344_v53  ;;  %v3346_v40 = vpop.f32.mrb[29].mxu0  ;;  %5561 = vmatprep.mubr.bf16.mxu0 %v3646_v36  ;;  %v4353_v15 = vld [vmem:[%s7851_s9] sm:$0x3f] }
 0x677   :  { %v3347_v45 = vpop.f32.mrb[30].mxu0  ;;  %v7679_v60 = vrot.slane %v4353_v15, %v4361_v19  ;;  %v4355_v42 = vcombine.high %v4353_v15, %v4353_v15 }
 0x678   :  { %v3573_v7 = vadd.f32 %v5436_v27, %v3347_v45  ;;  %v3349_v58 = vpop.f32.mrb[31].mxu0  ;;  %v3622_v50 = vmul.f32 %v3570_v46, %v8311_v1 }
 0x679   :  { %v4370_v27 = vcombine.high %v7679_v60, %v7679_v60  ;;  %v7690_v8 = vrot.slane %v4355_v42, %v4361_v19 }
 0x67a   :  { %v3623_v9 = vmul.f32 %v3573_v7, %v8312_v0 }
 0x67b   :  { %4406 = vmatprep.mubr.bf16.mxu1 %v4370_v27 }
 0x67c   :  { %v3647_v5 = vpack.c.bf16 %v3623_v9, %v3622_v50 }
 0x67e   :  { %5562 = vmatmul.mubr.bf16.gmra.mrb[76].mxu0 %v3647_v5 }
 0x6dd   :  { %v5519_v59 = vpop.f32.mrb[32].mxu0 }
 0x6de   :  { %v4235_v47 = vadd.f32 %v5519_v59, %v7686_v48  ;;  %v4035_v2 = vpop.f32.mrb[33].mxu0 }
 0x6df   :  { %v4233_v61 = vadd.f32 %v7686_v48, %v4035_v2  ;;  %v5520_v35 = vpop.f32.mrb[34].mxu0 }
 0x6e0   :  { %v4236_v56 = vadd.f32 %v5520_v35, %v7686_v48  ;;  %v4038_v26 = vpop.f32.mrb[35].mxu0  ;;  %v4283_v37 = vmax.f32 %v4235_v47, 0.0 }
 0x6e1   :  { %v4234_v18 = vadd.f32 %v7686_v48, %v4038_v26  ;;  %v4281_v63 = vmax.f32 %v4233_v61, 0.0 }
 0x6e2   :  { %v4284_v21 = vmax.f32 %v4236_v56, 0.0 }
 0x6e3   :  { %v4282_v17 = vmax.f32 %v4234_v18, 0.0 }
 0x6e4   :  { %v7694_v22 = vpack.c.bf16 %v4284_v21, %v4283_v37 }
 0x6e5   :  { %v7696_v28 = vpack.c.bf16 %v4282_v17, %v4281_v63  ;;  %v5523_v54 = vpop.f32.mrb[36].mxu0 }
 0x6e6   :  { %v4239_v41 = vadd.f32 %v5523_v54, %v7686_v48  ;;  %v4051_v39 = vpop.f32.mrb[37].mxu0 }
 0x6e7   :  { %v4237_v25 = vadd.f32 %v7686_v48, %v4051_v39  ;;  %v5524_v57 = vpop.f32.mrb[38].mxu0 }
 0x6e8   :  { %v4240_v38 = vadd.f32 %v5524_v57, %v7686_v48  ;;  %v4054_v20 = vpop.f32.mrb[39].mxu0  ;;  %v4287_v10 = vmax.f32 %v4239_v41, 0.0 }
 0x6e9   :  { %v4238_v32 = vadd.f32 %v7686_v48, %v4054_v20  ;;  %v4285_v33 = vmax.f32 %v4237_v25, 0.0 }
 0x6ea   :  { %v4288_v6 = vmax.f32 %v4240_v38, 0.0 }
 0x6eb   :  { %v4286_v12 = vmax.f32 %v4238_v32, 0.0 }
 0x6ec   :  { %v7702_v43 = vpack.c.bf16 %v4288_v6, %v4287_v10 }
 0x6ed   :  { %v7704_v44 = vpack.c.bf16 %v4286_v12, %v4285_v33  ;;  %v5527_v3 = vpop.f32.mrb[40].mxu0 }
 0x6ee   :  { %v4243_v11 = vadd.f32 %v5527_v3, %v7686_v48  ;;  %v4067_v51 = vpop.f32.mrb[41].mxu0 }
 0x6ef   :  { %v4241_v16 = vadd.f32 %v7686_v48, %v4067_v51  ;;  %v5528_v30 = vpop.f32.mrb[42].mxu0 }
 0x6f0   :  { %v4244_v34 = vadd.f32 %v5528_v30, %v7686_v48  ;;  %v4070_v24 = vpop.f32.mrb[43].mxu0  ;;  %v4291_v55 = vmax.f32 %v4243_v11, 0.0 }
 0x6f1   :  { %v4242_v29 = vadd.f32 %v7686_v48, %v4070_v24  ;;  %v4289_v52 = vmax.f32 %v4241_v16, 0.0 }
 0x6f2   :  { %v4292_v23 = vmax.f32 %v4244_v34, 0.0 }
 0x6f3   :  { %v4290_v49 = vmax.f32 %v4242_v29, 0.0 }
 0x6f4   :  { %v7710_v36 = vpack.c.bf16 %v4292_v23, %v4291_v55 }
 0x6f5   :  { %v7712_v53 = vpack.c.bf16 %v4290_v49, %v4289_v52  ;;  %v5531_v46 = vpop.f32.mrb[44].mxu0 }
 0x6f6   :  { %v4247_v40 = vadd.f32 %v5531_v46, %v7686_v48  ;;  %v4083_v45 = vpop.f32.mrb[45].mxu0 }
 0x6f7   :  { %v4245_v7 = vadd.f32 %v7686_v48, %v4083_v45  ;;  %v5532_v58 = vpop.f32.mrb[46].mxu0 }
 0x6f8   :  { %v4248_v1 = vadd.f32 %v5532_v58, %v7686_v48  ;;  %v4086_v50 = vpop.f32.mrb[47].mxu0  ;;  %v4295_v9 = vmax.f32 %v4247_v40, 0.0 }
 0x6f9   :  { %v4246_v0 = vadd.f32 %v7686_v48, %v4086_v50  ;;  %v4293_v13 = vmax.f32 %v4245_v7, 0.0 }
 0x6fa   :  { %v4296_v5 = vmax.f32 %v4248_v1, 0.0 }
 0x6fb   :  { %v4294_v4 = vmax.f32 %v4246_v0, 0.0 }
 0x6fc   :  { %v7718_v14 = vpack.c.bf16 %v4296_v5, %v4295_v9 }
 0x6fd   :  { %v7720_v31 = vpack.c.bf16 %v4294_v4, %v4293_v13  ;;  %v5535_v62 = vpop.f32.mrb[48].mxu0 }
 0x6fe   :  { %v4251_v19 = vadd.f32 %v5535_v62, %v7686_v48  ;;  %v4099_v15 = vpop.f32.mrb[49].mxu0 }
 0x6ff   :  { %v4249_v27 = vadd.f32 %v7686_v48, %v4099_v15  ;;  %v5536_v42 = vpop.f32.mrb[50].mxu0 }
 0x700   :  { %v4252_v59 = vadd.f32 %v5536_v42, %v7686_v48  ;;  %v4102_v47 = vpop.f32.mrb[51].mxu0  ;;  %v4299_v61 = vmax.f32 %v4251_v19, 0.0 }
 0x701   :  { %v4250_v2 = vadd.f32 %v7686_v48, %v4102_v47  ;;  %v4297_v56 = vmax.f32 %v4249_v27, 0.0 }
 0x702   :  { %v4300_v35 = vmax.f32 %v4252_v59, 0.0 }
 0x703   :  { %v4298_v26 = vmax.f32 %v4250_v2, 0.0 }
 0x704   :  { %v4338_v18 = vpack.c.bf16 %v4300_v35, %v4299_v61 }
 0x705   :  { %v4337_v37 = vpack.c.bf16 %v4298_v26, %v4297_v56  ;;  %v5539_v21 = vpop.f32.mrb[52].mxu0 }
 0x706   :  { %v4255_v63 = vadd.f32 %v5539_v21, %v7686_v48  ;;  %v4115_v17 = vpop.f32.mrb[53].mxu0 }
 0x707   :  { %v4253_v54 = vadd.f32 %v7686_v48, %v4115_v17  ;;  %v5540_v41 = vpop.f32.mrb[54].mxu0  ;;  %4941 = vmatprep.subr.bf16.mxu1 %v4337_v37 }
 0x708   :  { %v4256_v39 = vadd.f32 %v5540_v41, %v7686_v48  ;;  %v4118_v25 = vpop.f32.mrb[55].mxu0  ;;  %4942 = vmatpush3.bf16.msra.mxu1 %v7696_v28  ;;  %v4303_v38 = vmax.f32 %v4255_v63, 0.0 }
 0x709   :  { %v4254_v57 = vadd.f32 %v7686_v48, %v4118_v25  ;;  %4943 = vmatprep.subr.bf16.mxu1 %v4338_v18  ;;  %v4301_v32 = vmax.f32 %v4253_v54, 0.0 }
 0x70a   :  { %v4304_v20 = vmax.f32 %v4256_v39, 0.0 }
 0x70b   :  { %v4302_v10 = vmax.f32 %v4254_v57, 0.0 }
 0x70c   :  { %v4340_v6 = vpack.c.bf16 %v4304_v20, %v4303_v38  ;;  %4944 = vmatpush3.bf16.msra.mxu1 %v7694_v22 }
 0x70d   :  { %v4339_v33 = vpack.c.bf16 %v4302_v10, %v4301_v32  ;;  %v5543_v12 = vpop.f32.mrb[56].mxu0 }
 0x70e   :  { %v4259_v3 = vadd.f32 %v5543_v12, %v7686_v48  ;;  %v4131_v11 = vpop.f32.mrb[57].mxu0 }
 0x70f   :  { %v4257_v51 = vadd.f32 %v7686_v48, %v4131_v11  ;;  %v5544_v16 = vpop.f32.mrb[58].mxu0  ;;  %4945 = vmatprep.subr.bf16.mxu1 %v4339_v33 }
 0x710   :  { %v4260_v28 = vadd.f32 %v5544_v16, %v7686_v48  ;;  %v4134_v30 = vpop.f32.mrb[59].mxu0  ;;  %4946 = vmatpush3.bf16.msra.mxu1 %v7704_v44  ;;  %v4307_v24 = vmax.f32 %v4259_v3, 0.0 }
 0x711   :  { %v4258_v34 = vadd.f32 %v7686_v48, %v4134_v30  ;;  %4947 = vmatprep.subr.bf16.mxu1 %v4340_v6  ;;  %v4305_v22 = vmax.f32 %v4257_v51, 0.0 }
 0x712   :  { %v4308_v29 = vmax.f32 %v4260_v28, 0.0 }
 0x713   :  { %v4306_v55 = vmax.f32 %v4258_v34, 0.0 }
 0x714   :  { %v4342_v23 = vpack.c.bf16 %v4308_v29, %v4307_v24  ;;  %4948 = vmatpush3.bf16.msra.mxu1 %v7702_v43 }
 0x715   :  { %v4341_v52 = vpack.c.bf16 %v4306_v55, %v4305_v22  ;;  %v5547_v49 = vpop.f32.mrb[60].mxu0 }
 0x716   :  { %v4263_v46 = vadd.f32 %v5547_v49, %v7686_v48  ;;  %v4147_v40 = vpop.f32.mrb[61].mxu0 }
 0x717   :  { %v4261_v45 = vadd.f32 %v7686_v48, %v4147_v40  ;;  %v5548_v7 = vpop.f32.mrb[62].mxu0  ;;  %4949 = vmatprep.subr.bf16.mxu1 %v4341_v52 }
 0x718   :  { %v4264_v44 = vadd.f32 %v5548_v7, %v7686_v48  ;;  %v4150_v58 = vpop.f32.mrb[63].mxu0  ;;  %4950 = vmatpush3.bf16.msra.mxu1 %v7712_v53  ;;  %v4311_v50 = vmax.f32 %v4263_v46, 0.0 }
 0x719   :  { %v4262_v1 = vadd.f32 %v7686_v48, %v4150_v58  ;;  %4951 = vmatprep.subr.bf16.mxu1 %v4342_v23  ;;  %v4309_v43 = vmax.f32 %v4261_v45, 0.0 }
 0x71a   :  { %v4312_v0 = vmax.f32 %v4264_v44, 0.0 }
 0x71b   :  { %v4310_v9 = vmax.f32 %v4262_v1, 0.0 }
 0x71c   :  { %v4344_v5 = vpack.c.bf16 %v4312_v0, %v4311_v50  ;;  %4952 = vmatpush3.bf16.msra.mxu1 %v7710_v36  ;;  %v5979_v36 = vmov 0.0   ;;  %v4454_v0 = vld [vmem:[%s7852_s10] sm:$0xff] }
 0x71d   :  { %v4343_v13 = vpack.c.bf16 %v4310_v9, %v4309_v43  ;;  %v4455_v43 = vld [vmem:[%s7852_s10 + $0x8] sm:$0xff] }
 0x71e   :  { %v5621_v9 = vpack.c.bf16 %v4455_v43, %v4454_v0 }
 0x71f   :  { %4953 = vmatprep.subr.bf16.mxu1 %v4343_v13  ;;  %v4457_v13 = vld [vmem:[%s7852_s10 + $0x18] sm:$0xff] }
 0x720   :  { %4954 = vmatpush3.bf16.msra.mxu1 %v7720_v31 }
 0x721   :  { %v5551_v4 = vpop.f32.mrb[64].mxu0  ;;  %4955 = vmatprep.subr.bf16.mxu1 %v4344_v5  ;;  %v4456_v5 = vld [vmem:[%s7852_s10 + $0x10] sm:$0xff] }
 0x722   :  { %v4267_v62 = vadd.f32 %v5551_v4, %v7686_v48  ;;  %v4163_v19 = vpop.f32.mrb[65].mxu0  ;;  %v5624_v4 = vpack.c.bf16 %v4457_v13, %v4456_v5 }
 0x723   :  { %v4265_v53 = vadd.f32 %v7686_v48, %v4163_v19  ;;  %v5552_v15 = vpop.f32.mrb[66].mxu0  ;;  %v4459_v19 = vld [vmem:[%s7852_s10 + $0x28] sm:$0xff] }
 0x724   :  { %v4268_v27 = vadd.f32 %v5552_v15, %v7686_v48  ;;  %v4166_v42 = vpop.f32.mrb[67].mxu0  ;;  %4956 = vmatpush3.bf16.msra.mxu1 %v7718_v14  ;;  %v4315_v47 = vmax.f32 %v4267_v62, 0.0  ;;  %v4458_v62 = vld [vmem:[%s7852_s10 + $0x20] sm:$0xff]  ;;  %v4461_v15 = vld [vmem:[%s7852_s10 + $0x38] sm:$0xff] }
 0x725   :  { %v4266_v59 = vadd.f32 %v7686_v48, %v4166_v42  ;;  %5565 = vmatprep.subr.bf16.mxu1 %v5979_v36  ;;  %v4313_v2 = vmax.f32 %v4265_v53, 0.0  ;;  %v5627_v53 = vpack.c.bf16 %v4459_v19, %v4458_v62  ;;  %v4462_v42 = vld [vmem:[%s7852_s10 + $0x40] sm:$0xff] }
 0x726   :  { %v4316_v31 = vmax.f32 %v4268_v27, 0.0 }
 0x727   :  { %v4314_v61 = vmax.f32 %v4266_v59, 0.0  ;;  %4407 = vmatmul.mubr.bf16.vlgmr.msra.gmra.mrb[240].mxu1 %v7679_v60  ;;  %v4463_v59 = vld [vmem:[%s7852_s10 + $0x48] sm:$0xff] }
 0x728   :  { %v4346_v35 = vpack.c.bf16 %v4316_v31, %v4315_v47  ;;  %5581 = vmatprep.mubr.msk.bf16.mxu1 %vm5980_vm0, %v5979_v36  ;;  %v4464_v47 = vld [vmem:[%s7852_s10 + $0x50] sm:$0xff]  ;;  %v4465_v31 = vld [vmem:[%s7852_s10 + $0x58] sm:$0xff] }
 0x729   :  { %v4345_v56 = vpack.c.bf16 %v4314_v61, %v4313_v2  ;;  %v5636_v2 = vpack.c.bf16 %v4465_v31, %v4464_v47  ;;  %v4466_v61 = vld [vmem:[%s7852_s10 + $0x60] sm:$0xff] }
 0x72b   :  { %5566 = vmatpush3.bf16.msra.mxu1 %v4345_v56 }
 0x72c   :  { %5567 = vmatprep.subr.bf16.mxu1 %v5979_v36 }
 0x72f   :  { %5568 = vmatpush3.bf16.msra.mxu1 %v4346_v35  ;;  %v4467_v35 = vld [vmem:[%s7852_s10 + $0x68] sm:$0xff] }
 0x730   :  { %5569 = vmatprep.subr.bf16.mxu1 %v5979_v36  ;;  %v5639_v56 = vpack.c.bf16 %v4467_v35, %v4466_v61 }
 0x731   :  { %v5555_v14 = vpop.f32.mrb[68].mxu0 }
 0x732   :  { %v4271_v26 = vadd.f32 %v5555_v14, %v7686_v48  ;;  %v4179_v18 = vpop.f32.mrb[69].mxu0  ;;  %v4468_v14 = vld [vmem:[%s7852_s10 + $0x70] sm:$0xff] }
 0x733   :  { %v4269_v37 = vadd.f32 %v7686_v48, %v4179_v18  ;;  %v5556_v21 = vpop.f32.mrb[70].mxu0 }
 0x734   :  { %v4272_v60 = vadd.f32 %v5556_v21, %v7686_v48  ;;  %v4182_v63 = vpop.f32.mrb[71].mxu0  ;;  %v4319_v54 = vmax.f32 %v4271_v26, 0.0  ;;  %v4469_v26 = vld [vmem:[%s7852_s10 + $0x78] sm:$0xff] }
 0x735   :  { %v4270_v17 = vadd.f32 %v7686_v48, %v4182_v63  ;;  %v4317_v39 = vmax.f32 %v4269_v37, 0.0  ;;  %v5642_v18 = vpack.c.bf16 %v4469_v26, %v4468_v14 }
 0x736   :  { %v4320_v41 = vmax.f32 %v4272_v60, 0.0 }
 0x737   :  { %v4318_v25 = vmax.f32 %v4270_v17, 0.0 }
 0x738   :  { %v4348_v57 = vpack.c.bf16 %v4320_v41, %v4319_v54 }
 0x739   :  { %v4347_v38 = vpack.c.bf16 %v4318_v25, %v4317_v39 }
 0x73b   :  { %5570 = vmatpush3.bf16.msra.mxu1 %v4347_v38  ;;  %v4652_v38 = vld [vmem:[%s7853_s11] ss:$0 sm:$0xff] }
 0x73c   :  { %5571 = vmatprep.subr.bf16.mxu1 %v5979_v36 }
 0x73f   :  { %5572 = vmatpush3.bf16.msra.mxu1 %v4348_v57 }
 0x740   :  { %5573 = vmatprep.subr.bf16.mxu1 %v5979_v36 }
 0x741   :  { %v5559_v20 = vpop.f32.mrb[72].mxu0 }
 0x742   :  { %v4275_v32 = vadd.f32 %v5559_v20, %v7686_v48  ;;  %v4195_v10 = vpop.f32.mrb[73].mxu0 }
 0x743   :  { %v4273_v6 = vadd.f32 %v7686_v48, %v4195_v10  ;;  %v5560_v33 = vpop.f32.mrb[74].mxu0 }
 0x744   :  { %v4276_v12 = vadd.f32 %v5560_v33, %v7686_v48  ;;  %v4198_v3 = vpop.f32.mrb[75].mxu0  ;;  %v4323_v51 = vmax.f32 %v4275_v32, 0.0 }
 0x745   :  { %v4274_v11 = vadd.f32 %v7686_v48, %v4198_v3  ;;  %v4321_v28 = vmax.f32 %v4273_v6, 0.0 }
 0x746   :  { %v4324_v16 = vmax.f32 %v4276_v12, 0.0 }
 0x747   :  { %v4322_v30 = vmax.f32 %v4274_v11, 0.0 }
 0x748   :  { %v4350_v34 = vpack.c.bf16 %v4324_v16, %v4323_v51 }
 0x749   :  { %v4349_v24 = vpack.c.bf16 %v4322_v30, %v4321_v28 }
 0x74b   :  { %5574 = vmatpush3.bf16.msra.mxu1 %v4349_v24 }
 0x74c   :  { %5575 = vmatprep.subr.bf16.mxu1 %v5979_v36 }
 0x74f   :  { %5576 = vmatpush3.bf16.msra.mxu1 %v4350_v34 }
 0x750   :  { %5577 = vmatprep.subr.bf16.mxu1 %v5979_v36 }
 0x751   :  { %v5563_v29 = vpop.f32.mrb[76].mxu0 }
 0x752   :  { %v4279_v22 = vadd.f32 %v5563_v29, %v7686_v48  ;;  %v4211_v55 = vpop.f32.mrb[77].mxu0 }
 0x753   :  { %v4277_v23 = vadd.f32 %v7686_v48, %v4211_v55  ;;  %v5564_v52 = vpop.f32.mrb[78].mxu0 }
 0x754   :  { %v4280_v49 = vadd.f32 %v5564_v52, %v7686_v48  ;;  %v4214_v46 = vpop.f32.mrb[79].mxu0  ;;  %v4327_v45 = vmax.f32 %v4279_v22, 0.0 }
 0x755   :  { %v4278_v40 = vadd.f32 %v7686_v48, %v4214_v46  ;;  %v4325_v44 = vmax.f32 %v4277_v23, 0.0  ;;  %v5981_v48 = vmov 0.0|0.0  }
 0x756   :  { %v4328_v7 = vmax.f32 %v4280_v49, 0.0 }
 0x757   :  { %v4326_v58 = vmax.f32 %v4278_v40, 0.0 }
 0x758   :  { %v4352_v1 = vpack.c.bf16 %v4328_v7, %v4327_v45 }
 0x759   :  { %v4351_v50 = vpack.c.bf16 %v4326_v58, %v4325_v44 }
 0x75b   :  { %5578 = vmatpush3.bf16.msra.mxu1 %v4351_v50 }
 0x75c   :  { %5579 = vmatprep.subr.bf16.mxu1 %v5979_v36 }
 0x75f   :  { %5580 = vmatpush3.bf16.msra.mxu1 %v4352_v1 }
 0x760   :  { %5620 = vmatprep.subr.bf16.mxu1 %v5981_v48 }
 0x762   :  { %5582 = vmatmul.mubr.bf16.vlgmr.msra.gmra.mrb[244].mxu1 %v7690_v8  ;;  %v4460_v8 = vld [vmem:[%s7852_s10 + $0x30] sm:$0xff]  ;;  %s5982_s10 = smov [#allocation8]  }
 0x763   :  { %5622 = vmatpush3.bf16.msra.mxu1 %v5621_v9  ;;  %5617 = vmatprep.mubr.msk.f32.mxu1 %vm5980_vm0, %v5979_v36  ;;  %v5630_v27 = vpack.c.bf16 %v4461_v15, %v4460_v8  ;;  %v5633_v36 = vpack.c.bf16 %v4463_v59, %v4462_v42  ;;  %s4567_s11 = sshll.u32 %s5982_s10, 4  ;;  %s4568_s11 = int_to_ptr.vmem [resolvable:$true] %s4567_s11 }
 0x764   :  { %5623 = vmatprep.subr.bf16.mxu1 %v5981_v48  ;;  %s5944_s5 = scalar_lea.vmem %s4568_s11, 64  ;;  %p5949_p11 = scmp.lt.s32.totalorder %s4568_s11, %s4568_s11 }
 0x765   :  { %p5945_p10 = scmp.ne.s32.totalorder %s4568_s11, %s5944_s5  ;;  %p5950_p12 = scmp.lt.s32.totalorder %s5944_s5, %s5944_s5 }
 0x767   :  { %5625 = vmatpush3.bf16.msra.mxu1 %v5624_v4  ;;  %p5951_p13 = por %p5950_p12, %p5949_p11 }
 0x768   :  { %5626 = vmatprep.subr.bf16.mxu1 %v5981_v48 }
 0x769   :  { %p5952_p0 = pnand %p5951_p13, %p5945_p10 }
 0x76b   :  { %5628 = vmatpush3.bf16.msra.mxu1 %v5627_v53 }
 0x76c   :  { %5629 = vmatprep.subr.bf16.mxu1 %v5981_v48 }
 0x76f   :  { %5631 = vmatpush3.bf16.msra.mxu1 %v5630_v27 }
 0x770   :  { %5632 = vmatprep.subr.bf16.mxu1 %v5981_v48 }
 0x773   :  { %5634 = vmatpush3.bf16.msra.mxu1 %v5633_v36 }
 0x774   :  { %5635 = vmatprep.subr.bf16.mxu1 %v5981_v48 }
 0x777   :  { %5637 = vmatpush3.bf16.msra.mxu1 %v5636_v2 }
 0x778   :  { %5638 = vmatprep.subr.bf16.mxu1 %v5981_v48 }
 0x77b   :  { %5640 = vmatpush3.bf16.msra.mxu1 %v5639_v56 }
 0x77c   :  { %5641 = vmatprep.subr.bf16.mxu1 %v5981_v48 }
 0x77f   :  { %5643 = vmatpush3.bf16.msra.mxu1 %v5642_v18 }
 0x7fa   :  { %v4957_v37 = vpop.f32.mrb[240].mxu1 }
 0x7fb   :  { %v4958_v21 = vpop.f32.mrb[241].mxu1 }
 0x7fc   :  { %v4959_v60 = vadd.f32 %v4958_v21, %v4957_v37  ;;  %v4960_v63 = vpop.f32.mrb[242].mxu1 }
 0x7fd   :  { %v4961_v17 = vpop.f32.mrb[243].mxu1 }
 0x835   :  { %v4448_v54 = vpop.f32.mrb[244].mxu1 }
 0x836   :  { %v4449_v41 = vadd.f32 %v4959_v60, %v4448_v54  ;;  %v5583_v39 = vpop.f32.mrb[245].mxu1 }
 0x837   :  { %v4451_v25 = vpop.f32.mrb[246].mxu1 }
 0x838   :  { %5618 = vmatmul.mubr.f32.vlgmr.msra.gmra.mrb[248].mxu1 %v4449_v41  ;;  %v5584_v57 = vpop.f32.mrb[247].mxu1 }
 0x90b   :  { %v4543_v20 = vpop.f32.mrb[248].mxu1 }
 0x90c   :  { %v4544_v32 = vadd.f32 %v4652_v38, %v4543_v20  ;;  %v5619_v10 = vpop.f32.mrb[249].mxu1 }
 0x90e   :  { %v4548_v6 = vsel %vm4547_vm1, %v4544_v32, -inf }
 0x90f   :  { %4549 = vmax.xlane.f32.xlu0 %v4548_v6 }
 0x99c   :  { %v4550_v33 = vpop.xlane.xlu0 %4549 }
 0x99d   :  { %v4551_v12 = vsub.f32 %v4544_v32, %v4550_v33 }
 0x99f   :  { %v4552_v3 = vmul.f32 1.442695, %v4551_v12 }
 0x9a1   :  { %5874 = vpow2.f32 %v4552_v3 }
 0x9ab   :  { %v5875_v11 = vpop.eup %5874 }
 0x9ac   :  { %v4554_v51 = vsel %vm4547_vm1, %v5875_v11, 0.0 }
 0x9ad   :  { %4555 = vadd.xlane.f32.xlu1 %v4554_v51 }
 0xa3a   :  { %v4556_v16 = vpop.xlane.xlu1 %4555 }
 0xa3b   :  { %5876 = vlog2.f32 %v4556_v16 }
 0xa45   :  { %v5877_v28 = vpop.eup %5876 }
 0xa46   :  { %v4558_v30 = vmul.f32 0.6931472, %v5877_v28 }
 0xa48   :  { %v4559_v34 = vsub.f32 %v4551_v12, %v4558_v30 }
 0xa4a   :  { %4560 = vst.msk [vmem:[#allocation8] sm:$0xf] %vm4547_vm1, %v4559_v34 }
 0xa4b   :  { %5955 = shalt.err (!%p5952_p0)
}
 0xa4c   :  { %s5956_s30 = scalar_lea.hbm %s7854_s12, 64 }
 0xa4d   :  { %p5957_p1 = scmp.ne.s32.totalorder %s7854_s12, %s5956_s30  ;;  %p5960_p2 = scmp.lt.u32.totalorder %s5956_s30, %s7854_s12 }
 0xa4f   :  { %p5962_p3 = pnand %p5960_p2, %p5957_p1 }
 0xa51   :  { %5965 = shalt.err (!%p5962_p3)
}
 0xa52   :  { %4570 = dma.vmem_to_hbm [thread:$0]  %s4568_s11, 64, %s7854_s12, [#allocation4]  }
 0xa53   :  { %5970 = dma.done.wait [#allocation4], 64  }
 0xa54   :  { %5971 = vsyncadd [#allocation4], 4294967232 }
 0xa55   :  { %4574 = vsyncpa [#allocation3], 1 }
 0xa56   :  { %4575 = vsyncpa [#allocation6], 1 }
 0xa57   :  { %4576 = vsyncpa [#allocation4], 1 }

</bundles_post_ra>
